<compile_context>
chip_gen: v6e
topology: v6e:2x2x1
jax: 0.10.0
libtpu: 0.0.40
codegen_flags: <defaults>
</compile_context>

<pallas_src>
import functools

import numpy as np
import jax
import jax.numpy as jnp
from jax import lax
from jax.experimental import pallas as pl
from jax.experimental.pallas import tpu as pltpu

BN_EPS = 1e-5


# --------------------------------------------------------------------------------------
# Fused kernel: Conv3x3 (BN folded) + ReLU6 + [dropout=id] + Conv1x1 + bilinear resize
# --------------------------------------------------------------------------------------
def _auxhead_kernel(x_ref, w1_ref, b1_ref, w2_ref, mt_ref, o_ref, feat_ref, *,
                    tile_r, W, C, NC):
    r = pl.program_id(1)
    m = tile_r * W
    row0 = r * tile_r          # first output row of this tile (== padded-input start row)
    out_row0 = r * m           # first flattened (y*W + x) row of this tile
    if tile_r % 8 == 0:
        row0 = pl.multiple_of(row0, 8)
    if m % 8 == 0:
        out_row0 = pl.multiple_of(out_row0, 8)

    # One halo'd tile load per grid step (tile_r + 2 padded rows).
    tile = x_ref[pl.ds(row0, tile_r + 2), :, :]                      # (tile_r+2, W+2, C) bf16

    # Merge the three dy taps along the channel (lane) axis -> contraction depth 3C.
    slab = jnp.concatenate(
        [tile[0:tile_r], tile[1:tile_r + 1], tile[2:tile_r + 2]],
        axis=-1)                                                     # (tile_r, W+2, 3C)

    # Three dx taps instead of nine: (m, 3C) @ (3C, C) bf16 MXU matmuls, f32 accumulation.
    acc = None
    for dx in range(3):
        win = slab[:, dx:dx + W, :].reshape(m, 3 * C)                # leading-dim collapse only
        part = jnp.dot(win, w1_ref[dx], preferred_element_type=jnp.float32)
        acc = part if acc is None else acc + part

    # Folded-BN bias + ReLU6 (f32 epilogue; cast to bf16 only right before the matmul).
    acc = jnp.clip(acc + b1_ref[...], 0.0, 6.0)
    # TODO(synk): nn.Dropout(0.1) is identity at inference; a training-mode mask
    # (pltpu.prng_random_bits) is not implemented here.

    # 1x1 class projection; logits stay resident in VMEM (never round-trip HBM).
    feat_ref[pl.ds(out_row0, m), :] = jnp.dot(
        acc.astype(jnp.bfloat16), w2_ref[...],
        preferred_element_type=jnp.float32)                          # (m, NC)

    # After the last row tile of this image: fused bilinear resize as one matmul
    # against the precomputed kron(mh, mw) interpolation matrix.
    @pl.when(r == pl.num_programs(1) - 1)
    def _():
        o_ref[...] = jnp.dot(mt_ref[...], feat_ref[...],
                             preferred_element_type=jnp.float32)     # (h*w, NC)


# --------------------------------------------------------------------------------------
# Glue helpers
# --------------------------------------------------------------------------------------
def _fold_bn(w, bn):
    """Fold eval-mode BatchNorm into conv weight (kh,kw,Cin,Cout) and a bias."""
    gamma, beta, mean, var = bn
    scale = gamma / jnp.sqrt(var + BN_EPS)
    return w * scale, beta - mean * scale


def _bilinear_matrix(out_size, in_size):
    """PyTorch F.interpolate(mode='bilinear', align_corners=False) as a (out,in) matrix."""
    m = np.zeros((out_size, in_size), np.float32)
    scale = in_size / out_size
    for i in range(out_size):
        src = max((i + 0.5) * scale - 0.5, 0.0)
        i0 = min(int(np.floor(src)), in_size - 1)
        i1 = min(i0 + 1, in_size - 1)
        frac = src - i0
        m[i, i0] += 1.0 - frac
        m[i, i1] += frac
    return m


def _pick_row_tile(H, W, cap=256):
    """Largest divisor of H keeping the per-step matmul M dim (tile*W) <= cap."""
    best = 1
    for t in range(1, H + 1):
        if H % t == 0 and t * W <= cap:
            best = t
    return best


# --------------------------------------------------------------------------------------
# Forward pass
# --------------------------------------------------------------------------------------
def auxhead_forward(x_nchw, params, h, w):
    B, C, H, W = x_nchw.shape
    NC = params["w2"].shape[-1]

    # NCHW -> NHWC once, bf16 activations, one zero pad for the 3x3 conv (padding=1).
    x = jnp.transpose(x_nchw, (0, 2, 3, 1)).astype(jnp.bfloat16)
    xp = jnp.pad(x, ((0, 0), (1, 1), (1, 1), (0, 0)))

    # Fold BN into the conv and pre-merge the dy taps: (3, 3, C, C) -> (dx, dy*C, C).
    w1, b1 = _fold_bn(params["conv_w"].astype(jnp.float32), params["bn"])
    w1m = jnp.transpose(w1, (1, 0, 2, 3)).reshape(3, 3 * C, C).astype(jnp.bfloat16)
    b1 = b1.reshape(1, C).astype(jnp.float32)
    w2 = params["w2"].astype(jnp.bfloat16)

    # Whole separable bilinear resize (align_corners=False) as one (h*w, H*W) matrix.
    # TODO(synk): for large H/W/h/w this kron matrix grows as (h*w)*(H*W); switch to
    # two separable resize matmuls in that regime.
    mt = jnp.asarray(np.kron(_bilinear_matrix(h, H), _bilinear_matrix(w, W)))

    tile_r = _pick_row_tile(H, W)
    # VMEM note: the padded image stays resident per batch (fine at these sizes);
    # for big H*W*C switch to halo'd row-tile input blocks / raise vmem_limit_bytes
    # (v7x: 32 MiB scoped default, v5e: 16 MiB).
    out_flat = pl.pallas_call(
        functools.partial(_auxhead_kernel, tile_r=tile_r, W=W, C=C, NC=NC),
        out_shape=jax.ShapeDtypeStruct((B, h * w, NC), jnp.float32),
        grid=(B, H // tile_r),
        in_specs=[
            pl.BlockSpec((None, H + 2, W + 2, C), lambda b, r: (b, 0, 0, 0)),
            pl.BlockSpec((3, 3 * C, C), lambda b, r: (0, 0, 0)),
            pl.BlockSpec((1, C), lambda b, r: (0, 0)),
            pl.BlockSpec((C, NC), lambda b, r: (0, 0)),
            pl.BlockSpec((h * w, H * W), lambda b, r: (0, 0)),
        ],
        out_specs=pl.BlockSpec((None, h * w, NC), lambda b, r: (b, 0, 0)),
        scratch_shapes=[pltpu.VMEM((H * W, NC), jnp.float32)],
        compiler_params=pltpu.CompilerParams(
            dimension_semantics=("parallel", "arbitrary")),
    )(xp, w1m, b1, w2, mt)

    # (B, h*w, NC) -> (B, NC, h, w): one tiny final layout op on the resized logits.
    return out_flat.reshape(B, h, w, NC).transpose(0, 3, 1, 2)


# --------------------------------------------------------------------------------------
# Pure-JAX f32 reference (validation only)
# --------------------------------------------------------------------------------------
def auxhead_reference(x_nchw, params, h, w):
    x = x_nchw.astype(jnp.float32)
    wq = jnp.transpose(params["conv_w"], (3, 2, 0, 1))               # OIHW
    y = lax.conv_general_dilated(x, wq, (1, 1), ((1, 1), (1, 1)),
                                 dimension_numbers=("NCHW", "OIHW", "NCHW"),
                                 precision=lax.Precision.HIGHEST)
    gamma, beta, mean, var = params["bn"]
    scale = gamma / jnp.sqrt(var + BN_EPS)
    y = y * scale[None, :, None, None] + (beta - mean * scale)[None, :, None, None]
    y = jnp.clip(y, 0.0, 6.0)
    y = jnp.einsum("bchw,cn->bnhw", y, params["w2"],
                   precision=lax.Precision.HIGHEST)
    mh = jnp.asarray(_bilinear_matrix(h, x.shape[2]))
    mw = jnp.asarray(_bilinear_matrix(w, x.shape[3]))
    return jnp.einsum("ip,jq,bnpq->bnij", mh, mw, y,
                      precision=lax.Precision.HIGHEST)


# --------------------------------------------------------------------------------------
if __name__ == "__main__":
    B, C, H, W = 2, 64, 16, 16           # module default in_channels=64
    NUM_CLASSES = 8                      # module default num_classes=8
    OUT_H, OUT_W = 32, 32                # forward(x, h, w)

    key = jax.random.PRNGKey(0)
    kx, kw1, kg, kb, km, kv, kw2 = jax.random.split(key, 7)
    x = jax.random.normal(kx, (B, C, H, W), jnp.float32)
    params = {
        "conv_w": jax.random.normal(kw1, (3, 3, C, C), jnp.float32) / np.sqrt(9 * C),
        "bn": (1.0 + 0.05 * jax.random.normal(kg, (C,), jnp.float32),          # gamma
               0.05 * jax.random.normal(kb, (C,), jnp.float32),                # beta
               0.05 * jax.random.normal(km, (C,), jnp.float32),                # running_mean
               1.0 + 0.05 * jnp.abs(jax.random.normal(kv, (C,), jnp.float32))),  # running_var
        "w2": jax.random.normal(kw2, (C, NUM_CLASSES), jnp.float32) / np.sqrt(C),
    }

    fwd = jax.jit(auxhead_forward, static_argnums=(2, 3))
    out = jax.block_until_ready(fwd(x, params, OUT_H, OUT_W))

    assert out.shape == (B, NUM_CLASSES, OUT_H, OUT_W), out.shape
    assert bool(jnp.all(jnp.isfinite(out)))

    ref = auxhead_reference(x, params, OUT_H, OUT_W)
    err = float(jnp.max(jnp.abs(out - ref)))
    assert err < 2e-1, f"max abs err vs f32 reference: {err}"
    print("KERNEL_OK")
</pallas_src>

<mosaic_0001>
module attributes {stable_mosaic.version = 11 : i64} {
  func.func @_auxhead_kernel(%arg0: i32, %arg1: i32, %arg2: memref<1x18x18x64xbf16, #tpu.memory_space<vmem>>, %arg3: memref<3x192x64xbf16, #tpu.memory_space<vmem>>, %arg4: memref<1x64xf32, #tpu.memory_space<vmem>>, %arg5: memref<64x8xbf16, #tpu.memory_space<vmem>>, %arg6: memref<1024x256xf32, #tpu.memory_space<vmem>>, %arg7: memref<1x1024x8xf32, #tpu.memory_space<vmem>>, %arg8: memref<256x8xf32, #tpu.memory_space<vmem>>) attributes {dimension_semantics = [#tpu.dimension_semantics<parallel>, #tpu.dimension_semantics<arbitrary>], iteration_bounds = array<i64: 2, 1>, scalar_prefetch = 0 : i64, scratch_operands = 1 : i64, tpu.core_type = #tpu.core_type<tc>, window_params = [{transform_indices = @transform_0, window_bounds = array<i64: 1, 18, 18, 64>}, {pipeline_mode = #tpu.pipeline_mode<synchronous>, transform_indices = @transform_1, window_bounds = array<i64: 3, 192, 64>}, {pipeline_mode = #tpu.pipeline_mode<synchronous>, transform_indices = @transform_2, window_bounds = array<i64: 1, 64>}, {pipeline_mode = #tpu.pipeline_mode<synchronous>, transform_indices = @transform_3, window_bounds = array<i64: 64, 8>}, {pipeline_mode = #tpu.pipeline_mode<synchronous>, transform_indices = @transform_4, window_bounds = array<i64: 1024, 256>}, {transform_indices = @transform_5, window_bounds = array<i64: 1, 1024, 8>}]} {
    %c16_i32 = arith.constant 16 : i32
    %0 = arith.muli %arg1, %c16_i32 : i32
    %c256_i32 = arith.constant 256 : i32
    %1 = arith.muli %arg1, %c256_i32 : i32
    %2 = tpu.assume_multiple %0, 8 : i32
    %3 = tpu.assume_multiple %1, 8 : i32
    %c0 = arith.constant 0 : index
    %4 = arith.index_cast %2 : i32 to index
    %c0_0 = arith.constant 0 : index
    %c0_1 = arith.constant 0 : index
    %5 = vector.load %arg2[%c0, %4, %c0_0, %c0_1] : memref<1x18x18x64xbf16, #tpu.memory_space<vmem>>, vector<1x18x18x64xbf16>
    %6 = vector.shape_cast %5 : vector<1x18x18x64xbf16> to vector<18x18x64xbf16>
    %7 = vector.extract_strided_slice %6 {offsets = [0, 0, 0], sizes = [16, 18, 64], strides = [1, 1, 1]} : vector<18x18x64xbf16> to vector<16x18x64xbf16>
    %8 = vector.extract_strided_slice %6 {offsets = [1, 0, 0], sizes = [16, 18, 64], strides = [1, 1, 1]} : vector<18x18x64xbf16> to vector<16x18x64xbf16>
    %9 = vector.extract_strided_slice %6 {offsets = [2, 0, 0], sizes = [16, 18, 64], strides = [1, 1, 1]} : vector<18x18x64xbf16> to vector<16x18x64xbf16>
    %10 = tpu.concatenate %7, %8, %9 in 2 : vector<16x18x64xbf16>, vector<16x18x64xbf16>, vector<16x18x64xbf16> -> vector<16x18x192xbf16>
    %11 = vector.extract_strided_slice %10 {offsets = [0, 0, 0], sizes = [16, 16, 192], strides = [1, 1, 1]} : vector<16x18x192xbf16> to vector<16x16x192xbf16>
    %12 = vector.shape_cast %11 : vector<16x16x192xbf16> to vector<256x192xbf16>
    %c0_2 = arith.constant 0 : index
    %c0_3 = arith.constant 0 : index
    %c0_4 = arith.constant 0 : index
    %13 = vector.load %arg3[%c0_2, %c0_3, %c0_4] : memref<3x192x64xbf16, #tpu.memory_space<vmem>>, vector<1x192x64xbf16>
    %14 = vector.shape_cast %13 : vector<1x192x64xbf16> to vector<192x64xbf16>
    %cst = arith.constant dense<0.000000e+00> : vector<256x64xf32>
    %15 = tpu.matmul %12, %14, %cst {dimension_numbers = #tpu.dot_dimension_numbers<[1], [0], [0], [1], [0, 0, 1, 1], [], []>} : vector<256x192xbf16>, vector<192x64xbf16>, vector<256x64xf32> -> vector<256x64xf32>
    %16 = vector.extract_strided_slice %10 {offsets = [0, 1, 0], sizes = [16, 16, 192], strides = [1, 1, 1]} : vector<16x18x192xbf16> to vector<16x16x192xbf16>
    %17 = vector.shape_cast %16 : vector<16x16x192xbf16> to vector<256x192xbf16>
    %c1 = arith.constant 1 : index
    %c0_5 = arith.constant 0 : index
    %c0_6 = arith.constant 0 : index
    %18 = vector.load %arg3[%c1, %c0_5, %c0_6] : memref<3x192x64xbf16, #tpu.memory_space<vmem>>, vector<1x192x64xbf16>
    %19 = vector.shape_cast %18 : vector<1x192x64xbf16> to vector<192x64xbf16>
    %cst_7 = arith.constant dense<0.000000e+00> : vector<256x64xf32>
    %20 = tpu.matmul %17, %19, %cst_7 {dimension_numbers = #tpu.dot_dimension_numbers<[1], [0], [0], [1], [0, 0, 1, 1], [], []>} : vector<256x192xbf16>, vector<192x64xbf16>, vector<256x64xf32> -> vector<256x64xf32>
    %21 = arith.addf %15, %20 : vector<256x64xf32>
    %22 = vector.extract_strided_slice %10 {offsets = [0, 2, 0], sizes = [16, 16, 192], strides = [1, 1, 1]} : vector<16x18x192xbf16> to vector<16x16x192xbf16>
    %23 = vector.shape_cast %22 : vector<16x16x192xbf16> to vector<256x192xbf16>
    %c2 = arith.constant 2 : index
    %c0_8 = arith.constant 0 : index
    %c0_9 = arith.constant 0 : index
    %24 = vector.load %arg3[%c2, %c0_8, %c0_9] : memref<3x192x64xbf16, #tpu.memory_space<vmem>>, vector<1x192x64xbf16>
    %25 = vector.shape_cast %24 : vector<1x192x64xbf16> to vector<192x64xbf16>
    %cst_10 = arith.constant dense<0.000000e+00> : vector<256x64xf32>
    %26 = tpu.matmul %23, %25, %cst_10 {dimension_numbers = #tpu.dot_dimension_numbers<[1], [0], [0], [1], [0, 0, 1, 1], [], []>} : vector<256x192xbf16>, vector<192x64xbf16>, vector<256x64xf32> -> vector<256x64xf32>
    %27 = arith.addf %21, %26 : vector<256x64xf32>
    %c0_11 = arith.constant 0 : index
    %c0_12 = arith.constant 0 : index
    %28 = vector.load %arg4[%c0_11, %c0_12] : memref<1x64xf32, #tpu.memory_space<vmem>>, vector<1x64xf32>
    %29 = vector.broadcast %28 : vector<1x64xf32> to vector<256x64xf32>
    %30 = arith.addf %27, %29 : vector<256x64xf32>
    %cst_13 = arith.constant 0.000000e+00 : f32
    %cst_14 = arith.constant 6.000000e+00 : f32
    %31 = vector.broadcast %cst_13 : f32 to vector<256x64xf32>
    %32 = arith.maximumf %31, %30 : vector<256x64xf32>
    %33 = vector.broadcast %cst_14 : f32 to vector<256x64xf32>
    %34 = arith.minimumf %33, %32 : vector<256x64xf32>
    %35 = arith.truncf %34 : vector<256x64xf32> to vector<256x64xbf16>
    %c0_15 = arith.constant 0 : index
    %c0_16 = arith.constant 0 : index
    %36 = vector.load %arg5[%c0_15, %c0_16] : memref<64x8xbf16, #tpu.memory_space<vmem>>, vector<64x8xbf16>
    %cst_17 = arith.constant dense<0.000000e+00> : vector<256x8xf32>
    %37 = tpu.matmul %35, %36, %cst_17 {dimension_numbers = #tpu.dot_dimension_numbers<[1], [0], [0], [1], [0, 0, 1, 1], [], []>} : vector<256x64xbf16>, vector<64x8xbf16>, vector<256x8xf32> -> vector<256x8xf32>
    %38 = arith.index_cast %3 : i32 to index
    %c0_18 = arith.constant 0 : index
    %39 = vector.load %arg8[%38, %c0_18] : memref<256x8xf32, #tpu.memory_space<vmem>>, vector<256x8xf32>
    tpu.vector_store %arg8[%38, %c0_18], %37 {strides = array<i32>} : memref<256x8xf32, #tpu.memory_space<vmem>>, vector<256x8xf32>,
    %c0_i32 = arith.constant 0 : i32
    %40 = arith.cmpi eq, %arg1, %c0_i32 : i32
    %41 = arith.extui %40 : i1 to i32
    %c0_i32_19 = arith.constant 0 : i32
    %42 = arith.cmpi ne, %41, %c0_i32_19 : i32
    scf.if %42 {
      %c0_20 = arith.constant 0 : index
      %c0_21 = arith.constant 0 : index
      %43 = vector.load %arg6[%c0_20, %c0_21] : memref<1024x256xf32, #tpu.memory_space<vmem>>, vector<1024x256xf32>
      %c0_22 = arith.constant 0 : index
      %c0_23 = arith.constant 0 : index
      %44 = vector.load %arg8[%c0_22, %c0_23] : memref<256x8xf32, #tpu.memory_space<vmem>>, vector<256x8xf32>
      %cst_24 = arith.constant dense<0.000000e+00> : vector<1024x8xf32>
      %45 = tpu.matmul %43, %44, %cst_24 {dimension_numbers = #tpu.dot_dimension_numbers<[1], [0], [0], [1], [0, 0, 1, 1], [], []>} : vector<1024x256xf32>, vector<256x8xf32>, vector<1024x8xf32> -> vector<1024x8xf32>
      %c0_25 = arith.constant 0 : index
      %c0_26 = arith.constant 0 : index
      %c0_27 = arith.constant 0 : index
      %46 = vector.load %arg7[%c0_25, %c0_26, %c0_27] : memref<1x1024x8xf32, #tpu.memory_space<vmem>>, vector<1x1024x8xf32>
      %47 = vector.shape_cast %46 : vector<1x1024x8xf32> to vector<1024x8xf32>
      %48 = vector.shape_cast %45 : vector<1024x8xf32> to vector<1x1024x8xf32>
      tpu.vector_store %arg7[%c0_25, %c0_26, %c0_27], %48 {strides = array<i32>} : memref<1x1024x8xf32, #tpu.memory_space<vmem>>, vector<1x1024x8xf32>,
    } else {
    }
    return
  }
  func.func @transform_0(%arg0: i32, %arg1: i32) -> (i32, i32, i32, i32) {
    %c0_i32 = arith.constant 0 : i32
    %c0_i32_0 = arith.constant 0 : i32
    %c0_i32_1 = arith.constant 0 : i32
    %c0_i32_2 = arith.constant 0 : i32
    return %arg0, %c0_i32, %c0_i32_0, %c0_i32_1 : i32, i32, i32, i32
  }
  func.func @transform_1(%arg0: i32, %arg1: i32) -> (i32, i32, i32) {
    %c0_i32 = arith.constant 0 : i32
    %c0_i32_0 = arith.constant 0 : i32
    %c0_i32_1 = arith.constant 0 : i32
    %c0_i32_2 = arith.constant 0 : i32
    return %c0_i32, %c0_i32_0, %c0_i32_1 : i32, i32, i32
  }
  func.func @transform_2(%arg0: i32, %arg1: i32) -> (i32, i32) {
    %c0_i32 = arith.constant 0 : i32
    %c0_i32_0 = arith.constant 0 : i32
    %c0_i32_1 = arith.constant 0 : i32
    return %c0_i32, %c0_i32_0 : i32, i32
  }
  func.func @transform_3(%arg0: i32, %arg1: i32) -> (i32, i32) {
    %c0_i32 = arith.constant 0 : i32
    %c0_i32_0 = arith.constant 0 : i32
    %c0_i32_1 = arith.constant 0 : i32
    return %c0_i32, %c0_i32_0 : i32, i32
  }
  func.func @transform_4(%arg0: i32, %arg1: i32) -> (i32, i32) {
    %c0_i32 = arith.constant 0 : i32
    %c0_i32_0 = arith.constant 0 : i32
    %c0_i32_1 = arith.constant 0 : i32
    return %c0_i32, %c0_i32_0 : i32, i32
  }
  func.func @transform_5(%arg0: i32, %arg1: i32) -> (i32, i32, i32) {
    %c0_i32 = arith.constant 0 : i32
    %c0_i32_0 = arith.constant 0 : i32
    %c0_i32_1 = arith.constant 0 : i32
    return %arg0, %c0_i32, %c0_i32_0 : i32, i32, i32
  }
}

</mosaic_0001>

<bundles_post_ra>
// kernel: auxhead_forward.1
= control target key start
LH: loop header
LB: loop body
LE: loop exit
PB: predicated region body
PF: predicated region fallthrough
CT: control target
= control target key end

     0   :  { %s4138_s18 = smov 0   ;;  %s4140_s19 = smov 0   ;;  %s6220_s0 = inlined_call_operand.vmem [shape: bf16[2,18,18,64], index: 0, kind: input, shape index: {}]   ;;  %s6221_s1 = inlined_call_operand.vmem [shape: bf16[3,192,64], index: 1, kind: input, shape index: {}]   ;;  %s6222_s2 = inlined_call_operand.vmem [shape: f32[1,64], index: 2, kind: input, shape index: {}]   ;;  %s6223_s3 = inlined_call_operand.vmem [shape: bf16[64,8], index: 3, kind: input, shape index: {}]   ;;  %s6224_s4 = inlined_call_operand.vmem [shape: f32[1024,256], index: 4, kind: input, shape index: {}]   ;;  %s6225_s5 = inlined_call_operand.vmem [shape: f32[2,1024,8], index: 5, kind: output, shape index: {}]  }
   0x1   :  { %s4142_s20 = smov 0  }
   0x2 LB: > { %s27_s21 = sadd.s32 1, %s4099_s19  ;;  %p3627_p0 = scmp.ge.s32.totalorder %s4103_s20, 1  ;;  %s4103_s20 = sphi %s4142_s20, %s15_s20   ;;  %s4099_s19 = sphi %s4140_s19, %s6227_s19   ;;  %s4095_s18 = sphi %s4138_s18, %s6226_s18  }
   0x3   : > { %p29_p1 = scmp.ge.s32.totalorder %s27_s21, 2  ;;  %p199_p2 = scmp.lt.s32.totalorder %s4103_s20, 3 }
   0x5   : > { %s6229_s21 = smov (%p29_p1, %s27_s21), 0  ;;  %p200_p3 = pnand %p3627_p0, %p199_p2 }
   0x6   : > { %p227_p4 = scmp.lt.s32.totalorder (!%p200_p3), %s4095_s18, 1  ;;  %s4106_s11 = smov (!%p200_p3), 64  }
   0x7   : > { %203 = sbr.rel (%p200_p3) target bundleno = 1312 (0x520), region = 40 }
   0xc   : > { %v3993_v0 = vld [vmem:[%s6221_s1 + $0x38] sm:$0xff]   ;;  %v4105_v1 = vmov 0   ;;  %s6231_s18 = smov (!%p227_p4, %s4095_s18), 1  ;;  %v3995_v2 = vld [vmem:[%s6221_s1 + $0x30] sm:$0xff]   ;;  %v3997_v4 = vld [vmem:[%s6221_s1 + $0x28] sm:$0xff]   ;;  %vm505_vm0 = vcmask 523264  }
   0xd   : > { %1393 = vmatprep.subr.bf16.mxu1 %v4105_v1  ;;  %1128 = vmatprep.subr.bf16.mxu0 %v4105_v1  ;;  %s3947_s26 = smul.u32 216, %s6231_s18  ;;  %v3998_v3 = vld [vmem:[%s6221_s1 + $0x98] sm:$0xff]   ;;  %v4001_v5 = vld [vmem:[%s6221_s1 + $0x90] sm:$0xff]   ;;  %v4000_v10 = vld [vmem:[%s6221_s1 + $0x20] sm:$0xff]   ;;  %vm642_vm1 = vsmask.f32 7424 }
   0xe   : > { %1394 = vmatpush1.bf16.msra.mxu1 %v3993_v0  ;;  %1129 = vmatpush1.bf16.msra.mxu0 %v3998_v3  ;;  %v4003_v18 = vld [vmem:[%s6221_s1 + $0x18] sm:$0xff]   ;;  %v4004_v20 = vld [vmem:[%s6221_s1 + $0x88] sm:$0xff]   ;;  %v4006_v22 = vld [vmem:[%s6221_s1 + $0x10] sm:$0xff]   ;;  %vm1586_vm2 = vcmask 1046528   ;;  %vm2398_vm3 = vcmask 64512   ;;  %s3822_s14 = sshll.u32 %s6231_s18, 10 }
   0xf   : > { %1395 = vmatprep.subr.bf16.mxu1 %v4105_v1  ;;  %s4177_s8 = scalar_lea.vmem %s6220_s0, %s3947_s26  ;;  %1130 = vmatprep.subr.bf16.mxu0 %v4105_v1  ;;  %v4007_v23 = vld [vmem:[%s6221_s1 + $0x80] sm:$0xff]   ;;  %v4009_v25 = vld [vmem:[%s6221_s1 + $0x8] sm:$0xff]   ;;  %v4010_v27 = vld [vmem:[%s6221_s1 + $0x78] sm:$0xff]   ;;  %s5773_s25 = scalar_lea.vmem %s6225_s5, %s3822_s14 }
  0x10   : > { %v4183_v6 = vld [vmem:[%s4177_s8 + $0xc] sm:$0xff]   ;;  %v4188_v7 = vld [vmem:[%s4177_s8 + $0x18] sm:$0xff]   ;;  %v4193_v8 = vld [vmem:[%s4177_s8 + $0x14] ss:$0 sps:$4 sm:$0x11]  }
  0x11   : > { %433 = vrot.lane.b32.xlu0 %v4183_v6, %s4106_s11  ;;  %437 = vrot.lane.b32.xlu1 %v4188_v7, %s4106_s11  ;;  %v4198_v9 = vld [vmem:[%s4177_s8 + $0x20] ss:$0 sps:$4 sm:$0x11]   ;;  %v4205_v11 = vld [vmem:[%s4177_s8 + $0x24] sm:$0xff]   ;;  %v655_v38 = vshll.u32 %v4188_v7, 16  ;;  %v653_v42 = vshrl.u32 %v4188_v7, 16 }
  0x12   : > { %1396 = vmatpush1.bf16.msra.mxu1 %v3995_v2  ;;  %1131 = vmatpush1.bf16.msra.mxu0 %v4001_v5  ;;  %v4215_v12 = vld [vmem:[%s4177_s8 + $0x2c] ss:$0 sps:$4 sm:$0x11]   ;;  %v4221_v13 = vld [vmem:[%s4177_s8 + $0x30] sm:$0xff]   ;;  %v4229_v15 = vld [vmem:[%s4177_s8 + $0x3c] sm:$0xff]   ;;  %v659_v43 = vshll.u32 %v4198_v9, 16 }
  0x13   : > { %1397 = vmatprep.subr.bf16.mxu1 %v4105_v1  ;;  %1132 = vmatprep.subr.bf16.mxu0 %v4105_v1  ;;  %v4224_v14 = vld [vmem:[%s4177_s8 + $0x38] ss:$0 sps:$4 sm:$0x11]   ;;  %v4236_v16 = vld [vmem:[%s4177_s8 + $0x44] ss:$0 sps:$4 sm:$0x11]  }
  0x14   : > { %3731 = vmatprep.mubr.msk.bf16.mxu1 %vm505_vm0, %v4188_v7  ;;  %v4239_v17 = vld [vmem:[%s4177_s8 + $0x48] sm:$0xff]   ;;  %v4247_v19 = vld [vmem:[%s4177_s8 + $0x50] ss:$0 sps:$4 sm:$0x11]   ;;  %v4255_v21 = vld [vmem:[%s4177_s8 + $0x54] sm:$0xff]   ;;  %v657_v45 = vrot.slane %v655_v38, 1 }
  0x15   : > { %435 = vrot.lane.b32.xlu0 %v4193_v8, %s4106_s11  ;;  %439 = vrot.lane.b32.xlu1 %v4198_v9, %s4106_s11  ;;  %v4270_v24 = vld [vmem:[%s4177_s8 + $0x5c] ss:$0 sps:$4 sm:$0x11]   ;;  %v4277_v26 = vld [vmem:[%s4177_s8 + $0x68] ss:$0 sps:$4 sm:$0x11]  }
  0x16   : > { %1398 = vmatpush1.bf16.msra.mxu1 %v3997_v4  ;;  %1133 = vmatpush1.bf16.msra.mxu0 %v4004_v20  ;;  %v4286_v28 = vld [vmem:[%s4177_s8 + $0x60] sm:$0xff]   ;;  %v4013_v30 = vld [vmem:[%s6221_s1 + $0x70] sm:$0xff]   ;;  %v4015_v33 = vld [vmem:[%s6221_s1 + $0x58] sm:$0xff]   ;;  %v658_v50 = vor.u32 %v657_v45, %v653_v42  ;;  %v661_v51 = vrot.slane %v659_v43, 1  ;;  %v675_v0 = vshll.u32 %v4205_v11, 16  ;;  %v673_v4 = vshrl.u32 %v4205_v11, 16 }
  0x17   : > { %1399 = vmatprep.subr.bf16.mxu1 %v4105_v1  ;;  %1134 = vmatprep.subr.bf16.mxu0 %v4105_v1  ;;  %v4012_v29 = vld [vmem:[%s6221_s1] sm:$0xff]   ;;  %v4298_v31 = vld [vmem:[%s4177_s8 + $0x74] ss:$0 sps:$4 sm:$0x11]   ;;  %v4304_v32 = vld [vmem:[%s4177_s8 + $0x6c] sm:$0xff]  }
  0x18   : > { %v4016_v34 = vld [vmem:[%s6221_s1 + $0x68] sm:$0xff]   ;;  %v4316_v35 = vld [vmem:[%s4177_s8 + $0x80] ss:$0 sps:$4 sm:$0x11]   ;;  %v4322_v36 = vld [vmem:[%s4177_s8 + $0x78] sm:$0xff]   ;;  %v662_v55 = vsel %vm642_vm1, %v658_v50, %v661_v51  ;;  %v677_v5 = vrot.slane %v675_v0, 1 }
  0x19   : > { %441 = vrot.lane.b32.xlu0 %v4205_v11, %s4106_s11  ;;  %443 = vrot.lane.b32.xlu1 %v4215_v12, %s4106_s11  ;;  %v4018_v37 = vld [vmem:[%s6221_s1 + $0x50] sm:$0xff]   ;;  %v4019_v39 = vld [vmem:[%s6221_s1 + $0x60] sm:$0xff]   ;;  %v693_v50 = vshrl.u32 %v4221_v13, 16 }
  0x1a   : > { %1400 = vmatpush1.bf16.msra.mxu1 %v4000_v10  ;;  %1135 = vmatpush1.bf16.msra.mxu0 %v4007_v23  ;;  %v4335_v40 = vld [vmem:[%s4177_s8 + $0x84] sm:$0xff]   ;;  %v4338_v41 = vld [vmem:[%s4177_s8 + $0x8c] ss:$0 sps:$4 sm:$0x11]   ;;  %v4022_v46 = vld [vmem:[%s6221_s1 + $0xb8] sm:$0xff]   ;;  %v679_v10 = vshll.u32 %v4215_v12, 16 }
  0x1b   : > { %1401 = vmatprep.subr.bf16.mxu1 %v4105_v1  ;;  %1136 = vmatprep.subr.bf16.mxu0 %v4105_v1  ;;  %v4021_v44 = vld [vmem:[%s6221_s1 + $0x48] sm:$0xff]   ;;  %v4358_v47 = vld [vmem:[%s4177_s8 + $0x90] sm:$0xff]   ;;  %v4361_v48 = vld [vmem:[%s4177_s8 + $0x98] ss:$0 sps:$4 sm:$0x11]  }
  0x1c   : > { %v4024_v49 = vld [vmem:[%s6221_s1 + $0x40] sm:$0xff]   ;;  %v4025_v52 = vld [vmem:[%s6221_s1 + $0xb0] sm:$0xff]   ;;  %v4028_v56 = vld [vmem:[%s6221_s1 + $0xa8] sm:$0xff]   ;;  %3703 = vmatprep.mubr.msk.bf16.mxu0 %vm505_vm0, %v662_v55 }
  0x1d   : > { %445 = vrot.lane.b32.xlu0 %v4221_v13, %s4106_s11  ;;  %447 = vrot.lane.b32.xlu1 %v4224_v14, %s4106_s11  ;;  %v4373_v53 = vld [vmem:[%s4177_s8 + $0x9c] sm:$0xff]   ;;  %v4376_v54 = vld [vmem:[%s4177_s8 + $0xa4] ss:$0 sps:$4 sm:$0x11]  }
  0x1e   : > { %1402 = vmatpush1.bf16.msra.mxu1 %v4003_v18  ;;  %1137 = vmatpush1.bf16.msra.mxu0 %v4010_v27  ;;  %v4392_v57 = vld [vmem:[%s4177_s8 + $0xa8] sm:$0xff]   ;;  %v4395_v58 = vld [vmem:[%s4177_s8 + $0xb0] ss:$0 sps:$4 sm:$0x11]   ;;  %v4031_v59 = vld [vmem:[%s6221_s1 + $0xa0] sm:$0xff]  }
  0x1f   : > { %1403 = vmatprep.subr.bf16.mxu1 %v4105_v1  ;;  %1138 = vmatprep.subr.bf16.mxu0 %v4105_v1  ;;  %v4406_v60 = vld [vmem:[%s4177_s8 + $0xb4] sm:$0xff]   ;;  %v4411_v61 = vld [vmem:[%s4177_s8 + $0xbc] ss:$0 sps:$4 sm:$0x11]   ;;  %v4420_v63 = vld [vmem:[%s4177_s8 + $0xc0] sm:$0xff]  }
  0x20   : > { %v4414_v62 = vld [vmem:[%s4177_s8 + $0xc8] ss:$0 sps:$4 sm:$0x11]   ;;  %v4027_v2 = vld [vmem:[%s4177_s8] sm:$0xff]   ;;  %v4033_v55 = vld [vmem:[%s6221_s1 + $0xf8] sm:$0xff]  }
  0x21   : > { %449 = vrot.lane.b32.xlu0 %v4229_v15, %s4106_s11  ;;  %451 = vrot.lane.b32.xlu1 %v4236_v16, %s4106_s11 }
  0x22   : > { %1404 = vmatpush1.bf16.msra.mxu1 %v4006_v22  ;;  %1139 = vmatpush1.bf16.msra.mxu0 %v4013_v30  ;;  %v4029_v22 = vld [vmem:[%s4177_s8 + $0x8] ss:$0 sps:$4 sm:$0x11]   ;;  %v678_v30 = vor.u32 %v677_v5, %v673_v4 }
  0x23   : > { %1405 = vmatprep.subr.bf16.mxu1 %v4105_v1  ;;  %1140 = vmatprep.subr.bf16.mxu0 %v4105_v1 }
  0x25   : > { %453 = vrot.lane.b32.xlu0 %v4239_v17, %s4106_s11  ;;  %455 = vrot.lane.b32.xlu1 %v4247_v19, %s4106_s11 }
  0x26   : > { %1406 = vmatpush1.bf16.msra.mxu1 %v4009_v25  ;;  %1141 = vmatpush1.bf16.msra.mxu0 %v4016_v34  ;;  %v695_v34 = vshll.u32 %v4221_v13, 16 }
  0x27   : > { %1407 = vmatprep.subr.bf16.mxu1 %v4105_v1  ;;  %1142 = vmatprep.subr.bf16.mxu0 %v4105_v1 }
  0x29   : > { %457 = vrot.lane.b32.xlu0 %v4255_v21, %s4106_s11  ;;  %459 = vrot.lane.b32.xlu1 %v4270_v24, %s4106_s11 }
  0x2a   : > { %1408 = vmatpush1.bf16.msra.mxu1 %v4012_v29  ;;  %1143 = vmatpush1.bf16.msra.mxu0 %v4019_v39 }
  0x2b   : > { %1417 = vmatprep.subr.bf16.mxu1 %v4105_v1  ;;  %1152 = vmatprep.subr.bf16.mxu0 %v4105_v1 }
  0x2d   : > { %461 = vrot.lane.b32.xlu0 %v4286_v28, %s4106_s11  ;;  %463 = vrot.lane.b32.xlu1 %v4277_v26, %s4106_s11 }
  0x2e   : > { %1418 = vmatpush2.bf16.msra.mxu1 %v4015_v33  ;;  %1153 = vmatpush2.bf16.msra.mxu0 %v4022_v46  ;;  %v681_v33 = vrot.slane %v679_v10, 1 }
  0x2f   : > { %1419 = vmatprep.subr.bf16.mxu1 %v4105_v1  ;;  %1154 = vmatprep.subr.bf16.mxu0 %v4105_v1 }
  0x30   : > { %v682_v4 = vsel %vm642_vm1, %v678_v30, %v681_v33 }
  0x31   : > { %465 = vrot.lane.b32.xlu0 %v4304_v32, %s4106_s11  ;;  %467 = vrot.lane.b32.xlu1 %v4298_v31, %s4106_s11 }
  0x32   : > { %1420 = vmatpush2.bf16.msra.mxu1 %v4018_v37  ;;  %1155 = vmatpush2.bf16.msra.mxu0 %v4025_v52 }
  0x33   : > { %1421 = vmatprep.subr.bf16.mxu1 %v4105_v1  ;;  %1156 = vmatprep.subr.bf16.mxu0 %v4105_v1 }
  0x35   : > { %469 = vrot.lane.b32.xlu0 %v4322_v36, %s4106_s11  ;;  %471 = vrot.lane.b32.xlu1 %v4316_v35, %s4106_s11 }
  0x36   : > { %1422 = vmatpush2.bf16.msra.mxu1 %v4021_v44  ;;  %1157 = vmatpush2.bf16.msra.mxu0 %v4028_v56 }
  0x37   : > { %1423 = vmatprep.subr.bf16.mxu1 %v4105_v1  ;;  %1158 = vmatprep.subr.bf16.mxu0 %v4105_v1 }
  0x39   : > { %473 = vrot.lane.b32.xlu0 %v4335_v40, %s4106_s11  ;;  %475 = vrot.lane.b32.xlu1 %v4338_v41, %s4106_s11 }
  0x3a   : > { %1424 = vmatpush2.bf16.msra.mxu1 %v4024_v49  ;;  %1159 = vmatpush2.bf16.msra.mxu0 %v4031_v59  ;;  %v699_v59 = vshll.u32 %v4224_v14, 16 }
  0x3b   : > { %1844 = vmatprep.subr.bf16.mxu0 %v4105_v1 }
  0x3d   : > { %477 = vrot.lane.b32.xlu0 %v4358_v47, %s4106_s11  ;;  %479 = vrot.lane.b32.xlu1 %v4361_v48, %s4106_s11 }
  0x41   : > { %481 = vrot.lane.b32.xlu0 %v4373_v53, %s4106_s11  ;;  %483 = vrot.lane.b32.xlu1 %v4376_v54, %s4106_s11 }
  0x45   : > { %485 = vrot.lane.b32.xlu0 %v4392_v57, %s4106_s11  ;;  %487 = vrot.lane.b32.xlu1 %v4395_v58, %s4106_s11 }
  0x49   : > { %489 = vrot.lane.b32.xlu0 %v4406_v60, %s4106_s11  ;;  %491 = vrot.lane.b32.xlu1 %v4411_v61, %s4106_s11 }
  0x4d   : > { %493 = vrot.lane.b32.xlu0 %v4420_v63, %s4106_s11  ;;  %495 = vrot.lane.b32.xlu1 %v4414_v62, %s4106_s11 }
  0x83   : > { %v434_v3 = vpop.permute.xlu0 %433  ;;  %v438_v20 = vpop.permute.xlu1 %437 }
  0x84   : > { %v508_v18 = vsel %vm505_vm0, %v4027_v2, %v434_v3  ;;  %v515_v25 = vsel %vm505_vm0, %v4183_v6, %v438_v20 }
  0x85   : > { %v645_v23 = vshll.u32 %v508_v18, 16  ;;  %1426 = vmatmul.mubr.bf16.vlgmr.msra.gmra.mxu1 %v508_v18  ;;  %v643_v37 = vshrl.u32 %v508_v18, 16  ;;  %v1587_v38 = vrot.slane %v508_v18, 1  ;;  %v1593_v39 = vrot.slane %v515_v25, 1 }
  0x86   : > { %3732 = vmatprep.mubr.msk.bf16.mxu1 %vm505_vm0, %v4205_v11  ;;  %v665_v44 = vshll.u32 %v515_v25, 16  ;;  %v663_v2 = vshrl.u32 %v515_v25, 16 }
  0x87   : > { %v647_v27 = vrot.slane %v645_v23, 1  ;;  %v436_v29 = vpop.permute.xlu0 %435  ;;  %v440_v43 = vpop.permute.xlu1 %439 }
  0x88   : > { %v512_v42 = vsel %vm505_vm0, %v4029_v22, %v436_v29  ;;  %v519_v6 = vsel %vm505_vm0, %v4193_v8, %v440_v43  ;;  %v697_v8 = vrot.slane %v695_v34, 1  ;;  %v667_v10 = vrot.slane %v665_v44, 1 }
  0x89   : > { %v649_v45 = vshll.u32 %v512_v42, 16  ;;  %v1588_v46 = vrot.slane %v512_v42, 1  ;;  %v1594_v49 = vrot.slane %v519_v6, 1  ;;  %v648_v52 = vor.u32 %v647_v27, %v643_v37 }
  0x8a   : > { %v669_v18 = vshll.u32 %v519_v6, 16  ;;  %v698_v33 = vor.u32 %v697_v8, %v693_v50  ;;  %v701_v34 = vrot.slane %v699_v59, 1  ;;  %v715_v37 = vshll.u32 %v4229_v15, 16 }
  0x8b   : > { %v651_v51 = vrot.slane %v649_v45, 1  ;;  %v442_v56 = vpop.permute.xlu0 %441  ;;  %v4448_v0 = vsel %vm1586_vm2, %v1587_v38, %v1588_v46  ;;  %v444_v3 = vpop.permute.xlu1 %443  ;;  %v4452_v5 = vsel %vm1586_vm2, %v1593_v39, %v1594_v49  ;;  %v668_v42 = vor.u32 %v667_v10, %v663_v2 }
  0x8c   : > { %v522_v22 = vsel %vm505_vm0, %v4188_v7, %v442_v56  ;;  %v526_v27 = vsel %vm505_vm0, %v4198_v9, %v444_v3  ;;  %v671_v38 = vrot.slane %v669_v18, 1  ;;  %v713_v49 = vshrl.u32 %v4229_v15, 16 }
  0x8d   : > { %1434 = vmatmul.mubr.bf16.gmra.mxu1 %v515_v25  ;;  %v652_v20 = vsel %vm642_vm1, %v648_v52, %v651_v51  ;;  %v1599_v23 = vrot.slane %v522_v22, 1  ;;  %v1600_v29 = vrot.slane %v526_v27, 1  ;;  %v4034_v25 = vld [vmem:[%s6221_s1 + $0xf0] sm:$0xff]   ;;  %v685_v39 = vshll.u32 %v522_v22, 16 }
  0x8e   : > { %1161 = vmatmul.mubr.bf16.vlgmr.msra.gmra.mxu0 %v652_v20  ;;  %3733 = vmatprep.mubr.msk.bf16.mxu1 %vm505_vm0, %v4221_v13  ;;  %v683_v50 = vshrl.u32 %v522_v22, 16  ;;  %v702_v51 = vsel %vm642_vm1, %v698_v33, %v701_v34  ;;  %v717_v52 = vrot.slane %v715_v37, 1  ;;  %v689_v59 = vshll.u32 %v526_v27, 16 }
  0x8f   : > { %1845 = vmatpush1.bf16.msra.mxu0 %v4033_v55  ;;  %3704 = vmatprep.mubr.msk.bf16.mxu0 %vm505_vm0, %v682_v4  ;;  %v446_v30 = vpop.permute.xlu0 %445  ;;  %v448_v7 = vpop.permute.xlu1 %447  ;;  %v4476_v44 = vsel %vm1586_vm2, %v1599_v23, %v1600_v29  ;;  %v719_v55 = vshll.u32 %v4236_v16, 16  ;;  %v687_v56 = vrot.slane %v685_v39, 1  ;;  %v672_v2 = vsel %vm642_vm1, %v668_v42, %v671_v38 }
  0x90   : > { %1846 = vmatprep.subr.bf16.mxu0 %v4105_v1  ;;  %v4469_v9 = vsel %vm505_vm0, %v4205_v11, %v446_v30  ;;  %v4473_v43 = vsel %vm505_vm0, %v4215_v12, %v448_v7  ;;  %v4035_v11 = vld [vmem:[%s6221_s1 + $0xe8] sm:$0xff]   ;;  %v735_v29 = vshll.u32 %v4239_v17, 16  ;;  %v733_v39 = vshrl.u32 %v4239_v17, 16 }
  0x91   : > { %v1605_v45 = vrot.slane %v4469_v9, 1  ;;  %v1606_v46 = vrot.slane %v4473_v43, 1  ;;  %v721_v23 = vrot.slane %v719_v55, 1  ;;  %v688_v30 = vor.u32 %v687_v56, %v683_v50  ;;  %v4038_v56 = vld [vmem:[%s6221_s1 + $0xd0] sm:$0xff]  }
  0x92   : > { %v709_v50 = vshll.u32 %v4473_v43, 16 }
  0x93   : > { %1847 = vmatpush1.bf16.msra.mxu0 %v4034_v25  ;;  %v450_v6 = vpop.permute.xlu0 %449  ;;  %v452_v12 = vpop.permute.xlu1 %451  ;;  %v4505_v20 = vsel %vm1586_vm2, %v1605_v45, %v1606_v46  ;;  %v705_v25 = vshll.u32 %v4469_v9, 16  ;;  %v703_v45 = vshrl.u32 %v4469_v9, 16  ;;  %v737_v46 = vrot.slane %v735_v29, 1 }
  0x94   : > { %1848 = vmatprep.subr.bf16.mxu0 %v4105_v1  ;;  %v4490_v3 = vsel %vm505_vm0, %v4221_v13, %v450_v6  ;;  %v4497_v8 = vsel %vm505_vm0, %v4224_v14, %v452_v12  ;;  %v4036_v13 = vld [vmem:[%s6221_s1 + $0xe0] sm:$0xff]   ;;  %v691_v14 = vrot.slane %v689_v59, 1  ;;  %v739_v6 = vshll.u32 %v4247_v19, 16 }
  0x95   : > { %1442 = vmatmul.mubr.bf16.gmra.mxu1 %v522_v22  ;;  %v1611_v4 = vrot.slane %v4490_v3, 1  ;;  %v1612_v10 = vrot.slane %v4497_v8, 1  ;;  %v718_v22 = vor.u32 %v717_v52, %v713_v49  ;;  %v753_v29 = vshrl.u32 %v4255_v21, 16 }
  0x96   : > { %1169 = vmatmul.mubr.bf16.gmra.mxu0 %v672_v2  ;;  %3734 = vmatprep.mubr.msk.bf16.mxu1 %vm505_vm0, %v4229_v15  ;;  %v741_v2 = vrot.slane %v739_v6, 1 }
  0x97   : > { %3705 = vmatprep.mubr.msk.bf16.mxu0 %vm505_vm0, %v702_v51  ;;  %1849 = vmatpush1.bf16.msra.mxu0 %v4035_v11  ;;  %v454_v18 = vpop.permute.xlu0 %453  ;;  %v456_v27 = vpop.permute.xlu1 %455  ;;  %v4519_v34 = vsel %vm1586_vm2, %v1611_v4, %v1612_v10  ;;  %v707_v11 = vrot.slane %v705_v25, 1  ;;  %v692_v51 = vsel %vm642_vm1, %v688_v30, %v691_v14  ;;  %v755_v4 = vshll.u32 %v4255_v21, 16 }
  0x98   : > { %1850 = vmatprep.subr.bf16.mxu0 %v4105_v1  ;;  %v4512_v7 = vsel %vm505_vm0, %v4229_v15, %v454_v18  ;;  %v4516_v33 = vsel %vm505_vm0, %v4236_v16, %v456_v27  ;;  %v4037_v15 = vld [vmem:[%s6221_s1 + $0xd8] sm:$0xff]   ;;  %v722_v16 = vsel %vm642_vm1, %v718_v22, %v721_v23  ;;  %v725_v18 = vshll.u32 %v4490_v3, 16 }
  0x99   : > { %v1617_v37 = vrot.slane %v4512_v7, 1  ;;  %v1618_v38 = vrot.slane %v4516_v33, 1 }
  0x9b   : > { %1851 = vmatpush1.bf16.msra.mxu0 %v4036_v13  ;;  %v458_v42 = vpop.permute.xlu0 %457  ;;  %v460_v49 = vpop.permute.xlu1 %459  ;;  %v4551_v59 = vsel %vm1586_vm2, %v1617_v37, %v1618_v38  ;;  %v708_v13 = vor.u32 %v707_v11, %v703_v45  ;;  %v4039_v37 = vld [vmem:[%s6221_s1 + $0xc8] sm:$0xff]   ;;  %v723_v38 = vshrl.u32 %v4490_v3, 16 }
  0x9c   : > { %1852 = vmatprep.subr.bf16.mxu0 %v4105_v1  ;;  %v4536_v12 = vsel %vm505_vm0, %v4239_v17, %v458_v42  ;;  %v4543_v55 = vsel %vm505_vm0, %v4247_v19, %v460_v49  ;;  %v711_v19 = vrot.slane %v709_v50, 1  ;;  %v757_v42 = vrot.slane %v755_v4, 1  ;;  %v4040_v50 = vld [vmem:[%s6221_s1 + $0xc0] sm:$0xff]  }
  0x9d   : > { %1450 = vmatmul.mubr.bf16.gmra.mxu1 %v4469_v9  ;;  %v1623_v52 = vrot.slane %v4536_v12, 1  ;;  %v1624_v9 = vrot.slane %v4543_v55, 1 }
  0x9e   : > { %1177 = vmatmul.mubr.bf16.gmra.mxu0 %v692_v51  ;;  %3735 = vmatprep.mubr.msk.bf16.mxu1 %vm505_vm0, %v4239_v17  ;;  %v738_v17 = vor.u32 %v737_v46, %v733_v39  ;;  %v729_v46 = vshll.u32 %v4497_v8, 16  ;;  %v712_v6 = vsel %vm642_vm1, %v708_v13, %v711_v19 }
  0x9f   : > { %3706 = vmatprep.mubr.msk.bf16.mxu0 %vm505_vm0, %v722_v16  ;;  %1853 = vmatpush1.bf16.msra.mxu0 %v4037_v15  ;;  %v462_v43 = vpop.permute.xlu0 %461  ;;  %v464_v10 = vpop.permute.xlu1 %463  ;;  %v4565_v27 = vsel %vm1586_vm2, %v1623_v52, %v1624_v9  ;;  %v759_v15 = vshll.u32 %v4270_v24, 16  ;;  %v727_v16 = vrot.slane %v725_v18, 1  ;;  %v775_v9 = vshll.u32 %v4286_v28, 16 }
  0xa0   : > { %1854 = vmatprep.subr.bf16.mxu0 %v4105_v1  ;;  %v4558_v22 = vsel %vm505_vm0, %v4255_v21, %v462_v43  ;;  %v4562_v23 = vsel %vm505_vm0, %v4270_v24, %v464_v10  ;;  %v742_v39 = vsel %vm642_vm1, %v738_v17, %v741_v2  ;;  %v745_v17 = vshll.u32 %v4512_v7, 16 }
  0xa1   : > { %v1629_v14 = vrot.slane %v4558_v22, 1  ;;  %v1630_v25 = vrot.slane %v4562_v23, 1  ;;  %v761_v52 = vrot.slane %v759_v15, 1  ;;  %v728_v2 = vor.u32 %v727_v16, %v723_v38 }
  0xa2   : > { %v773_v18 = vshrl.u32 %v4286_v28, 16  ;;  %v777_v38 = vrot.slane %v775_v9, 1  ;;  %v747_v15 = vrot.slane %v745_v17, 1  ;;  %v765_v9 = vshll.u32 %v4536_v12, 16 }
  0xa3   : > { %v466_v30 = vpop.permute.xlu0 %465  ;;  %1855 = vmatpush1.bf16.msra.mxu0 %v4038_v56  ;;  %v468_v45 = vpop.permute.xlu1 %467  ;;  %v4597_v51 = vsel %vm1586_vm2, %v1629_v14, %v1630_v25  ;;  %v731_v56 = vrot.slane %v729_v46, 1  ;;  %v4041_v25 = vld [vmem:[%s6221_s1 + $0x118] sm:$0xff]  }
  0xa4   : > { %1856 = vmatprep.subr.bf16.mxu0 %v4105_v1  ;;  %v4582_v49 = vsel %vm505_vm0, %v4286_v28, %v466_v30  ;;  %v4589_v11 = vsel %vm505_vm0, %v4277_v26, %v468_v45  ;;  %v743_v30 = vshrl.u32 %v4512_v7, 16  ;;  %v749_v45 = vshll.u32 %v4516_v33, 16 }
  0xa5   : > { %1458 = vmatmul.mubr.bf16.gmra.mxu1 %v4490_v3  ;;  %v1635_v24 = vrot.slane %v4582_v49, 1  ;;  %v1636_v3 = vrot.slane %v4589_v11, 1  ;;  %v732_v16 = vsel %vm642_vm1, %v728_v2, %v731_v56 }
  0xa6   : > { %1185 = vmatmul.mubr.bf16.gmra.mxu0 %v712_v6  ;;  %3736 = vmatprep.mubr.msk.bf16.mxu1 %vm505_vm0, %v4255_v21  ;;  %v758_v21 = vor.u32 %v757_v42, %v753_v29 }
  0xa7   : > { %3707 = vmatprep.mubr.msk.bf16.mxu0 %vm505_vm0, %v742_v39  ;;  %v470_v8 = vpop.permute.xlu0 %469  ;;  %1857 = vmatpush1.bf16.msra.mxu0 %v4039_v37  ;;  %v472_v43 = vpop.permute.xlu1 %471  ;;  %v4611_v19 = vsel %vm1586_vm2, %v1635_v24, %v1636_v3  ;;  %v779_v39 = vshll.u32 %v4277_v26, 16  ;;  %v4042_v24 = vld [vmem:[%s6221_s1 + $0x110] sm:$0xff]  }
  0xa8   : > { %1858 = vmatprep.subr.bf16.mxu0 %v4105_v1  ;;  %v4604_v4 = vsel %vm505_vm0, %v4304_v32, %v470_v8  ;;  %v4608_v10 = vsel %vm505_vm0, %v4298_v31, %v472_v43  ;;  %v762_v37 = vsel %vm642_vm1, %v758_v21, %v761_v52  ;;  %v751_v52 = vrot.slane %v749_v45, 1 }
  0xa9   : > { %v1641_v13 = vrot.slane %v4604_v4, 1  ;;  %v1642_v29 = vrot.slane %v4608_v10, 1  ;;  %v781_v8 = vrot.slane %v779_v39, 1  ;;  %v748_v43 = vor.u32 %v747_v15, %v743_v30 }
  0xaa   : > { %v763_v30 = vshrl.u32 %v4536_v12, 16  ;;  %v799_v39 = vshll.u32 %v4298_v31, 16  ;;  %v767_v15 = vrot.slane %v765_v9, 1  ;;  %v769_v45 = vshll.u32 %v4543_v55, 16 }
  0xab   : > { %v474_v14 = vpop.permute.xlu0 %473  ;;  %1859 = vmatpush1.bf16.msra.mxu0 %v4040_v50  ;;  %v476_v42 = vpop.permute.xlu1 %475  ;;  %v4643_v3 = vsel %vm1586_vm2, %v1641_v13, %v1642_v29  ;;  %v795_v50 = vshll.u32 %v4304_v32, 16 }
  0xac   : > { %1868 = vmatprep.subr.bf16.mxu0 %v4105_v1  ;;  %v4628_v46 = vsel %vm505_vm0, %v4322_v36, %v474_v14  ;;  %v4635_v6 = vsel %vm505_vm0, %v4316_v35, %v476_v42  ;;  %v768_v9 = vor.u32 %v767_v15, %v763_v30 }
  0xad   : > { %1466 = vmatmul.mubr.bf16.gmra.mxu1 %v4512_v7  ;;  %v1647_v26 = vrot.slane %v4628_v46, 1  ;;  %v1648_v7 = vrot.slane %v4635_v6, 1 }
  0xae   : > { %1193 = vmatmul.mubr.bf16.gmra.mxu0 %v732_v16  ;;  %3737 = vmatprep.mubr.msk.bf16.mxu1 %vm505_vm0, %v4286_v28  ;;  %v778_v28 = vor.u32 %v777_v38, %v773_v18  ;;  %v793_v18 = vshrl.u32 %v4304_v32, 16  ;;  %v797_v38 = vrot.slane %v795_v50, 1  ;;  %v752_v16 = vsel %vm642_vm1, %v748_v43, %v751_v52 }
  0xaf   : > { %3708 = vmatprep.mubr.msk.bf16.mxu0 %vm505_vm0, %v762_v37  ;;  %v478_v33 = vpop.permute.xlu0 %477  ;;  %1869 = vmatpush2.bf16.msra.mxu0 %v4041_v25  ;;  %v480_v21 = vpop.permute.xlu1 %479  ;;  %v4657_v2 = vsel %vm1586_vm2, %v1647_v26, %v1648_v7  ;;  %v4043_v25 = vld [vmem:[%s6221_s1 + $0x108] sm:$0xff]   ;;  %v785_v52 = vshll.u32 %v4558_v22, 16 }
  0xb0   : > { %1870 = vmatprep.subr.bf16.mxu0 %v4105_v1  ;;  %v4650_v56 = vsel %vm505_vm0, %v4335_v40, %v478_v33  ;;  %v4654_v17 = vsel %vm505_vm0, %v4338_v41, %v480_v21  ;;  %v782_v37 = vsel %vm642_vm1, %v778_v28, %v781_v8  ;;  %v798_v28 = vor.u32 %v797_v38, %v793_v18 }
  0xb1   : > { %v1653_v13 = vrot.slane %v4650_v56, 1  ;;  %v1654_v29 = vrot.slane %v4654_v17, 1  ;;  %v801_v8 = vrot.slane %v799_v39, 1  ;;  %v771_v21 = vrot.slane %v769_v45, 1 }
  0xb2   : > { %v787_v15 = vrot.slane %v785_v52, 1  ;;  %v789_v45 = vshll.u32 %v4562_v23, 16 }
  0xb3   : > { %v482_v14 = vpop.permute.xlu0 %481  ;;  %1871 = vmatpush2.bf16.msra.mxu0 %v4042_v24  ;;  %v484_v42 = vpop.permute.xlu1 %483  ;;  %v4046_v24 = vld [vmem:[%s6221_s1 + $0x100] sm:$0xff]   ;;  %v802_v38 = vsel %vm642_vm1, %v798_v28, %v801_v8 }
  0xb4   : > { %1872 = vmatprep.subr.bf16.mxu0 %v4105_v1  ;;  %v4674_v26 = vsel %vm505_vm0, %v4358_v47, %v482_v14  ;;  %v4681_v7 = vsel %vm505_vm0, %v4361_v48, %v484_v42  ;;  %v783_v42 = vshrl.u32 %v4558_v22, 16 }
  0xb5   : > { %1474 = vmatmul.mubr.bf16.gmra.mxu1 %v4536_v12  ;;  %v1659_v31 = vrot.slane %v4674_v26, 1  ;;  %v815_v12 = vshll.u32 %v4322_v36, 16  ;;  %v1660_v55 = vrot.slane %v4681_v7, 1 }
  0xb6   : > { %1201 = vmatmul.mubr.bf16.gmra.mxu0 %v752_v16  ;;  %3738 = vmatprep.mubr.msk.bf16.mxu1 %vm505_vm0, %v4304_v32  ;;  %v4690_v32 = vsel %vm1586_vm2, %v1653_v13, %v1654_v29  ;;  %v813_v13 = vshrl.u32 %v4322_v36, 16  ;;  %v819_v29 = vshll.u32 %v4316_v35, 16  ;;  %v772_v16 = vsel %vm642_vm1, %v768_v9, %v771_v21 }
  0xb7   : > { %3709 = vmatprep.mubr.msk.bf16.mxu0 %vm505_vm0, %v782_v37  ;;  %v486_v33 = vpop.permute.xlu0 %485  ;;  %1873 = vmatpush2.bf16.msra.mxu0 %v4043_v25  ;;  %v488_v50 = vpop.permute.xlu1 %487  ;;  %v4704_v18 = vsel %vm1586_vm2, %v1659_v31, %v1660_v55  ;;  %v805_v21 = vshll.u32 %v4582_v49, 16  ;;  %v788_v52 = vor.u32 %v787_v15, %v783_v42  ;;  %v809_v15 = vshll.u32 %v4589_v11, 16 }
  0xb8   : > { %1874 = vmatprep.subr.bf16.mxu0 %v4105_v1  ;;  %v4696_v43 = vsel %vm505_vm0, %v4373_v53, %v486_v33  ;;  %v4701_v25 = vsel %vm505_vm0, %v4376_v54, %v488_v50  ;;  %v817_v1 = vrot.slane %v815_v12, 1  ;;  %v821_v23 = vrot.slane %v819_v29, 1 }
  0xb9   : > { %v1665_v14 = vrot.slane %v4696_v43, 1  ;;  %v1666_v30 = vrot.slane %v4701_v25, 1  ;;  %v791_v50 = vrot.slane %v789_v45, 1  ;;  %v807_v42 = vrot.slane %v805_v21, 1 }
  0xba   : > { %v825_v11 = vshll.u32 %v4604_v4, 16  ;;  %v829_v21 = vshll.u32 %v4608_v10, 16 }
  0xbb   : > { %v490_v37 = vpop.permute.xlu0 %489  ;;  %1875 = vmatpush2.bf16.msra.mxu0 %v4046_v24  ;;  %v492_v39 = vpop.permute.xlu1 %491  ;;  %v4725_v12 = vsel %vm1586_vm2, %v1665_v14, %v1666_v30  ;;  %v835_v24 = vshll.u32 %v4335_v40, 16  ;;  %v803_v30 = vshrl.u32 %v4582_v49, 16  ;;  %v792_v45 = vsel %vm642_vm1, %v788_v52, %v791_v50 }
  0xbc   : > { %v4718_v35 = vsel %vm505_vm0, %v4392_v57, %v490_v37  ;;  %v4722_v31 = vsel %vm505_vm0, %v4395_v58, %v492_v39  ;;  %v833_v37 = vshrl.u32 %v4335_v40, 16  ;;  %v839_v39 = vshll.u32 %v4338_v41, 16 }
  0xbd   : > { %1482 = vmatmul.mubr.bf16.gmra.mxu1 %v4558_v22  ;;  %v818_v22 = vor.u32 %v817_v1, %v813_v13  ;;  %v1671_v55 = vrot.slane %v4718_v35, 1  ;;  %v1672_v33 = vrot.slane %v4722_v31, 1  ;;  %v855_v41 = vshll.u32 %v4358_v47, 16 }
  0xbe   : > { %1209 = vmatmul.mubr.bf16.gmra.mxu0 %v772_v16  ;;  %3739 = vmatprep.mubr.msk.bf16.mxu1 %vm505_vm0, %v4322_v36  ;;  %v823_v50 = vshrl.u32 %v4604_v4, 16 }
  0xbf   : > { %3710 = vmatprep.mubr.msk.bf16.mxu0 %vm505_vm0, %v802_v38  ;;  %v494_v36 = vpop.permute.xlu0 %493  ;;  %v496_v8 = vpop.permute.xlu1 %495  ;;  %v822_v13 = vsel %vm642_vm1, %v818_v22, %v821_v23  ;;  %v4744_v29 = vsel %vm1586_vm2, %v1671_v55, %v1672_v33  ;;  %v837_v38 = vrot.slane %v835_v24, 1  ;;  %v841_v23 = vrot.slane %v839_v39, 1 }
  0xc0   : > { %v4733_v28 = vsel %vm505_vm0, %v4406_v60, %v494_v36  ;;  %v4739_v14 = vsel %vm505_vm0, %v4411_v61, %v496_v8  ;;  %v811_v55 = vrot.slane %v809_v15, 1  ;;  %v808_v33 = vor.u32 %v807_v42, %v803_v30 }
  0xc1   : > { %v1677_v9 = vrot.slane %v4733_v28, 1  ;;  %v1678_v1 = vrot.slane %v4739_v14, 1  ;;  %v838_v22 = vor.u32 %v837_v38, %v833_v37  ;;  %v853_v36 = vshrl.u32 %v4358_v47, 16 }
  0xc2   : > { %v857_v24 = vrot.slane %v855_v41, 1  ;;  %v859_v8 = vshll.u32 %v4361_v48, 16  ;;  %v812_v52 = vsel %vm642_vm1, %v808_v33, %v811_v55  ;;  %v831_v48 = vrot.slane %v829_v21, 1 }
  0xc3   : > { %v4753_v16 = vsel %vm1586_vm2, %v1677_v9, %v1678_v1  ;;  %v875_v1 = vshll.u32 %v4373_v53, 16  ;;  %v845_v30 = vshll.u32 %v4628_v46, 16  ;;  %v879_v39 = vshll.u32 %v4376_v54, 16 }
  0xc4   : > { %v858_v9 = vor.u32 %v857_v24, %v853_v36  ;;  %v843_v42 = vshrl.u32 %v4628_v46, 16  ;;  %v849_v15 = vshll.u32 %v4635_v6, 16  ;;  %v895_v41 = vshll.u32 %v4392_v57, 16 }
  0xc5   : > { %1490 = vmatmul.mubr.bf16.gmra.mxu1 %v4582_v49  ;;  %v842_v49 = vsel %vm642_vm1, %v838_v22, %v841_v23  ;;  %v877_v38 = vrot.slane %v875_v1, 1  ;;  %v881_v23 = vrot.slane %v879_v39, 1  ;;  %v865_v55 = vshll.u32 %v4650_v56, 16 }
  0xc6   : > { %1217 = vmatmul.mubr.bf16.gmra.mxu0 %v792_v45  ;;  %3740 = vmatprep.mubr.msk.bf16.mxu1 %vm505_vm0, %v4335_v40  ;;  %v827_v40 = vrot.slane %v825_v11, 1  ;;  %v851_v54 = vrot.slane %v849_v15, 1  ;;  %v897_v33 = vrot.slane %v895_v41, 1  ;;  %v863_v36 = vshrl.u32 %v4650_v56, 16  ;;  %v4818_v41 = vld [vmem:[%s4177_s8 + $0xcc] sm:$0xff]  }
  0xc7   : > { %3711 = vmatprep.mubr.msk.bf16.mxu0 %vm505_vm0, %v822_v13  ;;  %v861_v13 = vrot.slane %v859_v8, 1  ;;  %v869_v24 = vshll.u32 %v4654_v17, 16  ;;  %v915_v21 = vshll.u32 %v4406_v60, 16  ;;  %v919_v1 = vshll.u32 %v4411_v61, 16 }
  0xc8   : > { %v828_v37 = vor.u32 %v827_v40, %v823_v50  ;;  %v936_v61 = vshll.u32 %v4420_v63, 16  ;;  %v905_v39 = vshll.u32 %v4696_v43, 16  ;;  %v941_v15 = vshll.u32 %v4414_v62, 16  ;;  %v4822_v62 = vld [vmem:[%s4177_s8 + $0xd4] ss:$0 sps:$4 sm:$0x11]  }
  0xc9   : > { %v862_v10 = vsel %vm642_vm1, %v858_v9, %v861_v13  ;;  %v917_v13 = vrot.slane %v915_v21, 1 }
  0xca   : > { %v832_v45 = vsel %vm642_vm1, %v828_v37, %v831_v48  ;;  %v883_v48 = vshrl.u32 %v4674_v26, 16 }
  0xcd   : > { %1498 = vmatmul.mubr.bf16.gmra.mxu1 %v4604_v4  ;;  %v873_v4 = vshrl.u32 %v4373_v53, 16 }
  0xce   : > { %1225 = vmatmul.mubr.bf16.gmra.mxu0 %v812_v52  ;;  %3741 = vmatprep.mubr.msk.bf16.mxu1 %vm505_vm0, %v4358_v47  ;;  %v847_v47 = vrot.slane %v845_v30, 1  ;;  %v885_v52 = vshll.u32 %v4674_v26, 16  ;;  %v889_v30 = vshll.u32 %v4681_v7, 16  ;;  %v934_v7 = vshrl.u32 %v4420_v63, 16 }
  0xcf   : > { %3712 = vmatprep.mubr.msk.bf16.mxu0 %vm505_vm0, %v842_v49  ;;  %v878_v22 = vor.u32 %v877_v38, %v873_v4  ;;  %v899_v49 = vshll.u32 %v4395_v58, 16  ;;  %v871_v58 = vrot.slane %v869_v24, 1  ;;  %v921_v4 = vrot.slane %v919_v1, 1 }
  0xd0   : > { %v848_v11 = vor.u32 %v847_v47, %v843_v42  ;;  %v891_v38 = vrot.slane %v889_v30, 1  ;;  %v938_v47 = vrot.slane %v936_v61, 1  ;;  %v929_v24 = vshll.u32 %v4722_v31, 16  ;;  %v4054_v61 = vld [vmem:[%s4177_s8 + $0x2c] ss:$0 sps:$4 sm:$0x11]  }
  0xd1   : > { %v882_v6 = vsel %vm642_vm1, %v878_v22, %v881_v23  ;;  %v901_v40 = vrot.slane %v899_v49, 1  ;;  %v909_v22 = vshll.u32 %v4701_v25, 16  ;;  %v925_v25 = vshll.u32 %v4718_v35, 16 }
  0xd2   : > { %v852_v8 = vsel %vm642_vm1, %v848_v11, %v851_v54  ;;  %v939_v54 = vor.u32 %v938_v47, %v934_v7  ;;  %v958_v11 = vshll.u32 %v4818_v41, 16  ;;  %v931_v21 = vrot.slane %v929_v24, 1  ;;  %v4056_v7 = vld [vmem:[%s4177_s8 + $0x38] ss:$0 sps:$4 sm:$0x11]  }
  0xd3   : > { %v1603_v47 = vrot.slane %v4056_v7, 1 }
  0xd4   : > { %v960_v49 = vrot.slane %v958_v11, 1  ;;  %v4060_v11 = vld [vmem:[%s4177_s8 + $0x50] ss:$0 sps:$4 sm:$0x11]  }
  0xd5   : > { %1506 = vmatmul.mubr.bf16.gmra.mxu1 %v4628_v46  ;;  %v893_v46 = vshrl.u32 %v4392_v57, 16 }
  0xd6   : > { %1233 = vmatmul.mubr.bf16.gmra.mxu0 %v832_v45  ;;  %3742 = vmatprep.mubr.msk.bf16.mxu1 %vm505_vm0, %v4373_v53  ;;  %v867_v53 = vrot.slane %v865_v55, 1  ;;  %v907_v45 = vrot.slane %v905_v39, 1  ;;  %v943_v55 = vrot.slane %v941_v15, 1 }
  0xd7   : > { %3713 = vmatprep.mubr.msk.bf16.mxu0 %vm505_vm0, %v862_v10  ;;  %v898_v50 = vor.u32 %v897_v33, %v893_v46  ;;  %v956_v33 = vshrl.u32 %v4818_v41, 16 }
  0xd8   : > { %v868_v9 = vor.u32 %v867_v53, %v863_v36  ;;  %v944_v46 = vsel %vm642_vm1, %v939_v54, %v943_v55  ;;  %v923_v36 = vshrl.u32 %v4718_v35, 16  ;;  %v927_v53 = vrot.slane %v925_v25, 1  ;;  %v4047_v54 = vld [vmem:[%s6223_s3 + $0x18] sm:$0xff]  }
  0xd9   : > { %v902_v17 = vsel %vm642_vm1, %v898_v50, %v901_v40  ;;  %v961_v50 = vor.u32 %v960_v49, %v956_v33  ;;  %3843 = vmatprep.subr.bf16.mxu1 %v4047_v54 }
  0xda   : > { %v872_v37 = vsel %vm642_vm1, %v868_v9, %v871_v58  ;;  %v947_v58 = vshll.u32 %v4733_v28, 16  ;;  %3844 = vmatpush3.bf16.msra.mxu1 %v4047_v54 }
  0xdc   : > { %v949_v9 = vrot.slane %v947_v58, 1  ;;  %v4048_v58 = vld [vmem:[%s6223_s3 + $0x10] sm:$0xff]  }
  0xdd   : > { %1514 = vmatmul.mubr.bf16.gmra.mxu1 %v4650_v56  ;;  %v913_v56 = vshrl.u32 %v4406_v60, 16  ;;  %3845 = vmatprep.subr.bf16.mxu1 %v4048_v58 }
  0xde   : > { %1241 = vmatmul.mubr.bf16.gmra.mxu0 %v852_v8  ;;  %3743 = vmatprep.mubr.msk.bf16.mxu1 %vm505_vm0, %v4392_v57  ;;  %v887_v57 = vrot.slane %v885_v52, 1  ;;  %v928_v52 = vor.u32 %v927_v53, %v923_v36  ;;  %v4064_v53 = vld [vmem:[%s4177_s8 + $0x68] ss:$0 sps:$4 sm:$0x11]  }
  0xdf   : > { %3714 = vmatprep.mubr.msk.bf16.mxu0 %vm505_vm0, %v882_v6  ;;  %v918_v10 = vor.u32 %v917_v13, %v913_v56  ;;  %v911_v6 = vrot.slane %v909_v22, 1  ;;  %v4051_v13 = vld [vmem:[%s4177_s8 + $0x18] sm:$0xff]   ;;  %v4058_v22 = vld [vmem:[%s4177_s8 + $0x44] ss:$0 sps:$4 sm:$0x11]   ;;  %3846 = vmatpush3.bf16.msra.mxu1 %v4048_v58 }
  0xe0   : > { %v888_v42 = vor.u32 %v887_v57, %v883_v48  ;;  %v932_v56 = vsel %vm642_vm1, %v928_v52, %v931_v21  ;;  %v1590_v1 = vrot.slane %v4051_v13, 1  ;;  %v4052_v48 = vld [vmem:[%s4177_s8 + $0x20] ss:$0 sps:$4 sm:$0x11]   ;;  %v4069_v13 = vld [vmem:[%s4177_s8 + $0x84] sm:$0xff]  }
  0xe1   : > { %v1591_v57 = vrot.slane %v4052_v48, 1 }
  0xe2   : > { %v892_v23 = vsel %vm642_vm1, %v888_v42, %v891_v38  ;;  %v1597_v38 = vrot.slane %v4054_v61, 1  ;;  %v4055_v42 = vld [vmem:[%s4177_s8 + $0x30] sm:$0xff]  }
  0xe3   : > { %v4071_v61 = vld [vmem:[%s4177_s8 + $0x90] sm:$0xff]  }
  0xe5   : > { %1522 = vmatmul.mubr.bf16.gmra.mxu1 %v4674_v26  ;;  %v922_v26 = vsel %vm642_vm1, %v918_v10, %v921_v4  ;;  %v1592_v10 = vsel %vm1586_vm2, %v1590_v1, %v1591_v57  ;;  %v4070_v1 = vld [vmem:[%s4177_s8 + $0x8c] ss:$0 sps:$4 sm:$0x11]  }
  0xe6   : > { %1249 = vmatmul.mubr.bf16.gmra.mxu0 %v872_v37  ;;  %3744 = vmatprep.mubr.msk.bf16.mxu1 %vm505_vm0, %v4406_v60  ;;  %v903_v60 = vshrl.u32 %v4696_v43, 16  ;;  %v1645_v48 = vrot.slane %v4070_v1, 1  ;;  %v4077_v1 = vld [vmem:[%s4177_s8 + $0xb4] sm:$0xff]  }
  0xe7   : > { %3715 = vmatprep.mubr.msk.bf16.mxu0 %vm505_vm0, %v902_v17  ;;  %v951_v17 = vshll.u32 %v4739_v14, 16 }
  0xe9   : > { %v953_v30 = vrot.slane %v951_v17, 1 }
  0xed   : > { %1530 = vmatmul.mubr.bf16.gmra.mxu1 %v4696_v43  ;;  %v908_v43 = vor.u32 %v907_v45, %v903_v60  ;;  %v4057_v60 = vld [vmem:[%s4177_s8 + $0x3c] sm:$0xff]  }
  0xee   : > { %1257 = vmatmul.mubr.bf16.gmra.mxu0 %v892_v23  ;;  %3745 = vmatprep.mubr.msk.bf16.mxu1 %vm505_vm0, %v4420_v63  ;;  %v963_v63 = vshll.u32 %v4822_v62, 16  ;;  %v1608_v45 = vrot.slane %v4057_v60, 1  ;;  %v1609_v23 = vrot.slane %v4058_v22, 1 }
  0xef   : > { %3716 = vmatprep.mubr.msk.bf16.mxu0 %vm505_vm0, %v922_v26  ;;  %v912_v8 = vsel %vm642_vm1, %v908_v43, %v911_v6  ;;  %v1602_v26 = vrot.slane %v4055_v42, 1  ;;  %v1615_v6 = vrot.slane %v4060_v11, 1  ;;  %v4061_v43 = vld [vmem:[%s4177_s8 + $0x54] sm:$0xff]   ;;  %v4074_v11 = vld [vmem:[%s4177_s8 + $0xa4] ss:$0 sps:$4 sm:$0x11]  }
  0xf0   : > { %v965_v40 = vrot.slane %v963_v63, 1  ;;  %v4063_v63 = vld [vmem:[%s4177_s8 + $0x60] sm:$0xff]  }
  0xf1   : > { %v1604_v15 = vsel %vm1586_vm2, %v1602_v26, %v1603_v47  ;;  %v1626_v36 = vrot.slane %v4063_v63, 1 }
  0xf2   : > { %v966_v31 = vsel %vm642_vm1, %v961_v50, %v965_v40  ;;  %v4066_v40 = vld [vmem:[%s4177_s8 + $0x74] ss:$0 sps:$4 sm:$0x11]  }
  0xf3   : > { %v1633_v21 = vrot.slane %v4066_v40, 1 }
  0xf5   : > { %1538 = vmatmul.mubr.bf16.gmra.mxu1 %v4718_v35  ;;  %v945_v35 = vshrl.u32 %v4733_v28, 16 }
  0xf6   : > { %1265 = vmatmul.mubr.bf16.gmra.mxu0 %v912_v8  ;;  %3746 = vmatprep.mubr.msk.bf16.mxu1 %vm505_vm0, %v4818_v41  ;;  %v4065_v8 = vld [vmem:[%s4177_s8 + $0x6c] sm:$0xff]  }
  0xf7   : > { %3717 = vmatprep.mubr.msk.bf16.mxu0 %vm505_vm0, %v944_v46  ;;  %v950_v37 = vor.u32 %v949_v9, %v945_v35  ;;  %v4062_v46 = vld [vmem:[%s4177_s8 + $0x5c] ss:$0 sps:$4 sm:$0x11]   ;;  %v1632_v50 = vrot.slane %v4065_v8, 1 }
  0xf8   : > { %v1621_v33 = vrot.slane %v4062_v46, 1 }
  0xf9   : > { %v954_v14 = vsel %vm642_vm1, %v950_v37, %v953_v30 }
  0xfd   : > { %1546 = vmatmul.mubr.bf16.gmra.mxu1 %v4733_v28  ;;  %v4053_v28 = vld [vmem:[%s4177_s8 + $0x24] sm:$0xff]  }
  0xfe   : > { %1273 = vmatmul.mubr.bf16.gmra.mxu0 %v932_v56  ;;  %v1596_v4 = vrot.slane %v4053_v28, 1 }
  0xff   : > { %3718 = vmatprep.mubr.msk.bf16.mxu0 %vm505_vm0, %v966_v31  ;;  %v4068_v31 = vld [vmem:[%s4177_s8 + $0x80] ss:$0 sps:$4 sm:$0x11]  }
 0x100   : > { %v1598_v39 = vsel %vm1586_vm2, %v1596_v4, %v1597_v38  ;;  %v1639_v35 = vrot.slane %v4068_v31, 1  ;;  %v1650_v38 = vrot.slane %v4071_v61, 1 }
 0x106   : > { %1281 = vmatmul.mubr.bf16.gmra.mxu0 %v954_v14 }
 0x107   : > { %3783 = vmatprep.mubr.msk.bf16.mxu0 %vm505_vm0, %v1592_v10 }
 0x10e   : > { %1877 = vmatmul.mubr.bf16.vlgmr.msra.gmra.mxu0 %v4448_v0  ;;  %v1610_v0 = vsel %vm1586_vm2, %v1608_v45, %v1609_v23 }
 0x10f   : > { %3784 = vmatprep.mubr.msk.bf16.mxu0 %vm505_vm0, %v1598_v39  ;;  %v4072_v39 = vld [vmem:[%s4177_s8 + $0x98] ss:$0 sps:$4 sm:$0x11]  }
 0x110   : > { %v1651_v42 = vrot.slane %v4072_v39, 1 }
 0x116   : > { %1885 = vmatmul.mubr.bf16.gmra.mxu0 %v4452_v5  ;;  %v4059_v5 = vld [vmem:[%s4177_s8 + $0x48] sm:$0xff]  }
 0x117   : > { %3785 = vmatprep.mubr.msk.bf16.mxu0 %vm505_vm0, %v1604_v15  ;;  %v1614_v55 = vrot.slane %v4059_v5, 1  ;;  %v4073_v5 = vld [vmem:[%s4177_s8 + $0x9c] sm:$0xff]  }
 0x119   : > { %v1616_v25 = vsel %vm1586_vm2, %v1614_v55, %v1615_v6  ;;  %v1656_v55 = vrot.slane %v4073_v5, 1  ;;  %v1657_v6 = vrot.slane %v4074_v11, 1 }
 0x11e   : > { %1893 = vmatmul.mubr.bf16.gmra.mxu0 %v4476_v44  ;;  %v1620_v44 = vrot.slane %v4061_v43, 1 }
 0x11f   : > { %3786 = vmatprep.mubr.msk.bf16.mxu0 %vm505_vm0, %v1610_v0 }
 0x120   : > { %v1622_v49 = vsel %vm1586_vm2, %v1620_v44, %v1621_v33 }
 0x126   : > { %1901 = vmatmul.mubr.bf16.gmra.mxu0 %v4505_v20  ;;  %v1627_v20 = vrot.slane %v4064_v53, 1 }
 0x127   : > { %3787 = vmatprep.mubr.msk.bf16.mxu0 %vm505_vm0, %v1616_v25 }
 0x128   : > { %v1628_v24 = vsel %vm1586_vm2, %v1626_v36, %v1627_v20 }
 0x12e   : > { %1909 = vmatmul.mubr.bf16.gmra.mxu0 %v4519_v34  ;;  %v1634_v34 = vsel %vm1586_vm2, %v1632_v50, %v1633_v21  ;;  %v4075_v50 = vld [vmem:[%s4177_s8 + $0xa8] sm:$0xff]   ;;  %v4076_v21 = vld [vmem:[%s4177_s8 + $0xb0] ss:$0 sps:$4 sm:$0x11]  }
 0x12f   : > { %3788 = vmatprep.mubr.msk.bf16.mxu0 %vm505_vm0, %v1622_v49  ;;  %v1658_v49 = vsel %vm1586_vm2, %v1656_v55, %v1657_v6  ;;  %v1662_v40 = vrot.slane %v4075_v50, 1 }
 0x136   : > { %1917 = vmatmul.mubr.bf16.gmra.mxu0 %v4551_v59  ;;  %v4067_v59 = vld [vmem:[%s4177_s8 + $0x78] sm:$0xff]  }
 0x137   : > { %3789 = vmatprep.mubr.msk.bf16.mxu0 %vm505_vm0, %v1628_v24  ;;  %v1638_v52 = vrot.slane %v4067_v59, 1  ;;  %v4050_v24 = vld [vmem:[%s6223_s3] sm:$0xff]  }
 0x139   : > { %v1640_v9 = vsel %vm1586_vm2, %v1638_v52, %v1639_v35 }
 0x13e   : > { %1925 = vmatmul.mubr.bf16.gmra.mxu0 %v4565_v27  ;;  %v1644_v27 = vrot.slane %v4069_v13, 1 }
 0x13f   : > { %3790 = vmatprep.mubr.msk.bf16.mxu0 %vm505_vm0, %v1634_v34  ;;  %v1663_v34 = vrot.slane %v4076_v21, 1 }
 0x140   : > { %v1646_v37 = vsel %vm1586_vm2, %v1644_v27, %v1645_v48  ;;  %v1668_v48 = vrot.slane %v4077_v1, 1 }
 0x141   : > { %v1664_v35 = vsel %vm1586_vm2, %v1662_v40, %v1663_v34 }
 0x145   : > { %v1427_v17 = vpop.f32.mrf.mxu1 }
 0x146   : > { %1933 = vmatmul.mubr.bf16.gmra.mxu0 %v4597_v51 }
 0x147   : > { %v1429_v56 = vpop.f32.mrf.mxu1  ;;  %3791 = vmatprep.mubr.msk.bf16.mxu0 %vm505_vm0, %v1640_v9 }
 0x149   : > { %v1430_v57 = vpop.f32.mrf.mxu1 }
 0x14b   : > { %v1432_v30 = vpop.f32.mrf.mxu1 }
 0x14d   : > { %v1435_v10 = vpop.f32.mrf.mxu1 }
 0x14e   : > { %v1162_v14 = vpop.f32.mrf.mxu0  ;;  %1941 = vmatmul.mubr.bf16.gmra.mxu0 %v4611_v19  ;;  %v1652_v19 = vsel %vm1586_vm2, %v1650_v38, %v1651_v42 }
 0x14f   : > { %v4898_v28 = vadd.f32 %v1427_v17, %v1162_v14  ;;  %v1437_v51 = vpop.f32.mrf.mxu1  ;;  %3792 = vmatprep.mubr.msk.bf16.mxu0 %vm505_vm0, %v1646_v37 }
 0x150   : > { %v1164_v4 = vpop.f32.mrf.mxu0 }
 0x151   : > { %v1438_v26 = vpop.f32.mrf.mxu1 }
 0x152   : > { %v1165_v7 = vpop.f32.mrf.mxu0 }
 0x153   : > { %v4903_v47 = vadd.f32 %v1430_v57, %v1165_v7  ;;  %v1440_v15 = vpop.f32.mrf.mxu1  ;;  %v4078_v57 = vld [vmem:[%s4177_s8 + $0xbc] ss:$0 sps:$4 sm:$0x11]   ;;  %v4079_v7 = vld [vmem:[%s4177_s8 + $0xc0] sm:$0xff]  }
 0x154   : > { %v1167_v60 = vpop.f32.mrf.mxu0  ;;  %v1669_v30 = vrot.slane %v4078_v57, 1  ;;  %v1674_v15 = vrot.slane %v4079_v7, 1 }
 0x155   : > { %v1443_v45 = vpop.f32.mrf.mxu1  ;;  %v4080_v60 = vld [vmem:[%s4177_s8 + $0xc8] ss:$0 sps:$4 sm:$0x11]  }
 0x156   : > { %v1170_v22 = vpop.f32.mrf.mxu0  ;;  %1949 = vmatmul.mubr.bf16.gmra.mxu0 %v4643_v3  ;;  %v4049_v3 = vld [vmem:[%s6223_s3 + $0x8] sm:$0xff]  }
 0x157   : > { %v4907_v23 = vadd.f32 %v1435_v10, %v1170_v22  ;;  %v1445_v0 = vpop.f32.mrf.mxu1  ;;  %3793 = vmatprep.mubr.msk.bf16.mxu0 %vm505_vm0, %v1652_v19  ;;  %3847 = vmatprep.subr.bf16.mxu1 %v4049_v3  ;;  %v1675_v19 = vrot.slane %v4080_v60, 1 }
 0x158   : > { %v1172_v54 = vpop.f32.mrf.mxu0  ;;  %3848 = vmatpush3.bf16.msra.mxu1 %v4049_v3  ;;  %v1681_v3 = vrot.slane %v4822_v62, 1 }
 0x159   : > { %v1446_v25 = vpop.f32.mrf.mxu1  ;;  %3849 = vmatprep.subr.bf16.mxu1 %v4050_v24  ;;  %v1676_v55 = vsel %vm1586_vm2, %v1674_v15, %v1675_v19 }
 0x15a   : > { %v1173_v43 = vpop.f32.mrf.mxu0 }
 0x15b   : > { %v4912_v44 = vadd.f32 %v1438_v26, %v1173_v43  ;;  %v1448_v46 = vpop.f32.mrf.mxu1 }
 0x15c   : > { %v1175_v33 = vpop.f32.mrf.mxu0  ;;  %3850 = vmatpush3.bf16.msra.mxu1 %v4050_v24  ;;  %v1680_v46 = vrot.slane %v4818_v41, 1 }
 0x15d   : > { %v1451_v63 = vpop.f32.mrf.mxu1 }
 0x15e   : > { %v1178_v36 = vpop.f32.mrf.mxu0  ;;  %1957 = vmatmul.mubr.bf16.gmra.mxu0 %v4657_v2  ;;  %v1682_v24 = vsel %vm1586_vm2, %v1680_v46, %v1681_v3 }
 0x15f   : > { %v4919_v53 = vadd.f32 %v1443_v45, %v1178_v36  ;;  %v1453_v20 = vpop.f32.mrf.mxu1  ;;  %3794 = vmatprep.mubr.msk.bf16.mxu0 %vm505_vm0, %v1658_v49 }
 0x160   : > { %v1180_v8 = vpop.f32.mrf.mxu0 }
 0x161   : > { %v1454_v58 = vpop.f32.mrf.mxu1 }
 0x162   : > { %v1181_v2 = vpop.f32.mrf.mxu0 }
 0x163   : > { %v4927_v59 = vadd.f32 %v1446_v25, %v1181_v2  ;;  %v1456_v52 = vpop.f32.mrf.mxu1 }
 0x164   : > { %v1183_v31 = vpop.f32.mrf.mxu0 }
 0x165   : > { %v1459_v9 = vpop.f32.mrf.mxu1 }
 0x166   : > { %v1186_v17 = vpop.f32.mrf.mxu0  ;;  %1965 = vmatmul.mubr.bf16.gmra.mxu0 %v4690_v32  ;;  %v1670_v32 = vsel %vm1586_vm2, %v1668_v48, %v1669_v30 }
 0x167   : > { %v4931_v56 = vadd.f32 %v1451_v63, %v1186_v17  ;;  %v1461_v13 = vpop.f32.mrf.mxu1  ;;  %3795 = vmatprep.mubr.msk.bf16.mxu0 %vm505_vm0, %v1664_v35 }
 0x168   : > { %v1188_v27 = vpop.f32.mrf.mxu0 }
 0x169   : > { %v1462_v37 = vpop.f32.mrf.mxu1 }
 0x16a   : > { %v1189_v10 = vpop.f32.mrf.mxu0 }
 0x16b   : > { %v4936_v14 = vadd.f32 %v1454_v58, %v1189_v10  ;;  %v1464_v51 = vpop.f32.mrf.mxu1 }
 0x16c   : > { %v1191_v4 = vpop.f32.mrf.mxu0 }
 0x16d   : > { %v1467_v61 = vpop.f32.mrf.mxu1 }
 0x16e   : > { %v1194_v38 = vpop.f32.mrf.mxu0  ;;  %1973 = vmatmul.mubr.bf16.gmra.mxu0 %v4704_v18 }
 0x16f   : > { %v4940_v39 = vadd.f32 %v1459_v9, %v1194_v38  ;;  %v1469_v42 = vpop.f32.mrf.mxu1  ;;  %3796 = vmatprep.mubr.msk.bf16.mxu0 %vm505_vm0, %v1670_v32 }
 0x170   : > { %v1196_v26 = vpop.f32.mrf.mxu0 }
 0x171   : > { %v1470_v45 = vpop.f32.mrf.mxu1 }
 0x172   : > { %v1197_v22 = vpop.f32.mrf.mxu0 }
 0x173   : > { %v4945_v0 = vadd.f32 %v1462_v37, %v1197_v22  ;;  %v1472_v54 = vpop.f32.mrf.mxu1 }
 0x174   : > { %v1199_v5 = vpop.f32.mrf.mxu0 }
 0x175   : > { %v1475_v11 = vpop.f32.mrf.mxu1 }
 0x176   : > { %v1202_v18 = vpop.f32.mrf.mxu0  ;;  %1981 = vmatmul.mubr.bf16.gmra.mxu0 %v4725_v12 }
 0x177   : > { %v4949_v6 = vadd.f32 %v1467_v61, %v1202_v18  ;;  %v1477_v25 = vpop.f32.mrf.mxu1  ;;  %3797 = vmatprep.mubr.msk.bf16.mxu0 %vm505_vm0, %v1676_v55 }
 0x178   : > { %v1204_v43 = vpop.f32.mrf.mxu0 }
 0x179   : > { %v1478_v33 = vpop.f32.mrf.mxu1 }
 0x17a   : > { %v1205_v49 = vpop.f32.mrf.mxu0 }
 0x17b   : > { %v4954_v63 = vadd.f32 %v1470_v45, %v1205_v49  ;;  %v1480_v36 = vpop.f32.mrf.mxu1 }
 0x17c   : > { %v1207_v20 = vpop.f32.mrf.mxu0 }
 0x17d   : > { %v1483_v8 = vpop.f32.mrf.mxu1 }
 0x17e   : > { %v1210_v12 = vpop.f32.mrf.mxu0  ;;  %1989 = vmatmul.mubr.bf16.gmra.mxu0 %v4744_v29 }
 0x17f   : > { %v4958_v50 = vadd.f32 %v1475_v11, %v1210_v12  ;;  %v1485_v40 = vpop.f32.mrf.mxu1  ;;  %3798 = vmatprep.mubr.msk.bf16.mxu0 %vm505_vm0, %v1682_v24 }
 0x180   : > { %v1212_v41 = vpop.f32.mrf.mxu0 }
 0x181   : > { %v1486_v21 = vpop.f32.mrf.mxu1 }
 0x182   : > { %v1213_v62 = vpop.f32.mrf.mxu0 }
 0x183   : > { %v4961_v34 = vadd.f32 %v1478_v33, %v1213_v62  ;;  %v1488_v58 = vpop.f32.mrf.mxu1 }
 0x184   : > { %v1215_v2 = vpop.f32.mrf.mxu0 }
 0x185   : > { %v1491_v52 = vpop.f32.mrf.mxu1 }
 0x186   : > { %v1218_v31 = vpop.f32.mrf.mxu0  ;;  %1997 = vmatmul.mubr.bf16.gmra.mxu0 %v4753_v16 }
 0x187   : > { %v4964_v35 = vadd.f32 %v1483_v8, %v1218_v31  ;;  %v1493_v9 = vpop.f32.mrf.mxu1 }
 0x188   : > { %v1220_v29 = vpop.f32.mrf.mxu0 }
 0x189   : > { %v1494_v17 = vpop.f32.mrf.mxu1 }
 0x18a   : > { %v1221_v13 = vpop.f32.mrf.mxu0 }
 0x18b   : > { %v4966_v27 = vadd.f32 %v1486_v21, %v1221_v13  ;;  %v1496_v1 = vpop.f32.mrf.mxu1 }
 0x18c   : > { %v1223_v48 = vpop.f32.mrf.mxu0 }
 0x18d   : > { %v1499_v57 = vpop.f32.mrf.mxu1 }
 0x18e   : > { %v1226_v30 = vpop.f32.mrf.mxu0 }
 0x18f   : > { %v4968_v37 = vadd.f32 %v1491_v52, %v1226_v30  ;;  %v1501_v10 = vpop.f32.mrf.mxu1 }
 0x190   : > { %v1228_v51 = vpop.f32.mrf.mxu0 }
 0x191   : > { %v1502_v4 = vpop.f32.mrf.mxu1 }
 0x192   : > { %v1229_v32 = vpop.f32.mrf.mxu0 }
 0x193   : > { %v4970_v61 = vadd.f32 %v1494_v17, %v1229_v32  ;;  %v1504_v16 = vpop.f32.mrf.mxu1 }
 0x194   : > { %v1231_v38 = vpop.f32.mrf.mxu0 }
 0x195   : > { %v1507_v42 = vpop.f32.mrf.mxu1 }
 0x196   : > { %v1234_v26 = vpop.f32.mrf.mxu0 }
 0x197   : > { %v4972_v7 = vadd.f32 %v1499_v57, %v1234_v26  ;;  %v1509_v15 = vpop.f32.mrf.mxu1 }
 0x198   : > { %v1236_v60 = vpop.f32.mrf.mxu0 }
 0x199   : > { %v1510_v19 = vpop.f32.mrf.mxu1 }
 0x19a   : > { %v1237_v45 = vpop.f32.mrf.mxu0 }
 0x19b   : > { %v4974_v22 = vadd.f32 %v1502_v4, %v1237_v45  ;;  %v1512_v54 = vpop.f32.mrf.mxu1 }
 0x19c   : > { %v1239_v5 = vpop.f32.mrf.mxu0 }
 0x19d   : > { %v1515_v55 = vpop.f32.mrf.mxu1 }
 0x19e   : > { %v1242_v11 = vpop.f32.mrf.mxu0 }
 0x19f   : > { %v4976_v18 = vadd.f32 %v1507_v42, %v1242_v11  ;;  %v1517_v25 = vpop.f32.mrf.mxu1 }
 0x1a0   : > { %v1244_v43 = vpop.f32.mrf.mxu0 }
 0x1a1   : > { %v1518_v46 = vpop.f32.mrf.mxu1 }
 0x1a2   : > { %v1245_v3 = vpop.f32.mrf.mxu0 }
 0x1a3   : > { %v4978_v33 = vadd.f32 %v1510_v19, %v1245_v3  ;;  %v1520_v49 = vpop.f32.mrf.mxu1 }
 0x1a4   : > { %v1247_v36 = vpop.f32.mrf.mxu0 }
 0x1a5   : > { %v1523_v20 = vpop.f32.mrf.mxu1 }
 0x1a6   : > { %v1250_v24 = vpop.f32.mrf.mxu0 }
 0x1a7   : > { %v4980_v8 = vadd.f32 %v1515_v55, %v1250_v24  ;;  %v1525_v12 = vpop.f32.mrf.mxu1 }
 0x1a8   : > { %v1252_v40 = vpop.f32.mrf.mxu0 }
 0x1a9   : > { %v1526_v41 = vpop.f32.mrf.mxu1 }
 0x1aa   : > { %v1253_v21 = vpop.f32.mrf.mxu0 }
 0x1ab   : > { %v4982_v62 = vadd.f32 %v1518_v46, %v1253_v21  ;;  %v1528_v58 = vpop.f32.mrf.mxu1  ;;  %v5003_v21 = vld [vmem:[%s6222_s2] ss:$0 sm:$0xff] }
 0x1ac   : > { %v1255_v2 = vpop.f32.mrf.mxu0 }
 0x1ad   : > { %v1531_v52 = vpop.f32.mrf.mxu1 }
 0x1ae   : > { %v1258_v31 = vpop.f32.mrf.mxu0 }
 0x1af   : > { %v4984_v9 = vadd.f32 %v1523_v20, %v1258_v31  ;;  %v1533_v29 = vpop.f32.mrf.mxu1 }
 0x1b0   : > { %v1260_v17 = vpop.f32.mrf.mxu0 }
 0x1b1   : > { %v1534_v13 = vpop.f32.mrf.mxu1 }
 0x1b2   : > { %v1261_v1 = vpop.f32.mrf.mxu0 }
 0x1b3   : > { %v4986_v48 = vadd.f32 %v1526_v41, %v1261_v1  ;;  %v1536_v57 = vpop.f32.mrf.mxu1 }
 0x1b4   : > { %v1263_v30 = vpop.f32.mrf.mxu0 }
 0x1b5   : > { %v1539_v10 = vpop.f32.mrf.mxu1 }
 0x1b6   : > { %v1266_v51 = vpop.f32.mrf.mxu0 }
 0x1b7   : > { %v4988_v4 = vadd.f32 %v1531_v52, %v1266_v51  ;;  %v1541_v32 = vpop.f32.mrf.mxu1 }
 0x1b8   : > { %v1268_v16 = vpop.f32.mrf.mxu0 }
 0x1b9   : > { %v1542_v38 = vpop.f32.mrf.mxu1 }
 0x1ba   : > { %v1269_v42 = vpop.f32.mrf.mxu0 }
 0x1bb   : > { %v4990_v26 = vadd.f32 %v1534_v13, %v1269_v42  ;;  %v1544_v15 = vpop.f32.mrf.mxu1 }
 0x1bc   : > { %v1271_v60 = vpop.f32.mrf.mxu0 }
 0x1bd   : > { %v1547_v19 = vpop.f32.mrf.mxu1 }
 0x1be   : > { %v1274_v45 = vpop.f32.mrf.mxu0 }
 0x1bf   : > { %v4992_v54 = vadd.f32 %v1539_v10, %v1274_v45  ;;  %v1549_v5 = vpop.f32.mrf.mxu1 }
 0x1c0   : > { %v1276_v55 = vpop.f32.mrf.mxu0 }
 0x1c1   : > { %v1550_v11 = vpop.f32.mrf.mxu1 }
 0x1c2   : > { %v1277_v25 = vpop.f32.mrf.mxu0 }
 0x1c3   : > { %v4994_v43 = vadd.f32 %v1542_v38, %v1277_v25  ;;  %v1552_v46 = vpop.f32.mrf.mxu1 }
 0x1c4   : > { %v1279_v3 = vpop.f32.mrf.mxu0 }
 0x1c6   : > { %v1282_v49 = vpop.f32.mrf.mxu0 }
 0x1c7   : > { %v4996_v36 = vadd.f32 %v1547_v19, %v1282_v49 }
 0x1c8   : > { %v1284_v20 = vpop.f32.mrf.mxu0 }
 0x1ca   : > { %v1285_v24 = vpop.f32.mrf.mxu0 }
 0x1cb   : > { %v4998_v12 = vadd.f32 %v1550_v11, %v1285_v24 }
 0x1cc   : > { %v1287_v40 = vpop.f32.mrf.mxu0 }
 0x1ce   : > { %v1878_v41 = vpop.f32.mrf.mxu0 }
 0x1cf   : > { %v2005_v58 = vadd.f32 %v1878_v41, %v4898_v28 }
 0x1d0   : > { %v1880_v2 = vpop.f32.mrf.mxu0 }
 0x1d1   : > { %v2044_v52 = vadd.f32 %v5003_v21, %v2005_v58 }
 0x1d2   : > { %v1881_v31 = vpop.f32.mrf.mxu0 }
 0x1d3   : > { %v2006_v29 = vadd.f32 %v1881_v31, %v4903_v47  ;;  %v2076_v13 = vmax.f32 %v2044_v52, 0.0 }
 0x1d4   : > { %v1883_v17 = vpop.f32.mrf.mxu0 }
 0x1d5   : > { %v2045_v1 = vadd.f32 %v5003_v21, %v2006_v29  ;;  %v2108_v32 = vmin.f32 %v2076_v13, 6.0 }
 0x1d6   : > { %v1886_v57 = vpop.f32.mrf.mxu0 }
 0x1d7   : > { %v2077_v30 = vmax.f32 %v2045_v1, 0.0  ;;  %v2007_v10 = vadd.f32 %v1886_v57, %v4907_v23 }
 0x1d8   : > { %v1888_v51 = vpop.f32.mrf.mxu0 }
 0x1d9   : > { %v2109_v16 = vmin.f32 %v2077_v30, 6.0  ;;  %v2046_v38 = vadd.f32 %v5003_v21, %v2007_v10 }
 0x1da   : > { %v1889_v28 = vpop.f32.mrf.mxu0 }
 0x1db   : > { %v2140_v42 = vpack.c.bf16 %v2109_v16, %v2108_v32  ;;  %v2008_v15 = vadd.f32 %v1889_v28, %v4912_v44  ;;  %v2078_v19 = vmax.f32 %v2046_v38, 0.0 }
 0x1dc   : > { %v1891_v60 = vpop.f32.mrf.mxu0 }
 0x1dd   : > { %v2047_v47 = vadd.f32 %v5003_v21, %v2008_v15  ;;  %3851 = vmatprep.mubr.msk.bf16.mxu1 %vm505_vm0, %v2140_v42  ;;  %v2110_v11 = vmin.f32 %v2078_v19, 6.0 }
 0x1de   : > { %v1894_v45 = vpop.f32.mrf.mxu0 }
 0x1df   : > { %v2079_v5 = vmax.f32 %v2047_v47, 0.0  ;;  %v2009_v55 = vadd.f32 %v1894_v45, %v4919_v53 }
 0x1e0   : > { %v1896_v23 = vpop.f32.mrf.mxu0 }
 0x1e1   : > { %v2111_v25 = vmin.f32 %v2079_v5, 6.0  ;;  %v2048_v46 = vadd.f32 %v5003_v21, %v2009_v55 }
 0x1e2   : > { %v1897_v3 = vpop.f32.mrf.mxu0 }
 0x1e3   : > { %v2141_v49 = vpack.c.bf16 %v2111_v25, %v2110_v11  ;;  %v2010_v20 = vadd.f32 %v1897_v3, %v4927_v59  ;;  %v2080_v24 = vmax.f32 %v2048_v46, 0.0 }
 0x1e4   : > { %v1899_v44 = vpop.f32.mrf.mxu0 }
 0x1e5   : > { %v2049_v40 = vadd.f32 %v5003_v21, %v2010_v20  ;;  %3852 = vmatmul.mubr.msk.bf16.vlgmr.msra.gmra.mxu1 %vm505_vm0, %v2141_v49  ;;  %v2112_v52 = vmin.f32 %v2080_v24, 6.0 }
 0x1e6   : > { %v1902_v41 = vpop.f32.mrf.mxu0 }
 0x1e7   : > { %v2081_v58 = vmax.f32 %v2049_v40, 0.0  ;;  %v2011_v2 = vadd.f32 %v1902_v41, %v4931_v56 }
 0x1e8   : > { %v1904_v53 = vpop.f32.mrf.mxu0 }
 0x1e9   : > { %v2113_v31 = vmin.f32 %v2081_v58, 6.0  ;;  %v2050_v29 = vadd.f32 %v5003_v21, %v2011_v2 }
 0x1ea   : > { %v1905_v17 = vpop.f32.mrf.mxu0 }
 0x1eb   : > { %v2142_v13 = vpack.c.bf16 %v2113_v31, %v2112_v52  ;;  %v2012_v1 = vadd.f32 %v1905_v17, %v4936_v14  ;;  %v2082_v57 = vmax.f32 %v2050_v29, 0.0 }
 0x1ec   : > { %v1907_v59 = vpop.f32.mrf.mxu0 }
 0x1ed   : > { %v2051_v30 = vadd.f32 %v5003_v21, %v2012_v1  ;;  %3855 = vmatprep.mubr.msk.bf16.mxu1 %vm505_vm0, %v2142_v13  ;;  %v2114_v16 = vmin.f32 %v2082_v57, 6.0 }
 0x1ee   : > { %v1910_v10 = vpop.f32.mrf.mxu0 }
 0x1ef   : > { %v2083_v51 = vmax.f32 %v2051_v30, 0.0  ;;  %v2013_v32 = vadd.f32 %v1910_v10, %v4940_v39 }
 0x1f0   : > { %v1912_v56 = vpop.f32.mrf.mxu0 }
 0x1f1   : > { %v2115_v38 = vmin.f32 %v2083_v51, 6.0  ;;  %v2052_v28 = vadd.f32 %v5003_v21, %v2013_v32 }
 0x1f2   : > { %v1913_v42 = vpop.f32.mrf.mxu0 }
 0x1f3   : > { %v2143_v15 = vpack.c.bf16 %v2115_v38, %v2114_v16  ;;  %v2014_v60 = vadd.f32 %v1913_v42, %v4945_v0  ;;  %v2084_v19 = vmax.f32 %v2052_v28, 0.0 }
 0x1f4   : > { %v1915_v14 = vpop.f32.mrf.mxu0 }
 0x1f5   : > { %v2053_v47 = vadd.f32 %v5003_v21, %v2014_v60  ;;  %3856 = vmatmul.mubr.msk.bf16.gmra.mxu1 %vm505_vm0, %v2143_v15  ;;  %v2116_v23 = vmin.f32 %v2084_v19, 6.0 }
 0x1f6   : > { %v1918_v45 = vpop.f32.mrf.mxu0 }
 0x1f7   : > { %v2085_v5 = vmax.f32 %v2053_v47, 0.0  ;;  %v2015_v55 = vadd.f32 %v1918_v45, %v4949_v6 }
 0x1f8   : > { %v1920_v39 = vpop.f32.mrf.mxu0 }
 0x1f9   : > { %v2117_v11 = vmin.f32 %v2085_v5, 6.0  ;;  %v2054_v25 = vadd.f32 %v5003_v21, %v2015_v55 }
 0x1fa   : > { %v1921_v46 = vpop.f32.mrf.mxu0 }
 0x1fb   : > { %v2144_v3 = vpack.c.bf16 %v2117_v11, %v2116_v23  ;;  %v2016_v49 = vadd.f32 %v1921_v46, %v4954_v63  ;;  %v2086_v20 = vmax.f32 %v2054_v25, 0.0 }
 0x1fc   : > { %v1923_v0 = vpop.f32.mrf.mxu0 }
 0x1fd   : > { %v2055_v44 = vadd.f32 %v5003_v21, %v2016_v49  ;;  %3859 = vmatprep.mubr.msk.bf16.mxu1 %vm505_vm0, %v2144_v3  ;;  %v2118_v58 = vmin.f32 %v2086_v20, 6.0 }
 0x1fe   : > { %v1926_v24 = vpop.f32.mrf.mxu0 }
 0x1ff   : > { %v2087_v40 = vmax.f32 %v2055_v44, 0.0  ;;  %v2017_v41 = vadd.f32 %v1926_v24, %v4958_v50 }
 0x200   : > { %v1928_v6 = vpop.f32.mrf.mxu0 }
 0x201   : > { %v2119_v2 = vmin.f32 %v2087_v40, 6.0  ;;  %v2056_v53 = vadd.f32 %v5003_v21, %v2017_v41 }
 0x202   : > { %v1929_v52 = vpop.f32.mrf.mxu0 }
 0x203   : > { %v2145_v31 = vpack.c.bf16 %v2119_v2, %v2118_v58  ;;  %v2018_v29 = vadd.f32 %v1929_v52, %v4961_v34  ;;  %v2088_v17 = vmax.f32 %v2056_v53, 0.0 }
 0x204   : > { %v1931_v63 = vpop.f32.mrf.mxu0 }
 0x205   : > { %v2057_v13 = vadd.f32 %v5003_v21, %v2018_v29  ;;  %3860 = vmatmul.mubr.msk.bf16.gmra.mxu1 %vm505_vm0, %v2145_v31  ;;  %v2120_v30 = vmin.f32 %v2088_v17, 6.0 }
 0x206   : > { %v1934_v1 = vpop.f32.mrf.mxu0 }
 0x207   : > { %v2089_v59 = vmax.f32 %v2057_v13, 0.0  ;;  %v2019_v57 = vadd.f32 %v1934_v1, %v4964_v35 }
 0x208   : > { %v1936_v50 = vpop.f32.mrf.mxu0 }
 0x209   : > { %v2121_v10 = vmin.f32 %v2089_v59, 6.0  ;;  %v2058_v51 = vadd.f32 %v5003_v21, %v2019_v57 }
 0x20a   : > { %v1937_v32 = vpop.f32.mrf.mxu0 }
 0x20b   : > { %v2146_v56 = vpack.c.bf16 %v2121_v10, %v2120_v30  ;;  %v2020_v16 = vadd.f32 %v1937_v32, %v4966_v27  ;;  %v2090_v38 = vmax.f32 %v2058_v51, 0.0 }
 0x20c   : > { %v1939_v34 = vpop.f32.mrf.mxu0 }
 0x20d   : > { %v2059_v28 = vadd.f32 %v5003_v21, %v2020_v16  ;;  %3863 = vmatprep.mubr.msk.bf16.mxu1 %vm505_vm0, %v2146_v56  ;;  %v2122_v14 = vmin.f32 %v2090_v38, 6.0 }
 0x20e   : > { %v1942_v42 = vpop.f32.mrf.mxu0 }
 0x20f   : > { %v2091_v15 = vmax.f32 %v2059_v28, 0.0  ;;  %v2021_v60 = vadd.f32 %v1942_v42, %v4968_v37 }
 0x210   : > { %v1944_v35 = vpop.f32.mrf.mxu0 }
 0x211   : > { %v2123_v19 = vmin.f32 %v2091_v15, 6.0  ;;  %v2060_v47 = vadd.f32 %v5003_v21, %v2021_v60 }
 0x212   : > { %v1945_v45 = vpop.f32.mrf.mxu0 }
 0x213   : > { %v2147_v5 = vpack.c.bf16 %v2123_v19, %v2122_v14  ;;  %v2022_v55 = vadd.f32 %v1945_v45, %v4970_v61  ;;  %v2092_v39 = vmax.f32 %v2060_v47, 0.0 }
 0x214   : > { %v1947_v27 = vpop.f32.mrf.mxu0 }
 0x215   : > { %v2061_v23 = vadd.f32 %v5003_v21, %v2022_v55  ;;  %3864 = vmatmul.mubr.msk.bf16.gmra.mxu1 %vm505_vm0, %v2147_v5  ;;  %v2124_v3 = vmin.f32 %v2092_v39, 6.0 }
 0x216   : > { %v1950_v11 = vpop.f32.mrf.mxu0 }
 0x217   : > { %v2093_v25 = vmax.f32 %v2061_v23, 0.0  ;;  %v2023_v46 = vadd.f32 %v1950_v11, %v4972_v7 }
 0x218   : > { %v1952_v37 = vpop.f32.mrf.mxu0 }
 0x219   : > { %v2125_v49 = vmin.f32 %v2093_v25, 6.0  ;;  %v2062_v0 = vadd.f32 %v5003_v21, %v2023_v46 }
 0x21a   : > { %v1953_v20 = vpop.f32.mrf.mxu0 }
 0x21b   : > { %v2148_v44 = vpack.c.bf16 %v2125_v49, %v2124_v3  ;;  %v2024_v24 = vadd.f32 %v1953_v20, %v4974_v22  ;;  %v2094_v40 = vmax.f32 %v2062_v0, 0.0 }
 0x21c   : > { %v1955_v61 = vpop.f32.mrf.mxu0 }
 0x21d   : > { %v2063_v41 = vadd.f32 %v5003_v21, %v2024_v24  ;;  %3867 = vmatprep.mubr.msk.bf16.mxu1 %vm505_vm0, %v2148_v44  ;;  %v2126_v53 = vmin.f32 %v2094_v40, 6.0 }
 0x21e   : > { %v1958_v6 = vpop.f32.mrf.mxu0 }
 0x21f   : > { %v2095_v58 = vmax.f32 %v2063_v41, 0.0  ;;  %v2025_v2 = vadd.f32 %v1958_v6, %v4976_v18 }
 0x220   : > { %v1960_v7 = vpop.f32.mrf.mxu0 }
 0x221   : > { %v2127_v52 = vmin.f32 %v2095_v58, 6.0  ;;  %v2064_v31 = vadd.f32 %v5003_v21, %v2025_v2 }
 0x222   : > { %v1961_v29 = vpop.f32.mrf.mxu0 }
 0x223   : > { %v2149_v63 = vpack.c.bf16 %v2127_v52, %v2126_v53  ;;  %v2026_v17 = vadd.f32 %v1961_v29, %v4978_v33  ;;  %v2096_v13 = vmax.f32 %v2064_v31, 0.0 }
 0x224   : > { %v1963_v22 = vpop.f32.mrf.mxu0 }
 0x225   : > { %v2065_v1 = vadd.f32 %v5003_v21, %v2026_v17  ;;  %3868 = vmatmul.mubr.msk.bf16.gmra.mxu1 %vm505_vm0, %v2149_v63  ;;  %v2128_v30 = vmin.f32 %v2096_v13, 6.0 }
 0x226   : > { %v1966_v59 = vpop.f32.mrf.mxu0 }
 0x227   : > { %v2097_v57 = vmax.f32 %v2065_v1, 0.0  ;;  %v2027_v50 = vadd.f32 %v1966_v59, %v4980_v8 }
 0x228   : > { %v1968_v18 = vpop.f32.mrf.mxu0 }
 0x229   : > { %v2129_v10 = vmin.f32 %v2097_v57, 6.0  ;;  %v2066_v51 = vadd.f32 %v5003_v21, %v2027_v50 }
 0x22a   : > { %v1969_v32 = vpop.f32.mrf.mxu0 }
 0x22b   : > { %v2150_v56 = vpack.c.bf16 %v2129_v10, %v2128_v30  ;;  %v2028_v16 = vadd.f32 %v1969_v32, %v4982_v62  ;;  %v2098_v34 = vmax.f32 %v2066_v51, 0.0 }
 0x22c   : > { %v1971_v33 = vpop.f32.mrf.mxu0 }
 0x22d   : > { %v2067_v38 = vadd.f32 %v5003_v21, %v2028_v16  ;;  %3871 = vmatprep.mubr.msk.bf16.mxu1 %vm505_vm0, %v2150_v56  ;;  %v2130_v60 = vmin.f32 %v2098_v34, 6.0 }
 0x22e   : > { %v1974_v28 = vpop.f32.mrf.mxu0 }
 0x22f   : > { %v2099_v42 = vmax.f32 %v2067_v38, 0.0  ;;  %v2029_v15 = vadd.f32 %v1974_v28, %v4984_v9 }
 0x230   : > { %v1976_v8 = vpop.f32.mrf.mxu0 }
 0x231   : > { %v2131_v35 = vmin.f32 %v2099_v42, 6.0  ;;  %v2068_v14 = vadd.f32 %v5003_v21, %v2029_v15  ;;  %v2548_v42 = vld [vmem:[%s6224_s4 + $0x388] sm:$0xff] }
 0x232   : > { %v1977_v19 = vpop.f32.mrf.mxu0 }
 0x233   : > { %v2151_v47 = vpack.c.bf16 %v2131_v35, %v2130_v60  ;;  %v2030_v45 = vadd.f32 %v1977_v19, %v4986_v48  ;;  %v2100_v5 = vmax.f32 %v2068_v14, 0.0 }
 0x234   : > { %v1979_v62 = vpop.f32.mrf.mxu0 }
 0x235   : > { %v2069_v55 = vadd.f32 %v5003_v21, %v2030_v45  ;;  %3872 = vmatmul.mubr.msk.bf16.gmra.mxu1 %vm505_vm0, %v2151_v47  ;;  %v2132_v11 = vmin.f32 %v2100_v5, 6.0 }
 0x236   : > { %v1982_v27 = vpop.f32.mrf.mxu0 }
 0x237   : > { %v2101_v39 = vmax.f32 %v2069_v55, 0.0  ;;  %v2031_v23 = vadd.f32 %v1982_v27, %v4988_v4 }
 0x238   : > { %v1984_v9 = vpop.f32.mrf.mxu0 }
 0x239   : > { %v2133_v25 = vmin.f32 %v2101_v39, 6.0  ;;  %v2070_v46 = vadd.f32 %v5003_v21, %v2031_v23 }
 0x23a   : > { %v1985_v37 = vpop.f32.mrf.mxu0 }
 0x23b   : > { %v2152_v3 = vpack.c.bf16 %v2133_v25, %v2132_v11  ;;  %v2032_v49 = vadd.f32 %v1985_v37, %v4990_v26  ;;  %v2102_v0 = vmax.f32 %v2070_v46, 0.0 }
 0x23c   : > { %v1987_v48 = vpop.f32.mrf.mxu0 }
 0x23d   : > { %v2071_v20 = vadd.f32 %v5003_v21, %v2032_v49  ;;  %3875 = vmatprep.mubr.msk.bf16.mxu1 %vm505_vm0, %v2152_v3  ;;  %v2134_v40 = vmin.f32 %v2102_v0, 6.0 }
 0x23e   : > { %v1990_v44 = vpop.f32.mrf.mxu0 }
 0x23f   : > { %v2103_v24 = vmax.f32 %v2071_v20, 0.0  ;;  %v2033_v61 = vadd.f32 %v1990_v44, %v4992_v54 }
 0x240   : > { %v1992_v4 = vpop.f32.mrf.mxu0 }
 0x241   : > { %v2135_v41 = vmin.f32 %v2103_v24, 6.0  ;;  %v2072_v6 = vadd.f32 %v5003_v21, %v2033_v61 }
 0x242   : > { %v1993_v58 = vpop.f32.mrf.mxu0 }
 0x243   : > { %v2153_v2 = vpack.c.bf16 %v2135_v41, %v2134_v40  ;;  %v2034_v7 = vadd.f32 %v1993_v58, %v4994_v43  ;;  %v2104_v53 = vmax.f32 %v2072_v6, 0.0 }
 0x244   : > { %v1995_v26 = vpop.f32.mrf.mxu0 }
 0x245   : > { %v2073_v52 = vadd.f32 %v5003_v21, %v2034_v7  ;;  %3876 = vmatmul.mubr.msk.bf16.gmra.mxu1 %vm505_vm0, %v2153_v2  ;;  %v2136_v17 = vmin.f32 %v2104_v53, 6.0  ;;  %v2436_v2 = vld [vmem:[%s6224_s4 + $0x8] sm:$0xff] }
 0x246   : > { %v1998_v31 = vpop.f32.mrf.mxu0  ;;  %2787 = vmatprep.mubr.f32.mxu0 %v2436_v2  ;;  %v2456_v2 = vld [vmem:[%s6224_s4 + $0xa8] sm:$0xff] }
 0x247   : > { %v2105_v29 = vmax.f32 %v2073_v52, 0.0  ;;  %v2035_v63 = vadd.f32 %v1998_v31, %v4996_v36  ;;  %v4107_v36 = vmov 0.0  }
 0x248   : > { %v2000_v54 = vpop.f32.mrf.mxu0  ;;  %2723 = vmatprep.subr.mxu0 %v4107_v36  ;;  %3883 = vmatprep.subr.mxu1 %v4107_v36 }
 0x249   : > { %v2137_v22 = vmin.f32 %v2105_v29, 6.0  ;;  %v2074_v13 = vadd.f32 %v5003_v21, %v2035_v63 }
 0x24a   : > { %v2001_v1 = vpop.f32.mrf.mxu0 }
 0x24b   : > { %v2154_v59 = vpack.c.bf16 %v2137_v22, %v2136_v17  ;;  %v2036_v57 = vadd.f32 %v2001_v1, %v4998_v12  ;;  %v2106_v50 = vmax.f32 %v2074_v13, 0.0 }
 0x24c   : > { %v2003_v43 = vpop.f32.mrf.mxu0 }
 0x24d   : > { %v2075_v18 = vadd.f32 %v5003_v21, %v2036_v57  ;;  %3879 = vmatprep.mubr.msk.bf16.mxu1 %vm505_vm0, %v2154_v59  ;;  %v2138_v10 = vmin.f32 %v2106_v50, 6.0 }
 0x24f   : > { %v2107_v30 = vmax.f32 %v2075_v18, 0.0 }
 0x251   : > { %v2139_v51 = vmin.f32 %v2107_v30, 6.0 }
 0x253   : > { %v2155_v32 = vpack.c.bf16 %v2139_v51, %v2138_v10 }
 0x255   : > { %3880 = vmatmul.mubr.msk.bf16.gmra.mxu1 %vm505_vm0, %v2155_v32 }
 0x256   : > { %3067 = vmatprep.mubr.f32.mxu1 %v2548_v42  ;;  %v2552_v42 = vld [vmem:[%s6224_s4 + $0x3a8] sm:$0xff] }
 0x2a5   : > { %v3853_v56 = vpop.f32.mrf.mxu1 }
 0x2a6   : > { %2401 = vst.msk [vmem:[#allocation2 + $0x10] sm:$0xff] %vm2398_vm3, %v3853_v56 }
 0x2a7   : > { %v2270_v12 = vpop.f32.mrf.mxu1 }
 0x2a8   : > { %2399 = vst.msk [vmem:[#allocation2] sm:$0xff] %vm2398_vm3, %v2270_v12 }
 0x2a9   : > { %v3854_v21 = vpop.f32.mrf.mxu1 }
 0x2aa   : > { %2402 = vst.msk [vmem:[#allocation2 + $0x18] sm:$0xff] %vm2398_vm3, %v3854_v21  ;;  %v2547_v21 = vld [vmem:[%s6224_s4 + $0x380] sm:$0xff] }
 0x2ab   : > { %v2273_v16 = vpop.f32.mrf.mxu1 }
 0x2ac   : > { %2400 = vst.msk [vmem:[#allocation2 + $0x8] sm:$0xff] %vm2398_vm3, %v2273_v16  ;;  %v2435_v16 = vld [vmem:[%s6224_s4] sm:$0xff] }
 0x2ad   : > { %v2693_v41 = vld [vmem:[#allocation2 + $0x10] sm:$0xff] }
 0x2af   : > { %v2691_v58 = vld [vmem:[#allocation2] sm:$0xff] }
 0x2b1   : > { %v2694_v4 = vld [vmem:[#allocation2 + $0x18] sm:$0xff] }
 0x2b3   : > { %v2692_v6 = vld [vmem:[#allocation2 + $0x8] sm:$0xff] }
 0x2b5   : > { %v3857_v33 = vpop.f32.mrf.mxu1 }
 0x2b6   : > { %2405 = vst.msk [vmem:[#allocation2 + $0x30] sm:$0xff] %vm2398_vm3, %v3857_v33 }
 0x2b7   : > { %v2286_v34 = vpop.f32.mrf.mxu1 }
 0x2b8   : > { %2403 = vst.msk [vmem:[#allocation2 + $0x20] sm:$0xff] %vm2398_vm3, %v2286_v34  ;;  %v2550_v34 = vld [vmem:[%s6224_s4 + $0x398] sm:$0xff] }
 0x2b9   : > { %v3858_v38 = vpop.f32.mrf.mxu1 }
 0x2ba   : > { %2406 = vst.msk [vmem:[#allocation2 + $0x38] sm:$0xff] %vm2398_vm3, %v3858_v38  ;;  %v2438_v38 = vld [vmem:[%s6224_s4 + $0x18] sm:$0xff] }
 0x2bb   : > { %v2289_v28 = vpop.f32.mrf.mxu1 }
 0x2bc   : > { %2404 = vst.msk [vmem:[#allocation2 + $0x28] sm:$0xff] %vm2398_vm3, %v2289_v28  ;;  %v2549_v28 = vld [vmem:[%s6224_s4 + $0x390] sm:$0xff] }
 0x2bd   : > { %v2697_v48 = vld [vmem:[#allocation2 + $0x30] sm:$0xff] }
 0x2bf   : > { %v2695_v24 = vld [vmem:[#allocation2 + $0x20] sm:$0xff] }
 0x2c1   : > { %v2698_v49 = vld [vmem:[#allocation2 + $0x38] sm:$0xff] }
 0x2c3   : > { %v2696_v20 = vld [vmem:[#allocation2 + $0x28] sm:$0xff] }
 0x2c5   : > { %v3861_v15 = vpop.f32.mrf.mxu1 }
 0x2c6   : > { %2409 = vst.msk [vmem:[#allocation2 + $0x50] sm:$0xff] %vm2398_vm3, %v3861_v15  ;;  %v2440_v15 = vld [vmem:[%s6224_s4 + $0x28] sm:$0xff] }
 0x2c7   : > { %v2302_v8 = vpop.f32.mrf.mxu1 }
 0x2c8   : > { %2407 = vst.msk [vmem:[#allocation2 + $0x40] sm:$0xff] %vm2398_vm3, %v2302_v8  ;;  %v2551_v8 = vld [vmem:[%s6224_s4 + $0x3a0] sm:$0xff] }
 0x2c9   : > { %v3862_v60 = vpop.f32.mrf.mxu1 }
 0x2ca   : > { %2410 = vst.msk [vmem:[#allocation2 + $0x58] sm:$0xff] %vm2398_vm3, %v3862_v60  ;;  %v2439_v60 = vld [vmem:[%s6224_s4 + $0x20] sm:$0xff] }
 0x2cb   : > { %v2305_v35 = vpop.f32.mrf.mxu1 }
 0x2cc   : > { %2408 = vst.msk [vmem:[#allocation2 + $0x48] sm:$0xff] %vm2398_vm3, %v2305_v35  ;;  %v2554_v35 = vld [vmem:[%s6224_s4 + $0x3b8] sm:$0xff] }
 0x2cd   : > { %v2701_v46 = vld [vmem:[#allocation2 + $0x50] sm:$0xff] }
 0x2cf   : > { %v2699_v3 = vld [vmem:[#allocation2 + $0x40] sm:$0xff] }
 0x2d1   : > { %v2702_v11 = vld [vmem:[#allocation2 + $0x58] sm:$0xff] }
 0x2d3   : > { %v2700_v37 = vld [vmem:[#allocation2 + $0x48] sm:$0xff] }
 0x2d5   : > { %v3865_v14 = vpop.f32.mrf.mxu1 }
 0x2d6   : > { %2413 = vst.msk [vmem:[#allocation2 + $0x70] sm:$0xff] %vm2398_vm3, %v3865_v14  ;;  %v2442_v14 = vld [vmem:[%s6224_s4 + $0x38] sm:$0xff] }
 0x2d7   : > { %v2318_v19 = vpop.f32.mrf.mxu1 }
 0x2d8   : > { %2411 = vst.msk [vmem:[#allocation2 + $0x60] sm:$0xff] %vm2398_vm3, %v2318_v19  ;;  %v2553_v19 = vld [vmem:[%s6224_s4 + $0x3b0] sm:$0xff] }
 0x2d9   : > { %v3866_v47 = vpop.f32.mrf.mxu1 }
 0x2da   : > { %2414 = vst.msk [vmem:[#allocation2 + $0x78] sm:$0xff] %vm2398_vm3, %v3866_v47  ;;  %v2441_v47 = vld [vmem:[%s6224_s4 + $0x30] sm:$0xff] }
 0x2db   : > { %v2321_v45 = vpop.f32.mrf.mxu1 }
 0x2dc   : > { %2412 = vst.msk [vmem:[#allocation2 + $0x68] sm:$0xff] %vm2398_vm3, %v2321_v45  ;;  %v2556_v45 = vld [vmem:[%s6224_s4 + $0x3c8] sm:$0xff] }
 0x2dd   : > { %v2705_v5 = vld [vmem:[#allocation2 + $0x70] sm:$0xff] }
 0x2df   : > { %v2703_v23 = vld [vmem:[#allocation2 + $0x60] sm:$0xff] }
 0x2e1   : > { %v2706_v62 = vld [vmem:[#allocation2 + $0x78] sm:$0xff] }
 0x2e2   : > { %2724 = vmatpush1.msra.mxu0 %v2706_v62  ;;  %3915 = vmatpush1.msra.mxu1 %v2706_v62  ;;  %v2444_v62 = vld [vmem:[%s6224_s4 + $0x48] sm:$0xff] }
 0x2e3   : > { %2725 = vmatprep.subr.mxu0 %v4107_v36  ;;  %3884 = vmatprep.subr.mxu1 %v4107_v36  ;;  %v2704_v27 = vld [vmem:[#allocation2 + $0x68] sm:$0xff] }
 0x2e4   : > { %2726 = vmatpush1.msra.mxu0 %v2705_v5  ;;  %3916 = vmatpush1.msra.mxu1 %v2705_v5  ;;  %v2555_v5 = vld [vmem:[%s6224_s4 + $0x3c0] sm:$0xff] }
 0x2e5   : > { %v3869_v55 = vpop.f32.mrf.mxu1  ;;  %2727 = vmatprep.subr.mxu0 %v4107_v36  ;;  %3885 = vmatprep.subr.mxu1 %v4107_v36 }
 0x2e6   : > { %2417 = vst.msk [vmem:[#allocation2 + $0x90] sm:$0xff] %vm2398_vm3, %v3869_v55  ;;  %2728 = vmatpush1.msra.mxu0 %v2704_v27  ;;  %3917 = vmatpush1.msra.mxu1 %v2704_v27  ;;  %v2443_v55 = vld [vmem:[%s6224_s4 + $0x40] sm:$0xff]  ;;  %v2558_v27 = vld [vmem:[%s6224_s4 + $0x3d8] sm:$0xff] }
 0x2e7   : > { %v2334_v39 = vpop.f32.mrf.mxu1  ;;  %2729 = vmatprep.subr.mxu0 %v4107_v36  ;;  %3886 = vmatprep.subr.mxu1 %v4107_v36 }
 0x2e8   : > { %2415 = vst.msk [vmem:[#allocation2 + $0x80] sm:$0xff] %vm2398_vm3, %v2334_v39  ;;  %2730 = vmatpush1.msra.mxu0 %v2703_v23  ;;  %3918 = vmatpush1.msra.mxu1 %v2703_v23  ;;  %v2446_v39 = vld [vmem:[%s6224_s4 + $0x58] sm:$0xff]  ;;  %v2557_v23 = vld [vmem:[%s6224_s4 + $0x3d0] sm:$0xff] }
 0x2e9   : > { %v3870_v9 = vpop.f32.mrf.mxu1  ;;  %2731 = vmatprep.subr.mxu0 %v4107_v36  ;;  %3887 = vmatprep.subr.mxu1 %v4107_v36 }
 0x2ea   : > { %2418 = vst.msk [vmem:[#allocation2 + $0x98] sm:$0xff] %vm2398_vm3, %v3870_v9  ;;  %2732 = vmatpush1.msra.mxu0 %v2702_v11  ;;  %3919 = vmatpush1.msra.mxu1 %v2702_v11  ;;  %v2445_v9 = vld [vmem:[%s6224_s4 + $0x50] sm:$0xff]  ;;  %v2560_v11 = vld [vmem:[%s6224_s4 + $0x3e8] sm:$0xff] }
 0x2eb   : > { %v2337_v25 = vpop.f32.mrf.mxu1  ;;  %2733 = vmatprep.subr.mxu0 %v4107_v36  ;;  %3888 = vmatprep.subr.mxu1 %v4107_v36 }
 0x2ec   : > { %2416 = vst.msk [vmem:[#allocation2 + $0x88] sm:$0xff] %vm2398_vm3, %v2337_v25  ;;  %2734 = vmatpush1.msra.mxu0 %v2701_v46  ;;  %3920 = vmatpush1.msra.mxu1 %v2701_v46  ;;  %v2448_v25 = vld [vmem:[%s6224_s4 + $0x68] sm:$0xff]  ;;  %v2559_v46 = vld [vmem:[%s6224_s4 + $0x3e0] sm:$0xff] }
 0x2ed   : > { %2735 = vmatprep.subr.mxu0 %v4107_v36  ;;  %3889 = vmatprep.subr.mxu1 %v4107_v36  ;;  %v2709_v56 = vld [vmem:[#allocation2 + $0x90] sm:$0xff] }
 0x2ee   : > { %2736 = vmatpush1.msra.mxu0 %v2700_v37  ;;  %3921 = vmatpush1.msra.mxu1 %v2700_v37  ;;  %v2447_v37 = vld [vmem:[%s6224_s4 + $0x60] sm:$0xff] }
 0x2ef   : > { %2737 = vmatprep.subr.mxu0 %v4107_v36  ;;  %3890 = vmatprep.subr.mxu1 %v4107_v36  ;;  %v2707_v33 = vld [vmem:[#allocation2 + $0x80] sm:$0xff] }
 0x2f0   : > { %2738 = vmatpush1.msra.mxu0 %v2699_v3  ;;  %3922 = vmatpush1.msra.mxu1 %v2699_v3  ;;  %v2562_v3 = vld [vmem:[%s6224_s4 + $0x3f8] sm:$0xff] }
 0x2f1   : > { %2739 = vmatprep.subr.mxu0 %v4107_v36  ;;  %3891 = vmatprep.subr.mxu1 %v4107_v36  ;;  %v2710_v32 = vld [vmem:[#allocation2 + $0x98] sm:$0xff] }
 0x2f2   : > { %2740 = vmatpush1.msra.mxu0 %v2698_v49  ;;  %3923 = vmatpush1.msra.mxu1 %v2698_v49  ;;  %v2450_v49 = vld [vmem:[%s6224_s4 + $0x78] sm:$0xff] }
 0x2f3   : > { %2741 = vmatprep.subr.mxu0 %v4107_v36  ;;  %3892 = vmatprep.subr.mxu1 %v4107_v36  ;;  %v2708_v12 = vld [vmem:[#allocation2 + $0x88] sm:$0xff] }
 0x2f4   : > { %2742 = vmatpush1.msra.mxu0 %v2697_v48  ;;  %3924 = vmatpush1.msra.mxu1 %v2697_v48  ;;  %v2561_v48 = vld [vmem:[%s6224_s4 + $0x3f0] sm:$0xff] }
 0x2f5   : > { %v3873_v0 = vpop.f32.mrf.mxu1  ;;  %2743 = vmatprep.subr.mxu0 %v4107_v36  ;;  %3893 = vmatprep.subr.mxu1 %v4107_v36 }
 0x2f6   : > { %2421 = vst.msk [vmem:[#allocation2 + $0xb0] sm:$0xff] %vm2398_vm3, %v3873_v0  ;;  %2744 = vmatpush1.msra.mxu0 %v2696_v20  ;;  %3925 = vmatpush1.msra.mxu1 %v2696_v20  ;;  %v2449_v0 = vld [vmem:[%s6224_s4 + $0x70] sm:$0xff]  ;;  %v2564_v20 = vld [vmem:[%s6224_s4 + $0x408] sm:$0xff] }
 0x2f7   : > { %v2350_v44 = vpop.f32.mrf.mxu1  ;;  %2745 = vmatprep.subr.mxu0 %v4107_v36  ;;  %3894 = vmatprep.subr.mxu1 %v4107_v36 }
 0x2f8   : > { %2419 = vst.msk [vmem:[#allocation2 + $0xa0] sm:$0xff] %vm2398_vm3, %v2350_v44  ;;  %2746 = vmatpush1.msra.mxu0 %v2695_v24  ;;  %3926 = vmatpush1.msra.mxu1 %v2695_v24  ;;  %v2452_v44 = vld [vmem:[%s6224_s4 + $0x88] sm:$0xff]  ;;  %v2563_v24 = vld [vmem:[%s6224_s4 + $0x400] sm:$0xff] }
 0x2f9   : > { %v3874_v61 = vpop.f32.mrf.mxu1  ;;  %2747 = vmatprep.subr.mxu0 %v4107_v36  ;;  %3895 = vmatprep.subr.mxu1 %v4107_v36 }
 0x2fa   : > { %2422 = vst.msk [vmem:[#allocation2 + $0xb8] sm:$0xff] %vm2398_vm3, %v3874_v61  ;;  %2748 = vmatpush1.msra.mxu0 %v2694_v4  ;;  %3927 = vmatpush1.msra.mxu1 %v2694_v4  ;;  %v2451_v61 = vld [vmem:[%s6224_s4 + $0x80] sm:$0xff]  ;;  %v2566_v4 = vld [vmem:[%s6224_s4 + $0x418] sm:$0xff] }
 0x2fb   : > { %v2353_v40 = vpop.f32.mrf.mxu1  ;;  %2749 = vmatprep.subr.mxu0 %v4107_v36  ;;  %3896 = vmatprep.subr.mxu1 %v4107_v36 }
 0x2fc   : > { %2420 = vst.msk [vmem:[#allocation2 + $0xa8] sm:$0xff] %vm2398_vm3, %v2353_v40  ;;  %2750 = vmatpush1.msra.mxu0 %v2693_v41  ;;  %3928 = vmatpush1.msra.mxu1 %v2693_v41  ;;  %v2454_v40 = vld [vmem:[%s6224_s4 + $0x98] sm:$0xff]  ;;  %v2565_v41 = vld [vmem:[%s6224_s4 + $0x410] sm:$0xff] }
 0x2fd   : > { %2751 = vmatprep.subr.mxu0 %v4107_v36  ;;  %3897 = vmatprep.subr.mxu1 %v4107_v36  ;;  %v2713_v30 = vld [vmem:[#allocation2 + $0xb0] sm:$0xff] }
 0x2fe   : > { %2752 = vmatpush1.msra.mxu0 %v2692_v6  ;;  %3929 = vmatpush1.msra.mxu1 %v2692_v6  ;;  %v2453_v6 = vld [vmem:[%s6224_s4 + $0x90] sm:$0xff] }
 0x2ff   : > { %2753 = vmatprep.subr.mxu0 %v4107_v36  ;;  %3898 = vmatprep.subr.mxu1 %v4107_v36  ;;  %v2711_v51 = vld [vmem:[#allocation2 + $0xa0] sm:$0xff] }
 0x300   : > { %2754 = vmatpush1.msra.mxu0 %v2691_v58  ;;  %3930 = vmatpush1.msra.mxu1 %v2691_v58  ;;  %v2568_v58 = vld [vmem:[%s6224_s4 + $0x428] sm:$0xff] }
 0x301   : > { %2755 = vmatprep.subr.mxu0 %v4107_v36  ;;  %3899 = vmatprep.subr.mxu1 %v4107_v36  ;;  %v2714_v18 = vld [vmem:[#allocation2 + $0xb8] sm:$0xff] }
 0x303   : > { %v2712_v10 = vld [vmem:[#allocation2 + $0xa8] sm:$0xff] }
 0x305   : > { %v3877_v7 = vpop.f32.mrf.mxu1 }
 0x306   : > { %2425 = vst.msk [vmem:[#allocation2 + $0xd0] sm:$0xff] %vm2398_vm3, %v3877_v7  ;;  %v2567_v7 = vld [vmem:[%s6224_s4 + $0x420] sm:$0xff] }
 0x307   : > { %v2366_v26 = vpop.f32.mrf.mxu1 }
 0x308   : > { %2423 = vst.msk [vmem:[#allocation2 + $0xc0] sm:$0xff] %vm2398_vm3, %v2366_v26  ;;  %v2455_v26 = vld [vmem:[%s6224_s4 + $0xa0] sm:$0xff] }
 0x309   : > { %v3878_v53 = vpop.f32.mrf.mxu1 }
 0x30a   : > { %2426 = vst.msk [vmem:[#allocation2 + $0xd8] sm:$0xff] %vm2398_vm3, %v3878_v53  ;;  %v2570_v53 = vld [vmem:[%s6224_s4 + $0x438] sm:$0xff] }
 0x30b   : > { %v2369_v52 = vpop.f32.mrf.mxu1 }
 0x30c   : > { %2424 = vst.msk [vmem:[#allocation2 + $0xc8] sm:$0xff] %vm2398_vm3, %v2369_v52  ;;  %v2458_v52 = vld [vmem:[%s6224_s4 + $0xb8] sm:$0xff] }
 0x30d   : > { %v2717_v57 = vld [vmem:[#allocation2 + $0xd0] sm:$0xff] }
 0x30f   : > { %v2715_v50 = vld [vmem:[#allocation2 + $0xc0] sm:$0xff] }
 0x311   : > { %v2718_v59 = vld [vmem:[#allocation2 + $0xd8] sm:$0xff] }
 0x313   : > { %v2716_v43 = vld [vmem:[#allocation2 + $0xc8] sm:$0xff] }
 0x315   : > { %v3881_v31 = vpop.f32.mrf.mxu1 }
 0x316   : > { %2429 = vst.msk [vmem:[#allocation2 + $0xf0] sm:$0xff] %vm2398_vm3, %v3881_v31  ;;  %v2569_v31 = vld [vmem:[%s6224_s4 + $0x430] sm:$0xff] }
 0x317   : > { %v2382_v29 = vpop.f32.mrf.mxu1 }
 0x318   : > { %2427 = vst.msk [vmem:[#allocation2 + $0xe0] sm:$0xff] %vm2398_vm3, %v2382_v29  ;;  %v2457_v29 = vld [vmem:[%s6224_s4 + $0xb0] sm:$0xff] }
 0x319   : > { %v3882_v63 = vpop.f32.mrf.mxu1 }
 0x31a   : > { %2430 = vst.msk [vmem:[#allocation2 + $0xf8] sm:$0xff] %vm2398_vm3, %v3882_v63  ;;  %v2572_v63 = vld [vmem:[%s6224_s4 + $0x448] sm:$0xff] }
 0x31b   : > { %v2385_v54 = vpop.f32.mrf.mxu1 }
 0x31c   : > { %2428 = vst.msk [vmem:[#allocation2 + $0xe8] sm:$0xff] %vm2398_vm3, %v2385_v54  ;;  %v2460_v54 = vld [vmem:[%s6224_s4 + $0xc8] sm:$0xff] }
 0x31d   : > { %v2721_v22 = vld [vmem:[#allocation2 + $0xf0] sm:$0xff] }
 0x31f   : > { %v2719_v1 = vld [vmem:[#allocation2 + $0xe0] sm:$0xff] }
 0x321   : > { %v2722_v17 = vld [vmem:[#allocation2 + $0xf8] sm:$0xff] }
 0x322   : > { %2756 = vmatpush2.msra.mxu0 %v2722_v17  ;;  %3931 = vmatpush2.msra.mxu1 %v2722_v17  ;;  %v2571_v17 = vld [vmem:[%s6224_s4 + $0x440] sm:$0xff] }
 0x323   : > { %2757 = vmatprep.subr.mxu0 %v4107_v36  ;;  %3900 = vmatprep.subr.mxu1 %v4107_v36  ;;  %v2720_v13 = vld [vmem:[#allocation2 + $0xe8] sm:$0xff] }
 0x324   : > { %2758 = vmatpush2.msra.mxu0 %v2721_v22  ;;  %3932 = vmatpush2.msra.mxu1 %v2721_v22  ;;  %v2459_v22 = vld [vmem:[%s6224_s4 + $0xc0] sm:$0xff] }
 0x325   : > { %2759 = vmatprep.subr.mxu0 %v4107_v36  ;;  %3901 = vmatprep.subr.mxu1 %v4107_v36 }
 0x326   : > { %2760 = vmatpush2.msra.mxu0 %v2720_v13  ;;  %3933 = vmatpush2.msra.mxu1 %v2720_v13  ;;  %v2574_v13 = vld [vmem:[%s6224_s4 + $0x458] sm:$0xff] }
 0x327   : > { %2761 = vmatprep.subr.mxu0 %v4107_v36  ;;  %3902 = vmatprep.subr.mxu1 %v4107_v36 }
 0x328   : > { %2762 = vmatpush2.msra.mxu0 %v2719_v1  ;;  %3934 = vmatpush2.msra.mxu1 %v2719_v1  ;;  %v2462_v1 = vld [vmem:[%s6224_s4 + $0xd8] sm:$0xff] }
 0x329   : > { %2763 = vmatprep.subr.mxu0 %v4107_v36  ;;  %3903 = vmatprep.subr.mxu1 %v4107_v36 }
 0x32a   : > { %2764 = vmatpush2.msra.mxu0 %v2718_v59  ;;  %3935 = vmatpush2.msra.mxu1 %v2718_v59  ;;  %v2573_v59 = vld [vmem:[%s6224_s4 + $0x450] sm:$0xff] }
 0x32b   : > { %2765 = vmatprep.subr.mxu0 %v4107_v36  ;;  %3904 = vmatprep.subr.mxu1 %v4107_v36 }
 0x32c   : > { %2766 = vmatpush2.msra.mxu0 %v2717_v57  ;;  %3936 = vmatpush2.msra.mxu1 %v2717_v57  ;;  %v2461_v57 = vld [vmem:[%s6224_s4 + $0xd0] sm:$0xff] }
 0x32d   : > { %2767 = vmatprep.subr.mxu0 %v4107_v36  ;;  %3905 = vmatprep.subr.mxu1 %v4107_v36 }
 0x32e   : > { %2768 = vmatpush2.msra.mxu0 %v2716_v43  ;;  %3937 = vmatpush2.msra.mxu1 %v2716_v43  ;;  %v2576_v43 = vld [vmem:[%s6224_s4 + $0x468] sm:$0xff] }
 0x32f   : > { %2769 = vmatprep.subr.mxu0 %v4107_v36  ;;  %3906 = vmatprep.subr.mxu1 %v4107_v36 }
 0x330   : > { %2770 = vmatpush2.msra.mxu0 %v2715_v50  ;;  %3938 = vmatpush2.msra.mxu1 %v2715_v50  ;;  %v2464_v50 = vld [vmem:[%s6224_s4 + $0xe8] sm:$0xff] }
 0x331   : > { %2771 = vmatprep.subr.mxu0 %v4107_v36  ;;  %3907 = vmatprep.subr.mxu1 %v4107_v36 }
 0x332   : > { %2772 = vmatpush2.msra.mxu0 %v2714_v18  ;;  %3939 = vmatpush2.msra.mxu1 %v2714_v18  ;;  %v2575_v18 = vld [vmem:[%s6224_s4 + $0x460] sm:$0xff] }
 0x333   : > { %2773 = vmatprep.subr.mxu0 %v4107_v36  ;;  %3908 = vmatprep.subr.mxu1 %v4107_v36 }
 0x334   : > { %2774 = vmatpush2.msra.mxu0 %v2713_v30  ;;  %3940 = vmatpush2.msra.mxu1 %v2713_v30  ;;  %v2463_v30 = vld [vmem:[%s6224_s4 + $0xe0] sm:$0xff] }
 0x335   : > { %2775 = vmatprep.subr.mxu0 %v4107_v36  ;;  %3909 = vmatprep.subr.mxu1 %v4107_v36 }
 0x336   : > { %2776 = vmatpush2.msra.mxu0 %v2712_v10  ;;  %3941 = vmatpush2.msra.mxu1 %v2712_v10  ;;  %v2578_v10 = vld [vmem:[%s6224_s4 + $0x478] sm:$0xff] }
 0x337   : > { %2777 = vmatprep.subr.mxu0 %v4107_v36  ;;  %3910 = vmatprep.subr.mxu1 %v4107_v36 }
 0x338   : > { %2778 = vmatpush2.msra.mxu0 %v2711_v51  ;;  %3942 = vmatpush2.msra.mxu1 %v2711_v51  ;;  %v2466_v51 = vld [vmem:[%s6224_s4 + $0xf8] sm:$0xff] }
 0x339   : > { %2779 = vmatprep.subr.mxu0 %v4107_v36  ;;  %3911 = vmatprep.subr.mxu1 %v4107_v36 }
 0x33a   : > { %2780 = vmatpush2.msra.mxu0 %v2710_v32  ;;  %3943 = vmatpush2.msra.mxu1 %v2710_v32  ;;  %v2577_v32 = vld [vmem:[%s6224_s4 + $0x470] sm:$0xff] }
 0x33b   : > { %2781 = vmatprep.subr.mxu0 %v4107_v36  ;;  %3912 = vmatprep.subr.mxu1 %v4107_v36 }
 0x33c   : > { %2782 = vmatpush2.msra.mxu0 %v2709_v56  ;;  %3944 = vmatpush2.msra.mxu1 %v2709_v56  ;;  %v2465_v56 = vld [vmem:[%s6224_s4 + $0xf0] sm:$0xff] }
 0x33d   : > { %2783 = vmatprep.subr.mxu0 %v4107_v36  ;;  %3913 = vmatprep.subr.mxu1 %v4107_v36 }
 0x33e   : > { %2784 = vmatpush2.msra.mxu0 %v2708_v12  ;;  %3945 = vmatpush2.msra.mxu1 %v2708_v12  ;;  %v2580_v12 = vld [vmem:[%s6224_s4 + $0x488] sm:$0xff] }
 0x33f   : > { %2785 = vmatprep.subr.mxu0 %v4107_v36  ;;  %3914 = vmatprep.subr.mxu1 %v4107_v36  ;;  %v2437_v36 = vld [vmem:[%s6224_s4 + $0x10] sm:$0xff] }
 0x340   : > { %2786 = vmatpush2.msra.mxu0 %v2707_v33  ;;  %3946 = vmatpush2.msra.mxu1 %v2707_v33  ;;  %v2467_v33 = vld [vmem:[%s6224_s4 + $0x100] sm:$0xff] }
 0x341   : > { %3068 = vmatmul.mubr.f32.vlgmr.msra.gmra.mxu1 %v2547_v21  ;;  %2788 = vmatmul.mubr.f32.vlgmr.msra.gmra.mxu0 %v2435_v16  ;;  %v2468_v21 = vld [vmem:[%s6224_s4 + $0x108] sm:$0xff]  ;;  %v2579_v16 = vld [vmem:[%s6224_s4 + $0x480] sm:$0xff] }
 0x342   : > { %3072 = vmatprep.mubr.f32.mxu1 %v2550_v34  ;;  %2792 = vmatprep.mubr.f32.mxu0 %v2438_v38  ;;  %v2582_v34 = vld [vmem:[%s6224_s4 + $0x498] sm:$0xff] }
 0x343   : > { %v2470_v38 = vld [vmem:[%s6224_s4 + $0x118] sm:$0xff] }
 0x345   : > { %3073 = vmatmul.mubr.f32.gmra.mxu1 %v2549_v28  ;;  %2793 = vmatmul.mubr.f32.gmra.mxu0 %v2437_v36  ;;  %v2581_v28 = vld [vmem:[%s6224_s4 + $0x490] sm:$0xff] }
 0x346   : > { %3077 = vmatprep.mubr.f32.mxu1 %v2552_v42  ;;  %2797 = vmatprep.mubr.f32.mxu0 %v2440_v15  ;;  %v2469_v36 = vld [vmem:[%s6224_s4 + $0x110] sm:$0xff]  ;;  %v2584_v42 = vld [vmem:[%s6224_s4 + $0x4a8] sm:$0xff] }
 0x347   : > { %v2472_v15 = vld [vmem:[%s6224_s4 + $0x128] sm:$0xff] }
 0x349   : > { %3078 = vmatmul.mubr.f32.gmra.mxu1 %v2551_v8  ;;  %2798 = vmatmul.mubr.f32.gmra.mxu0 %v2439_v60  ;;  %v2583_v8 = vld [vmem:[%s6224_s4 + $0x4a0] sm:$0xff] }
 0x34a   : > { %3082 = vmatprep.mubr.f32.mxu1 %v2554_v35  ;;  %2802 = vmatprep.mubr.f32.mxu0 %v2442_v14  ;;  %v2471_v60 = vld [vmem:[%s6224_s4 + $0x120] sm:$0xff]  ;;  %v2586_v35 = vld [vmem:[%s6224_s4 + $0x4b8] sm:$0xff] }
 0x34b   : > { %v2474_v14 = vld [vmem:[%s6224_s4 + $0x138] sm:$0xff] }
 0x34d   : > { %3083 = vmatmul.mubr.f32.gmra.mxu1 %v2553_v19  ;;  %2803 = vmatmul.mubr.f32.gmra.mxu0 %v2441_v47  ;;  %v2585_v19 = vld [vmem:[%s6224_s4 + $0x4b0] sm:$0xff] }
 0x34e   : > { %3087 = vmatprep.mubr.f32.mxu1 %v2556_v45  ;;  %2807 = vmatprep.mubr.f32.mxu0 %v2444_v62  ;;  %v2473_v47 = vld [vmem:[%s6224_s4 + $0x130] sm:$0xff]  ;;  %v2588_v45 = vld [vmem:[%s6224_s4 + $0x4c8] sm:$0xff] }
 0x34f   : > { %v2476_v62 = vld [vmem:[%s6224_s4 + $0x148] sm:$0xff] }
 0x351   : > { %3088 = vmatmul.mubr.f32.gmra.mxu1 %v2555_v5  ;;  %2808 = vmatmul.mubr.f32.gmra.mxu0 %v2443_v55  ;;  %v2587_v5 = vld [vmem:[%s6224_s4 + $0x4c0] sm:$0xff] }
 0x352   : > { %3092 = vmatprep.mubr.f32.mxu1 %v2558_v27  ;;  %2812 = vmatprep.mubr.f32.mxu0 %v2446_v39  ;;  %v2475_v55 = vld [vmem:[%s6224_s4 + $0x140] sm:$0xff]  ;;  %v2590_v27 = vld [vmem:[%s6224_s4 + $0x4d8] sm:$0xff] }
 0x353   : > { %v2478_v39 = vld [vmem:[%s6224_s4 + $0x158] sm:$0xff] }
 0x355   : > { %3093 = vmatmul.mubr.f32.gmra.mxu1 %v2557_v23  ;;  %2813 = vmatmul.mubr.f32.gmra.mxu0 %v2445_v9  ;;  %v2589_v23 = vld [vmem:[%s6224_s4 + $0x4d0] sm:$0xff] }
 0x356   : > { %3097 = vmatprep.mubr.f32.mxu1 %v2560_v11  ;;  %2817 = vmatprep.mubr.f32.mxu0 %v2448_v25  ;;  %v2477_v9 = vld [vmem:[%s6224_s4 + $0x150] sm:$0xff]  ;;  %v2592_v11 = vld [vmem:[%s6224_s4 + $0x4e8] sm:$0xff] }
 0x357   : > { %v2480_v25 = vld [vmem:[%s6224_s4 + $0x168] sm:$0xff] }
 0x359   : > { %3098 = vmatmul.mubr.f32.gmra.mxu1 %v2559_v46  ;;  %2818 = vmatmul.mubr.f32.gmra.mxu0 %v2447_v37  ;;  %v2591_v46 = vld [vmem:[%s6224_s4 + $0x4e0] sm:$0xff] }
 0x35a   : > { %3102 = vmatprep.mubr.f32.mxu1 %v2562_v3  ;;  %2822 = vmatprep.mubr.f32.mxu0 %v2450_v49  ;;  %v2479_v37 = vld [vmem:[%s6224_s4 + $0x160] sm:$0xff]  ;;  %v2594_v3 = vld [vmem:[%s6224_s4 + $0x4f8] sm:$0xff] }
 0x35b   : > { %v2482_v49 = vld [vmem:[%s6224_s4 + $0x178] sm:$0xff] }
 0x35d   : > { %3103 = vmatmul.mubr.f32.gmra.mxu1 %v2561_v48  ;;  %2823 = vmatmul.mubr.f32.gmra.mxu0 %v2449_v0  ;;  %v2593_v48 = vld [vmem:[%s6224_s4 + $0x4f0] sm:$0xff] }
 0x35e   : > { %3107 = vmatprep.mubr.f32.mxu1 %v2564_v20  ;;  %2827 = vmatprep.mubr.f32.mxu0 %v2452_v44  ;;  %v2481_v0 = vld [vmem:[%s6224_s4 + $0x170] sm:$0xff]  ;;  %v2596_v20 = vld [vmem:[%s6224_s4 + $0x508] sm:$0xff] }
 0x35f   : > { %v2484_v44 = vld [vmem:[%s6224_s4 + $0x188] sm:$0xff] }
 0x361   : > { %3108 = vmatmul.mubr.f32.gmra.mxu1 %v2563_v24  ;;  %2828 = vmatmul.mubr.f32.gmra.mxu0 %v2451_v61  ;;  %v2595_v24 = vld [vmem:[%s6224_s4 + $0x500] sm:$0xff] }
 0x362   : > { %3112 = vmatprep.mubr.f32.mxu1 %v2566_v4  ;;  %2832 = vmatprep.mubr.f32.mxu0 %v2454_v40  ;;  %v2483_v61 = vld [vmem:[%s6224_s4 + $0x180] sm:$0xff]  ;;  %v2598_v4 = vld [vmem:[%s6224_s4 + $0x518] sm:$0xff] }
 0x363   : > { %v2486_v40 = vld [vmem:[%s6224_s4 + $0x198] sm:$0xff] }
 0x365   : > { %3113 = vmatmul.mubr.f32.gmra.mxu1 %v2565_v41  ;;  %2833 = vmatmul.mubr.f32.gmra.mxu0 %v2453_v6  ;;  %v2597_v41 = vld [vmem:[%s6224_s4 + $0x510] sm:$0xff] }
 0x366   : > { %3117 = vmatprep.mubr.f32.mxu1 %v2568_v58  ;;  %2837 = vmatprep.mubr.f32.mxu0 %v2456_v2  ;;  %v2485_v6 = vld [vmem:[%s6224_s4 + $0x190] sm:$0xff]  ;;  %v2600_v58 = vld [vmem:[%s6224_s4 + $0x528] sm:$0xff] }
 0x367   : > { %v2488_v2 = vld [vmem:[%s6224_s4 + $0x1a8] sm:$0xff] }
 0x369   : > { %3118 = vmatmul.mubr.f32.gmra.mxu1 %v2567_v7  ;;  %2838 = vmatmul.mubr.f32.gmra.mxu0 %v2455_v26  ;;  %v2599_v7 = vld [vmem:[%s6224_s4 + $0x520] sm:$0xff] }
 0x36a   : > { %3122 = vmatprep.mubr.f32.mxu1 %v2570_v53  ;;  %2842 = vmatprep.mubr.f32.mxu0 %v2458_v52  ;;  %v2487_v26 = vld [vmem:[%s6224_s4 + $0x1a0] sm:$0xff]  ;;  %v2602_v53 = vld [vmem:[%s6224_s4 + $0x538] sm:$0xff] }
 0x36b   : > { %v2490_v52 = vld [vmem:[%s6224_s4 + $0x1b8] sm:$0xff] }
 0x36d   : > { %3123 = vmatmul.mubr.f32.gmra.mxu1 %v2569_v31  ;;  %2843 = vmatmul.mubr.f32.gmra.mxu0 %v2457_v29  ;;  %v2601_v31 = vld [vmem:[%s6224_s4 + $0x530] sm:$0xff] }
 0x36e   : > { %3127 = vmatprep.mubr.f32.mxu1 %v2572_v63  ;;  %2847 = vmatprep.mubr.f32.mxu0 %v2460_v54  ;;  %v2489_v29 = vld [vmem:[%s6224_s4 + $0x1b0] sm:$0xff]  ;;  %v2604_v63 = vld [vmem:[%s6224_s4 + $0x548] sm:$0xff] }
 0x36f   : > { %v2492_v54 = vld [vmem:[%s6224_s4 + $0x1c8] sm:$0xff] }
 0x371   : > { %3128 = vmatmul.mubr.f32.gmra.mxu1 %v2571_v17  ;;  %2848 = vmatmul.mubr.f32.gmra.mxu0 %v2459_v22  ;;  %v2603_v17 = vld [vmem:[%s6224_s4 + $0x540] sm:$0xff] }
 0x372   : > { %3132 = vmatprep.mubr.f32.mxu1 %v2574_v13  ;;  %2852 = vmatprep.mubr.f32.mxu0 %v2462_v1  ;;  %v2491_v22 = vld [vmem:[%s6224_s4 + $0x1c0] sm:$0xff]  ;;  %v2606_v13 = vld [vmem:[%s6224_s4 + $0x558] sm:$0xff] }
 0x373   : > { %v2494_v1 = vld [vmem:[%s6224_s4 + $0x1d8] sm:$0xff] }
 0x375   : > { %3133 = vmatmul.mubr.f32.gmra.mxu1 %v2573_v59  ;;  %2853 = vmatmul.mubr.f32.gmra.mxu0 %v2461_v57  ;;  %v2605_v59 = vld [vmem:[%s6224_s4 + $0x550] sm:$0xff] }
 0x376   : > { %3137 = vmatprep.mubr.f32.mxu1 %v2576_v43  ;;  %2857 = vmatprep.mubr.f32.mxu0 %v2464_v50  ;;  %v2493_v57 = vld [vmem:[%s6224_s4 + $0x1d0] sm:$0xff]  ;;  %v2608_v43 = vld [vmem:[%s6224_s4 + $0x568] sm:$0xff] }
 0x377   : > { %v2496_v50 = vld [vmem:[%s6224_s4 + $0x1e8] sm:$0xff] }
 0x379   : > { %3138 = vmatmul.mubr.f32.gmra.mxu1 %v2575_v18  ;;  %2858 = vmatmul.mubr.f32.gmra.mxu0 %v2463_v30  ;;  %v2607_v18 = vld [vmem:[%s6224_s4 + $0x560] sm:$0xff] }
 0x37a   : > { %3142 = vmatprep.mubr.f32.mxu1 %v2578_v10  ;;  %2862 = vmatprep.mubr.f32.mxu0 %v2466_v51  ;;  %v2495_v30 = vld [vmem:[%s6224_s4 + $0x1e0] sm:$0xff]  ;;  %v2610_v10 = vld [vmem:[%s6224_s4 + $0x578] sm:$0xff] }
 0x37b   : > { %v2498_v51 = vld [vmem:[%s6224_s4 + $0x1f8] sm:$0xff] }
 0x37d   : > { %3143 = vmatmul.mubr.f32.gmra.mxu1 %v2577_v32  ;;  %2863 = vmatmul.mubr.f32.gmra.mxu0 %v2465_v56  ;;  %v2609_v32 = vld [vmem:[%s6224_s4 + $0x570] sm:$0xff] }
 0x37e   : > { %3147 = vmatprep.mubr.f32.mxu1 %v2580_v12  ;;  %2867 = vmatprep.mubr.f32.mxu0 %v2468_v21  ;;  %v2497_v56 = vld [vmem:[%s6224_s4 + $0x1f0] sm:$0xff]  ;;  %v2612_v12 = vld [vmem:[%s6224_s4 + $0x588] sm:$0xff] }
 0x37f   : > { %v2500_v21 = vld [vmem:[%s6224_s4 + $0x208] sm:$0xff] }
 0x381   : > { %3148 = vmatmul.mubr.f32.gmra.mxu1 %v2579_v16  ;;  %2868 = vmatmul.mubr.f32.gmra.mxu0 %v2467_v33  ;;  %v2611_v16 = vld [vmem:[%s6224_s4 + $0x580] sm:$0xff] }
 0x382   : > { %3152 = vmatprep.mubr.f32.mxu1 %v2582_v34  ;;  %2872 = vmatprep.mubr.f32.mxu0 %v2470_v38  ;;  %v2499_v33 = vld [vmem:[%s6224_s4 + $0x200] sm:$0xff]  ;;  %v2614_v34 = vld [vmem:[%s6224_s4 + $0x598] sm:$0xff] }
 0x383   : > { %v2502_v38 = vld [vmem:[%s6224_s4 + $0x218] sm:$0xff] }
 0x385   : > { %3153 = vmatmul.mubr.f32.gmra.mxu1 %v2581_v28  ;;  %2873 = vmatmul.mubr.f32.gmra.mxu0 %v2469_v36  ;;  %v2613_v28 = vld [vmem:[%s6224_s4 + $0x590] sm:$0xff] }
 0x386   : > { %3157 = vmatprep.mubr.f32.mxu1 %v2584_v42  ;;  %2877 = vmatprep.mubr.f32.mxu0 %v2472_v15  ;;  %v2501_v36 = vld [vmem:[%s6224_s4 + $0x210] sm:$0xff]  ;;  %v2616_v42 = vld [vmem:[%s6224_s4 + $0x5a8] sm:$0xff] }
 0x387   : > { %v2504_v15 = vld [vmem:[%s6224_s4 + $0x228] sm:$0xff] }
 0x389   : > { %3158 = vmatmul.mubr.f32.gmra.mxu1 %v2583_v8  ;;  %2878 = vmatmul.mubr.f32.gmra.mxu0 %v2471_v60  ;;  %v2615_v8 = vld [vmem:[%s6224_s4 + $0x5a0] sm:$0xff] }
 0x38a   : > { %3162 = vmatprep.mubr.f32.mxu1 %v2586_v35  ;;  %2882 = vmatprep.mubr.f32.mxu0 %v2474_v14  ;;  %v2503_v60 = vld [vmem:[%s6224_s4 + $0x220] sm:$0xff]  ;;  %v2618_v35 = vld [vmem:[%s6224_s4 + $0x5b8] sm:$0xff] }
 0x38b   : > { %v2506_v14 = vld [vmem:[%s6224_s4 + $0x238] sm:$0xff] }
 0x38d   : > { %3163 = vmatmul.mubr.f32.gmra.mxu1 %v2585_v19  ;;  %2883 = vmatmul.mubr.f32.gmra.mxu0 %v2473_v47  ;;  %v2617_v19 = vld [vmem:[%s6224_s4 + $0x5b0] sm:$0xff] }
 0x38e   : > { %3167 = vmatprep.mubr.f32.mxu1 %v2588_v45  ;;  %2887 = vmatprep.mubr.f32.mxu0 %v2476_v62  ;;  %v2505_v47 = vld [vmem:[%s6224_s4 + $0x230] sm:$0xff]  ;;  %v2620_v45 = vld [vmem:[%s6224_s4 + $0x5c8] sm:$0xff] }
 0x38f   : > { %v2508_v62 = vld [vmem:[%s6224_s4 + $0x248] sm:$0xff] }
 0x391   : > { %3168 = vmatmul.mubr.f32.gmra.mxu1 %v2587_v5  ;;  %2888 = vmatmul.mubr.f32.gmra.mxu0 %v2475_v55  ;;  %v2619_v5 = vld [vmem:[%s6224_s4 + $0x5c0] sm:$0xff] }
 0x392   : > { %3172 = vmatprep.mubr.f32.mxu1 %v2590_v27  ;;  %2892 = vmatprep.mubr.f32.mxu0 %v2478_v39  ;;  %v2507_v55 = vld [vmem:[%s6224_s4 + $0x240] sm:$0xff]  ;;  %v2622_v27 = vld [vmem:[%s6224_s4 + $0x5d8] sm:$0xff] }
 0x393   : > { %v2510_v39 = vld [vmem:[%s6224_s4 + $0x258] sm:$0xff] }
 0x395   : > { %3173 = vmatmul.mubr.f32.gmra.mxu1 %v2589_v23  ;;  %2893 = vmatmul.mubr.f32.gmra.mxu0 %v2477_v9  ;;  %v2621_v23 = vld [vmem:[%s6224_s4 + $0x5d0] sm:$0xff] }
 0x396   : > { %3177 = vmatprep.mubr.f32.mxu1 %v2592_v11  ;;  %2897 = vmatprep.mubr.f32.mxu0 %v2480_v25  ;;  %v2509_v9 = vld [vmem:[%s6224_s4 + $0x250] sm:$0xff]  ;;  %v2624_v11 = vld [vmem:[%s6224_s4 + $0x5e8] sm:$0xff] }
 0x397   : > { %v2512_v25 = vld [vmem:[%s6224_s4 + $0x268] sm:$0xff] }
 0x399   : > { %3178 = vmatmul.mubr.f32.gmra.mxu1 %v2591_v46  ;;  %2898 = vmatmul.mubr.f32.gmra.mxu0 %v2479_v37  ;;  %v2623_v46 = vld [vmem:[%s6224_s4 + $0x5e0] sm:$0xff] }
 0x39a   : > { %3182 = vmatprep.mubr.f32.mxu1 %v2594_v3  ;;  %2902 = vmatprep.mubr.f32.mxu0 %v2482_v49  ;;  %v2511_v37 = vld [vmem:[%s6224_s4 + $0x260] sm:$0xff]  ;;  %v2626_v3 = vld [vmem:[%s6224_s4 + $0x5f8] sm:$0xff] }
 0x39b   : > { %v2514_v49 = vld [vmem:[%s6224_s4 + $0x278] sm:$0xff] }
 0x39d   : > { %3183 = vmatmul.mubr.f32.gmra.mxu1 %v2593_v48  ;;  %2903 = vmatmul.mubr.f32.gmra.mxu0 %v2481_v0  ;;  %v2625_v48 = vld [vmem:[%s6224_s4 + $0x5f0] sm:$0xff] }
 0x39e   : > { %3187 = vmatprep.mubr.f32.mxu1 %v2596_v20  ;;  %2907 = vmatprep.mubr.f32.mxu0 %v2484_v44  ;;  %v2513_v0 = vld [vmem:[%s6224_s4 + $0x270] sm:$0xff]  ;;  %v2628_v20 = vld [vmem:[%s6224_s4 + $0x608] sm:$0xff] }
 0x39f   : > { %v2516_v44 = vld [vmem:[%s6224_s4 + $0x288] sm:$0xff] }
 0x3a1   : > { %3188 = vmatmul.mubr.f32.gmra.mxu1 %v2595_v24  ;;  %2908 = vmatmul.mubr.f32.gmra.mxu0 %v2483_v61  ;;  %v2627_v24 = vld [vmem:[%s6224_s4 + $0x600] sm:$0xff] }
 0x3a2   : > { %3192 = vmatprep.mubr.f32.mxu1 %v2598_v4  ;;  %2912 = vmatprep.mubr.f32.mxu0 %v2486_v40  ;;  %v2515_v61 = vld [vmem:[%s6224_s4 + $0x280] sm:$0xff]  ;;  %v2630_v4 = vld [vmem:[%s6224_s4 + $0x618] sm:$0xff] }
 0x3a3   : > { %v2518_v40 = vld [vmem:[%s6224_s4 + $0x298] sm:$0xff] }
 0x3a5   : > { %3193 = vmatmul.mubr.f32.gmra.mxu1 %v2597_v41  ;;  %2913 = vmatmul.mubr.f32.gmra.mxu0 %v2485_v6  ;;  %v2629_v41 = vld [vmem:[%s6224_s4 + $0x610] sm:$0xff] }
 0x3a6   : > { %3197 = vmatprep.mubr.f32.mxu1 %v2600_v58  ;;  %2917 = vmatprep.mubr.f32.mxu0 %v2488_v2  ;;  %v2517_v6 = vld [vmem:[%s6224_s4 + $0x290] sm:$0xff]  ;;  %v2632_v58 = vld [vmem:[%s6224_s4 + $0x628] sm:$0xff] }
 0x3a7   : > { %v2520_v2 = vld [vmem:[%s6224_s4 + $0x2a8] sm:$0xff] }
 0x3a9   : > { %3198 = vmatmul.mubr.f32.gmra.mxu1 %v2599_v7  ;;  %2918 = vmatmul.mubr.f32.gmra.mxu0 %v2487_v26  ;;  %v2631_v7 = vld [vmem:[%s6224_s4 + $0x620] sm:$0xff] }
 0x3aa   : > { %3202 = vmatprep.mubr.f32.mxu1 %v2602_v53  ;;  %2922 = vmatprep.mubr.f32.mxu0 %v2490_v52  ;;  %v2519_v26 = vld [vmem:[%s6224_s4 + $0x2a0] sm:$0xff]  ;;  %v2634_v53 = vld [vmem:[%s6224_s4 + $0x638] sm:$0xff] }
 0x3ab   : > { %v2522_v52 = vld [vmem:[%s6224_s4 + $0x2b8] sm:$0xff] }
 0x3ad   : > { %3203 = vmatmul.mubr.f32.gmra.mxu1 %v2601_v31  ;;  %2923 = vmatmul.mubr.f32.gmra.mxu0 %v2489_v29  ;;  %v2633_v31 = vld [vmem:[%s6224_s4 + $0x630] sm:$0xff] }
 0x3ae   : > { %3207 = vmatprep.mubr.f32.mxu1 %v2604_v63  ;;  %2927 = vmatprep.mubr.f32.mxu0 %v2492_v54  ;;  %v2521_v29 = vld [vmem:[%s6224_s4 + $0x2b0] sm:$0xff]  ;;  %v2636_v63 = vld [vmem:[%s6224_s4 + $0x648] sm:$0xff] }
 0x3af   : > { %v2524_v54 = vld [vmem:[%s6224_s4 + $0x2c8] sm:$0xff] }
 0x3b1   : > { %3208 = vmatmul.mubr.f32.gmra.mxu1 %v2603_v17  ;;  %2928 = vmatmul.mubr.f32.gmra.mxu0 %v2491_v22  ;;  %v2635_v17 = vld [vmem:[%s6224_s4 + $0x640] sm:$0xff] }
 0x3b2   : > { %3212 = vmatprep.mubr.f32.mxu1 %v2606_v13  ;;  %2932 = vmatprep.mubr.f32.mxu0 %v2494_v1  ;;  %v2523_v22 = vld [vmem:[%s6224_s4 + $0x2c0] sm:$0xff]  ;;  %v2638_v13 = vld [vmem:[%s6224_s4 + $0x658] sm:$0xff] }
 0x3b3   : > { %v2526_v1 = vld [vmem:[%s6224_s4 + $0x2d8] sm:$0xff] }
 0x3b5   : > { %3213 = vmatmul.mubr.f32.gmra.mxu1 %v2605_v59  ;;  %2933 = vmatmul.mubr.f32.gmra.mxu0 %v2493_v57  ;;  %v2637_v59 = vld [vmem:[%s6224_s4 + $0x650] sm:$0xff] }
 0x3b6   : > { %3217 = vmatprep.mubr.f32.mxu1 %v2608_v43  ;;  %2937 = vmatprep.mubr.f32.mxu0 %v2496_v50  ;;  %v2525_v57 = vld [vmem:[%s6224_s4 + $0x2d0] sm:$0xff]  ;;  %v2640_v43 = vld [vmem:[%s6224_s4 + $0x668] sm:$0xff] }
 0x3b7   : > { %v2528_v50 = vld [vmem:[%s6224_s4 + $0x2e8] sm:$0xff] }
 0x3b9   : > { %3218 = vmatmul.mubr.f32.gmra.mxu1 %v2607_v18  ;;  %2938 = vmatmul.mubr.f32.gmra.mxu0 %v2495_v30  ;;  %v2639_v18 = vld [vmem:[%s6224_s4 + $0x660] sm:$0xff] }
 0x3ba   : > { %3222 = vmatprep.mubr.f32.mxu1 %v2610_v10  ;;  %2942 = vmatprep.mubr.f32.mxu0 %v2498_v51  ;;  %v2527_v30 = vld [vmem:[%s6224_s4 + $0x2e0] sm:$0xff]  ;;  %v2642_v10 = vld [vmem:[%s6224_s4 + $0x678] sm:$0xff] }
 0x3bb   : > { %v2530_v51 = vld [vmem:[%s6224_s4 + $0x2f8] sm:$0xff] }
 0x3bd   : > { %3223 = vmatmul.mubr.f32.gmra.mxu1 %v2609_v32  ;;  %2943 = vmatmul.mubr.f32.gmra.mxu0 %v2497_v56  ;;  %v2641_v32 = vld [vmem:[%s6224_s4 + $0x670] sm:$0xff] }
 0x3be   : > { %3227 = vmatprep.mubr.f32.mxu1 %v2612_v12  ;;  %2947 = vmatprep.mubr.f32.mxu0 %v2500_v21  ;;  %v2529_v56 = vld [vmem:[%s6224_s4 + $0x2f0] sm:$0xff]  ;;  %v2644_v12 = vld [vmem:[%s6224_s4 + $0x688] sm:$0xff] }
 0x3bf   : > { %v2532_v21 = vld [vmem:[%s6224_s4 + $0x308] sm:$0xff] }
 0x3c1   : > { %3228 = vmatmul.mubr.f32.gmra.mxu1 %v2611_v16  ;;  %2948 = vmatmul.mubr.f32.gmra.mxu0 %v2499_v33  ;;  %v2643_v16 = vld [vmem:[%s6224_s4 + $0x680] sm:$0xff] }
 0x3c2   : > { %3232 = vmatprep.mubr.f32.mxu1 %v2614_v34  ;;  %2952 = vmatprep.mubr.f32.mxu0 %v2502_v38  ;;  %v2531_v33 = vld [vmem:[%s6224_s4 + $0x300] sm:$0xff]  ;;  %v2646_v34 = vld [vmem:[%s6224_s4 + $0x698] sm:$0xff] }
 0x3c3   : > { %v2534_v38 = vld [vmem:[%s6224_s4 + $0x318] sm:$0xff] }
 0x3c5   : > { %3233 = vmatmul.mubr.f32.gmra.mxu1 %v2613_v28  ;;  %2953 = vmatmul.mubr.f32.gmra.mxu0 %v2501_v36 }
 0x3c6   : > { %3237 = vmatprep.mubr.f32.mxu1 %v2616_v42  ;;  %2957 = vmatprep.mubr.f32.mxu0 %v2504_v15  ;;  %v2645_v42 = vld [vmem:[%s6224_s4 + $0x690] sm:$0xff] }
 0x3c7   : > { %v2533_v15 = vld [vmem:[%s6224_s4 + $0x310] sm:$0xff] }
 0x3c9   : > { %3238 = vmatmul.mubr.f32.gmra.mxu1 %v2615_v8  ;;  %2958 = vmatmul.mubr.f32.gmra.mxu0 %v2503_v60  ;;  %v2648_v60 = vld [vmem:[%s6224_s4 + $0x6a8] sm:$0xff] }
 0x3ca   : > { %3242 = vmatprep.mubr.f32.mxu1 %v2618_v35  ;;  %2962 = vmatprep.mubr.f32.mxu0 %v2506_v14  ;;  %v2536_v14 = vld [vmem:[%s6224_s4 + $0x328] sm:$0xff] }
 0x3cd   : > { %3243 = vmatmul.mubr.f32.gmra.mxu1 %v2617_v19  ;;  %2963 = vmatmul.mubr.f32.gmra.mxu0 %v2505_v47 }
 0x3ce   : > { %3247 = vmatprep.mubr.f32.mxu1 %v2620_v45  ;;  %2967 = vmatprep.mubr.f32.mxu0 %v2508_v62  ;;  %v2647_v45 = vld [vmem:[%s6224_s4 + $0x6a0] sm:$0xff] }
 0x3cf   : > { %v2535_v62 = vld [vmem:[%s6224_s4 + $0x320] sm:$0xff] }
 0x3d1   : > { %3248 = vmatmul.mubr.f32.gmra.mxu1 %v2619_v5  ;;  %2968 = vmatmul.mubr.f32.gmra.mxu0 %v2507_v55  ;;  %v2650_v55 = vld [vmem:[%s6224_s4 + $0x6b8] sm:$0xff] }
 0x3d2   : > { %3252 = vmatprep.mubr.f32.mxu1 %v2622_v27  ;;  %2972 = vmatprep.mubr.f32.mxu0 %v2510_v39  ;;  %v2538_v39 = vld [vmem:[%s6224_s4 + $0x338] sm:$0xff] }
 0x3d5   : > { %3253 = vmatmul.mubr.f32.gmra.mxu1 %v2621_v23  ;;  %2973 = vmatmul.mubr.f32.gmra.mxu0 %v2509_v9 }
 0x3d6   : > { %3257 = vmatprep.mubr.f32.mxu1 %v2624_v11  ;;  %2977 = vmatprep.mubr.f32.mxu0 %v2512_v25  ;;  %v2649_v11 = vld [vmem:[%s6224_s4 + $0x6b0] sm:$0xff] }
 0x3d7   : > { %v2537_v25 = vld [vmem:[%s6224_s4 + $0x330] sm:$0xff] }
 0x3d9   : > { %3258 = vmatmul.mubr.f32.gmra.mxu1 %v2623_v46  ;;  %2978 = vmatmul.mubr.f32.gmra.mxu0 %v2511_v37  ;;  %v2652_v37 = vld [vmem:[%s6224_s4 + $0x6c8] sm:$0xff] }
 0x3da   : > { %3262 = vmatprep.mubr.f32.mxu1 %v2626_v3  ;;  %2982 = vmatprep.mubr.f32.mxu0 %v2514_v49  ;;  %v2540_v49 = vld [vmem:[%s6224_s4 + $0x348] sm:$0xff] }
 0x3dd   : > { %3263 = vmatmul.mubr.f32.gmra.mxu1 %v2625_v48  ;;  %2983 = vmatmul.mubr.f32.gmra.mxu0 %v2513_v0 }
 0x3de   : > { %3267 = vmatprep.mubr.f32.mxu1 %v2628_v20  ;;  %2987 = vmatprep.mubr.f32.mxu0 %v2516_v44  ;;  %v2651_v20 = vld [vmem:[%s6224_s4 + $0x6c0] sm:$0xff] }
 0x3df   : > { %v2539_v44 = vld [vmem:[%s6224_s4 + $0x340] sm:$0xff] }
 0x3e1   : > { %3268 = vmatmul.mubr.f32.gmra.mxu1 %v2627_v24  ;;  %2988 = vmatmul.mubr.f32.gmra.mxu0 %v2515_v61  ;;  %v2654_v61 = vld [vmem:[%s6224_s4 + $0x6d8] sm:$0xff] }
 0x3e2   : > { %3272 = vmatprep.mubr.f32.mxu1 %v2630_v4  ;;  %2992 = vmatprep.mubr.f32.mxu0 %v2518_v40  ;;  %v2542_v40 = vld [vmem:[%s6224_s4 + $0x358] sm:$0xff] }
 0x3e5   : > { %3273 = vmatmul.mubr.f32.gmra.mxu1 %v2629_v41  ;;  %2993 = vmatmul.mubr.f32.gmra.mxu0 %v2517_v6 }
 0x3e6   : > { %3277 = vmatprep.mubr.f32.mxu1 %v2632_v58  ;;  %2997 = vmatprep.mubr.f32.mxu0 %v2520_v2  ;;  %v2653_v58 = vld [vmem:[%s6224_s4 + $0x6d0] sm:$0xff] }
 0x3e7   : > { %v2541_v2 = vld [vmem:[%s6224_s4 + $0x350] sm:$0xff] }
 0x3e9   : > { %3278 = vmatmul.mubr.f32.gmra.mxu1 %v2631_v7  ;;  %2998 = vmatmul.mubr.f32.gmra.mxu0 %v2519_v26  ;;  %v2656_v26 = vld [vmem:[%s6224_s4 + $0x6e8] sm:$0xff] }
 0x3ea   : > { %3282 = vmatprep.mubr.f32.mxu1 %v2634_v53  ;;  %3002 = vmatprep.mubr.f32.mxu0 %v2522_v52  ;;  %v2544_v52 = vld [vmem:[%s6224_s4 + $0x368] sm:$0xff] }
 0x3ed   : > { %3283 = vmatmul.mubr.f32.gmra.mxu1 %v2633_v31  ;;  %3003 = vmatmul.mubr.f32.gmra.mxu0 %v2521_v29 }
 0x3ee   : > { %3287 = vmatprep.mubr.f32.mxu1 %v2636_v63  ;;  %3007 = vmatprep.mubr.f32.mxu0 %v2524_v54  ;;  %v2655_v63 = vld [vmem:[%s6224_s4 + $0x6e0] sm:$0xff] }
 0x3ef   : > { %v2543_v54 = vld [vmem:[%s6224_s4 + $0x360] sm:$0xff] }
 0x3f1   : > { %3288 = vmatmul.mubr.f32.gmra.mxu1 %v2635_v17  ;;  %3008 = vmatmul.mubr.f32.gmra.mxu0 %v2523_v22  ;;  %v2658_v22 = vld [vmem:[%s6224_s4 + $0x6f8] sm:$0xff] }
 0x3f2   : > { %3292 = vmatprep.mubr.f32.mxu1 %v2638_v13  ;;  %3012 = vmatprep.mubr.f32.mxu0 %v2526_v1  ;;  %v2546_v1 = vld [vmem:[%s6224_s4 + $0x378] sm:$0xff] }
 0x3f5   : > { %3293 = vmatmul.mubr.f32.gmra.mxu1 %v2637_v59  ;;  %3013 = vmatmul.mubr.f32.gmra.mxu0 %v2525_v57 }
 0x3f6   : > { %3297 = vmatprep.mubr.f32.mxu1 %v2640_v43  ;;  %3017 = vmatprep.mubr.f32.mxu0 %v2528_v50  ;;  %v2657_v43 = vld [vmem:[%s6224_s4 + $0x6f0] sm:$0xff] }
 0x3f7   : > { %v2545_v50 = vld [vmem:[%s6224_s4 + $0x370] sm:$0xff] }
 0x3f9   : > { %3298 = vmatmul.mubr.f32.gmra.mxu1 %v2639_v18  ;;  %3018 = vmatmul.mubr.f32.gmra.mxu0 %v2527_v30  ;;  %v2660_v30 = vld [vmem:[%s6224_s4 + $0x708] sm:$0xff] }
 0x3fa   : > { %3302 = vmatprep.mubr.f32.mxu1 %v2642_v10  ;;  %3022 = vmatprep.mubr.f32.mxu0 %v2530_v51 }
 0x3fd   : > { %3303 = vmatmul.mubr.f32.gmra.mxu1 %v2641_v32  ;;  %3023 = vmatmul.mubr.f32.gmra.mxu0 %v2529_v56  ;;  %v2659_v56 = vld [vmem:[%s6224_s4 + $0x700] sm:$0xff] }
 0x3fe   : > { %3307 = vmatprep.mubr.f32.mxu1 %v2644_v12  ;;  %3027 = vmatprep.mubr.f32.mxu0 %v2532_v21  ;;  %v2662_v21 = vld [vmem:[%s6224_s4 + $0x718] sm:$0xff] }
 0x401   : > { %v3069_v28 = vpop.f32.mrf.mxu1  ;;  %3308 = vmatmul.mubr.f32.gmra.mxu1 %v2643_v16  ;;  %v2789_v36 = vpop.f32.mrf.mxu0  ;;  %3028 = vmatmul.mubr.f32.gmra.mxu0 %v2531_v33 }
 0x402   : > { %3484 = vst.msk [vmem:[%s5773_s25 + $0x1c0] sm:$0xff] %vm2398_vm3, %v3069_v28  ;;  %3312 = vmatprep.mubr.f32.mxu1 %v2646_v34  ;;  %3428 = vst.msk [vmem:[%s5773_s25] sm:$0xff] %vm2398_vm3, %v2789_v36  ;;  %3032 = vmatprep.mubr.f32.mxu0 %v2534_v38  ;;  %v2661_v38 = vld [vmem:[%s6224_s4 + $0x710] sm:$0xff]  ;;  %v2664_v36 = vld [vmem:[%s6224_s4 + $0x728] sm:$0xff] }
 0x403   : > { %v3071_v8 = vpop.f32.mrf.mxu1  ;;  %v2791_v35 = vpop.f32.mrf.mxu0 }
 0x405   : > { %v3074_v19 = vpop.f32.mrf.mxu1  ;;  %3313 = vmatmul.mubr.f32.gmra.mxu1 %v2645_v42  ;;  %v2794_v47 = vpop.f32.mrf.mxu0  ;;  %3033 = vmatmul.mubr.f32.gmra.mxu0 %v2533_v15 }
 0x406   : > { %3485 = vst.msk [vmem:[%s5773_s25 + $0x1c8] sm:$0xff] %vm2398_vm3, %v3074_v19  ;;  %3317 = vmatprep.mubr.f32.mxu1 %v2648_v60  ;;  %3429 = vst.msk [vmem:[%s5773_s25 + $0x8] sm:$0xff] %vm2398_vm3, %v2794_v47  ;;  %3037 = vmatprep.mubr.f32.mxu0 %v2536_v14  ;;  %v2663_v60 = vld [vmem:[%s6224_s4 + $0x720] sm:$0xff]  ;;  %v2666_v14 = vld [vmem:[%s6224_s4 + $0x738] sm:$0xff] }
 0x407   : > { %v3076_v5 = vpop.f32.mrf.mxu1  ;;  %v2796_v27 = vpop.f32.mrf.mxu0 }
 0x409   : > { %v3079_v23 = vpop.f32.mrf.mxu1  ;;  %3318 = vmatmul.mubr.f32.gmra.mxu1 %v2647_v45  ;;  %v2799_v9 = vpop.f32.mrf.mxu0  ;;  %3038 = vmatmul.mubr.f32.gmra.mxu0 %v2535_v62  ;;  %v2665_v62 = vld [vmem:[%s6224_s4 + $0x730] sm:$0xff] }
 0x40a   : > { %3486 = vst.msk [vmem:[%s5773_s25 + $0x1d0] sm:$0xff] %vm2398_vm3, %v3079_v23  ;;  %3322 = vmatprep.mubr.f32.mxu1 %v2650_v55  ;;  %3430 = vst.msk [vmem:[%s5773_s25 + $0x10] sm:$0xff] %vm2398_vm3, %v2799_v9  ;;  %3042 = vmatprep.mubr.f32.mxu0 %v2538_v39  ;;  %v2668_v55 = vld [vmem:[%s6224_s4 + $0x748] sm:$0xff]  ;;  %v2667_v9 = vld [vmem:[%s6224_s4 + $0x740] sm:$0xff] }
 0x40b   : > { %v3081_v46 = vpop.f32.mrf.mxu1  ;;  %v2801_v3 = vpop.f32.mrf.mxu0 }
 0x40d   : > { %v3084_v48 = vpop.f32.mrf.mxu1  ;;  %3323 = vmatmul.mubr.f32.gmra.mxu1 %v2649_v11  ;;  %v2804_v0 = vpop.f32.mrf.mxu0  ;;  %3043 = vmatmul.mubr.f32.gmra.mxu0 %v2537_v25  ;;  %v2670_v25 = vld [vmem:[%s6224_s4 + $0x758] sm:$0xff] }
 0x40e   : > { %3487 = vst.msk [vmem:[%s5773_s25 + $0x1d8] sm:$0xff] %vm2398_vm3, %v3084_v48  ;;  %3327 = vmatprep.mubr.f32.mxu1 %v2652_v37  ;;  %3431 = vst.msk [vmem:[%s5773_s25 + $0x18] sm:$0xff] %vm2398_vm3, %v2804_v0  ;;  %3047 = vmatprep.mubr.f32.mxu0 %v2540_v49  ;;  %v2669_v49 = vld [vmem:[%s6224_s4 + $0x750] sm:$0xff]  ;;  %v2672_v0 = vld [vmem:[%s6224_s4 + $0x768] sm:$0xff] }
 0x40f   : > { %v3086_v24 = vpop.f32.mrf.mxu1  ;;  %v2806_v4 = vpop.f32.mrf.mxu0 }
 0x411   : > { %v3089_v41 = vpop.f32.mrf.mxu1  ;;  %3328 = vmatmul.mubr.f32.gmra.mxu1 %v2651_v20  ;;  %v2809_v6 = vpop.f32.mrf.mxu0  ;;  %3048 = vmatmul.mubr.f32.gmra.mxu0 %v2539_v44 }
 0x412   : > { %3488 = vst.msk [vmem:[%s5773_s25 + $0x1e0] sm:$0xff] %vm2398_vm3, %v3089_v41  ;;  %3332 = vmatprep.mubr.f32.mxu1 %v2654_v61  ;;  %3432 = vst.msk [vmem:[%s5773_s25 + $0x20] sm:$0xff] %vm2398_vm3, %v2809_v6  ;;  %3052 = vmatprep.mubr.f32.mxu0 %v2542_v40  ;;  %v2671_v61 = vld [vmem:[%s6224_s4 + $0x760] sm:$0xff]  ;;  %v2674_v40 = vld [vmem:[%s6224_s4 + $0x778] sm:$0xff] }
 0x413   : > { %v3091_v7 = vpop.f32.mrf.mxu1  ;;  %v2811_v53 = vpop.f32.mrf.mxu0 }
 0x415   : > { %v3094_v31 = vpop.f32.mrf.mxu1  ;;  %3333 = vmatmul.mubr.f32.gmra.mxu1 %v2653_v58  ;;  %v2814_v29 = vpop.f32.mrf.mxu0  ;;  %3053 = vmatmul.mubr.f32.gmra.mxu0 %v2541_v2  ;;  %v2673_v2 = vld [vmem:[%s6224_s4 + $0x770] sm:$0xff] }
 0x416   : > { %3489 = vst.msk [vmem:[%s5773_s25 + $0x1e8] sm:$0xff] %vm2398_vm3, %v3094_v31  ;;  %3337 = vmatprep.mubr.f32.mxu1 %v2656_v26  ;;  %3433 = vst.msk [vmem:[%s5773_s25 + $0x28] sm:$0xff] %vm2398_vm3, %v2814_v29  ;;  %3057 = vmatprep.mubr.f32.mxu0 %v2544_v52  ;;  %v2676_v26 = vld [vmem:[%s6224_s4 + $0x788] sm:$0xff]  ;;  %v2675_v29 = vld [vmem:[%s6224_s4 + $0x780] sm:$0xff] }
 0x417   : > { %v3096_v17 = vpop.f32.mrf.mxu1  ;;  %v2816_v13 = vpop.f32.mrf.mxu0 }
 0x419   : > { %v3099_v59 = vpop.f32.mrf.mxu1  ;;  %3338 = vmatmul.mubr.f32.gmra.mxu1 %v2655_v63  ;;  %v2819_v57 = vpop.f32.mrf.mxu0  ;;  %3058 = vmatmul.mubr.f32.gmra.mxu0 %v2543_v54  ;;  %v2678_v54 = vld [vmem:[%s6224_s4 + $0x798] sm:$0xff] }
 0x41a   : > { %3490 = vst.msk [vmem:[%s5773_s25 + $0x1f0] sm:$0xff] %vm2398_vm3, %v3099_v59  ;;  %3342 = vmatprep.mubr.f32.mxu1 %v2658_v22  ;;  %3434 = vst.msk [vmem:[%s5773_s25 + $0x30] sm:$0xff] %vm2398_vm3, %v2819_v57  ;;  %3062 = vmatprep.mubr.f32.mxu0 %v2546_v1  ;;  %v2677_v1 = vld [vmem:[%s6224_s4 + $0x790] sm:$0xff]  ;;  %v2680_v57 = vld [vmem:[%s6224_s4 + $0x7a8] sm:$0xff] }
 0x41b   : > { %v3101_v18 = vpop.f32.mrf.mxu1  ;;  %v2821_v10 = vpop.f32.mrf.mxu0 }
 0x41d   : > { %v3104_v51 = vpop.f32.mrf.mxu1  ;;  %3343 = vmatmul.mubr.f32.gmra.mxu1 %v2657_v43  ;;  %v2824_v32 = vpop.f32.mrf.mxu0  ;;  %3063 = vmatmul.mubr.f32.gmra.mxu0 %v2545_v50 }
 0x41e   : > { %3491 = vst.msk [vmem:[%s5773_s25 + $0x1f8] sm:$0xff] %vm2398_vm3, %v3104_v51  ;;  %3347 = vmatprep.mubr.f32.mxu1 %v2660_v30  ;;  %3435 = vst.msk [vmem:[%s5773_s25 + $0x38] sm:$0xff] %vm2398_vm3, %v2824_v32  ;;  %v2679_v30 = vld [vmem:[%s6224_s4 + $0x7a0] sm:$0xff]  ;;  %v2682_v51 = vld [vmem:[%s6224_s4 + $0x7b8] sm:$0xff] }
 0x41f   : > { %v3106_v12 = vpop.f32.mrf.mxu1  ;;  %v2826_v16 = vpop.f32.mrf.mxu0 }
 0x421   : > { %v3109_v33 = vpop.f32.mrf.mxu1  ;;  %3348 = vmatmul.mubr.f32.gmra.mxu1 %v2659_v56  ;;  %v2829_v34 = vpop.f32.mrf.mxu0 }
 0x422   : > { %3492 = vst.msk [vmem:[%s5773_s25 + $0x200] sm:$0xff] %vm2398_vm3, %v3109_v33  ;;  %3352 = vmatprep.mubr.f32.mxu1 %v2662_v21  ;;  %3436 = vst.msk [vmem:[%s5773_s25 + $0x40] sm:$0xff] %vm2398_vm3, %v2829_v34  ;;  %v2681_v21 = vld [vmem:[%s6224_s4 + $0x7b0] sm:$0xff]  ;;  %v2684_v33 = vld [vmem:[%s6224_s4 + $0x7c8] sm:$0xff] }
 0x423   : > { %v3111_v28 = vpop.f32.mrf.mxu1  ;;  %v2831_v42 = vpop.f32.mrf.mxu0 }
 0x425   : > { %v3114_v15 = vpop.f32.mrf.mxu1  ;;  %3353 = vmatmul.mubr.f32.gmra.mxu1 %v2661_v38  ;;  %v2834_v8 = vpop.f32.mrf.mxu0 }
 0x426   : > { %3493 = vst.msk [vmem:[%s5773_s25 + $0x208] sm:$0xff] %vm2398_vm3, %v3114_v15  ;;  %3357 = vmatprep.mubr.f32.mxu1 %v2664_v36  ;;  %3437 = vst.msk [vmem:[%s5773_s25 + $0x48] sm:$0xff] %vm2398_vm3, %v2834_v8  ;;  %v2683_v36 = vld [vmem:[%s6224_s4 + $0x7c0] sm:$0xff]  ;;  %v2686_v15 = vld [vmem:[%s6224_s4 + $0x7d8] sm:$0xff] }
 0x427   : > { %v3116_v35 = vpop.f32.mrf.mxu1  ;;  %v2836_v19 = vpop.f32.mrf.mxu0 }
 0x429   : > { %v3119_v47 = vpop.f32.mrf.mxu1  ;;  %3358 = vmatmul.mubr.f32.gmra.mxu1 %v2663_v60  ;;  %v2839_v45 = vpop.f32.mrf.mxu0 }
 0x42a   : > { %3494 = vst.msk [vmem:[%s5773_s25 + $0x210] sm:$0xff] %vm2398_vm3, %v3119_v47  ;;  %3362 = vmatprep.mubr.f32.mxu1 %v2666_v14  ;;  %3438 = vst.msk [vmem:[%s5773_s25 + $0x50] sm:$0xff] %vm2398_vm3, %v2839_v45  ;;  %v2685_v14 = vld [vmem:[%s6224_s4 + $0x7d0] sm:$0xff]  ;;  %v2688_v47 = vld [vmem:[%s6224_s4 + $0x7e8] sm:$0xff] }
 0x42b   : > { %v3121_v5 = vpop.f32.mrf.mxu1  ;;  %v2841_v27 = vpop.f32.mrf.mxu0 }
 0x42d   : > { %v3124_v39 = vpop.f32.mrf.mxu1  ;;  %3363 = vmatmul.mubr.f32.gmra.mxu1 %v2665_v62  ;;  %v2844_v23 = vpop.f32.mrf.mxu0 }
 0x42e   : > { %3495 = vst.msk [vmem:[%s5773_s25 + $0x218] sm:$0xff] %vm2398_vm3, %v3124_v39  ;;  %3367 = vmatprep.mubr.f32.mxu1 %v2668_v55  ;;  %3439 = vst.msk [vmem:[%s5773_s25 + $0x58] sm:$0xff] %vm2398_vm3, %v2844_v23  ;;  %v2687_v55 = vld [vmem:[%s6224_s4 + $0x7e0] sm:$0xff]  ;;  %v2690_v39 = vld [vmem:[%s6224_s4 + $0x7f8] sm:$0xff] }
 0x42f   : > { %v3126_v11 = vpop.f32.mrf.mxu1  ;;  %v2846_v46 = vpop.f32.mrf.mxu0 }
 0x431   : > { %v3129_v37 = vpop.f32.mrf.mxu1  ;;  %3368 = vmatmul.mubr.f32.gmra.mxu1 %v2667_v9  ;;  %v2849_v3 = vpop.f32.mrf.mxu0 }
 0x432   : > { %3496 = vst.msk [vmem:[%s5773_s25 + $0x220] sm:$0xff] %vm2398_vm3, %v3129_v37  ;;  %3372 = vmatprep.mubr.f32.mxu1 %v2670_v25  ;;  %3440 = vst.msk [vmem:[%s5773_s25 + $0x60] sm:$0xff] %vm2398_vm3, %v2849_v3  ;;  %v2689_v25 = vld [vmem:[%s6224_s4 + $0x7f0] sm:$0xff] }
 0x433   : > { %v3131_v48 = vpop.f32.mrf.mxu1  ;;  %v2851_v20 = vpop.f32.mrf.mxu0 }
 0x435   : > { %v3134_v44 = vpop.f32.mrf.mxu1  ;;  %3373 = vmatmul.mubr.f32.gmra.mxu1 %v2669_v49  ;;  %v2854_v24 = vpop.f32.mrf.mxu0 }
 0x436   : > { %3497 = vst.msk [vmem:[%s5773_s25 + $0x228] sm:$0xff] %vm2398_vm3, %v3134_v44  ;;  %3377 = vmatprep.mubr.f32.mxu1 %v2672_v0  ;;  %3441 = vst.msk [vmem:[%s5773_s25 + $0x68] sm:$0xff] %vm2398_vm3, %v2854_v24 }
 0x437   : > { %v3136_v4 = vpop.f32.mrf.mxu1  ;;  %v2856_v41 = vpop.f32.mrf.mxu0 }
 0x439   : > { %v3139_v6 = vpop.f32.mrf.mxu1  ;;  %3378 = vmatmul.mubr.f32.gmra.mxu1 %v2671_v61  ;;  %v2859_v58 = vpop.f32.mrf.mxu0 }
 0x43a   : > { %3498 = vst.msk [vmem:[%s5773_s25 + $0x230] sm:$0xff] %vm2398_vm3, %v3139_v6  ;;  %3382 = vmatprep.mubr.f32.mxu1 %v2674_v40  ;;  %3442 = vst.msk [vmem:[%s5773_s25 + $0x70] sm:$0xff] %vm2398_vm3, %v2859_v58 }
 0x43b   : > { %v3141_v7 = vpop.f32.mrf.mxu1  ;;  %v2861_v53 = vpop.f32.mrf.mxu0 }
 0x43d   : > { %v3144_v52 = vpop.f32.mrf.mxu1  ;;  %3383 = vmatmul.mubr.f32.gmra.mxu1 %v2673_v2  ;;  %v2864_v31 = vpop.f32.mrf.mxu0 }
 0x43e   : > { %3499 = vst.msk [vmem:[%s5773_s25 + $0x238] sm:$0xff] %vm2398_vm3, %v3144_v52  ;;  %3387 = vmatprep.mubr.f32.mxu1 %v2676_v26  ;;  %3443 = vst.msk [vmem:[%s5773_s25 + $0x78] sm:$0xff] %vm2398_vm3, %v2864_v31 }
 0x43f   : > { %v3146_v63 = vpop.f32.mrf.mxu1  ;;  %v2866_v17 = vpop.f32.mrf.mxu0 }
 0x441   : > { %v3149_v22 = vpop.f32.mrf.mxu1  ;;  %3388 = vmatmul.mubr.f32.gmra.mxu1 %v2675_v29  ;;  %v2869_v13 = vpop.f32.mrf.mxu0 }
 0x442   : > { %3500 = vst.msk [vmem:[%s5773_s25 + $0x240] sm:$0xff] %vm2398_vm3, %v3149_v22  ;;  %3392 = vmatprep.mubr.f32.mxu1 %v2678_v54  ;;  %3444 = vst.msk [vmem:[%s5773_s25 + $0x80] sm:$0xff] %vm2398_vm3, %v2869_v13 }
 0x443   : > { %v3151_v59 = vpop.f32.mrf.mxu1  ;;  %v2871_v43 = vpop.f32.mrf.mxu0 }
 0x445   : > { %v3154_v50 = vpop.f32.mrf.mxu1  ;;  %3393 = vmatmul.mubr.f32.gmra.mxu1 %v2677_v1  ;;  %v2874_v18 = vpop.f32.mrf.mxu0 }
 0x446   : > { %3501 = vst.msk [vmem:[%s5773_s25 + $0x248] sm:$0xff] %vm2398_vm3, %v3154_v50  ;;  %3397 = vmatprep.mubr.f32.mxu1 %v2680_v57  ;;  %3445 = vst.msk [vmem:[%s5773_s25 + $0x88] sm:$0xff] %vm2398_vm3, %v2874_v18 }
 0x447   : > { %v3156_v10 = vpop.f32.mrf.mxu1  ;;  %v2876_v32 = vpop.f32.mrf.mxu0 }
 0x449   : > { %v3159_v56 = vpop.f32.mrf.mxu1  ;;  %3398 = vmatmul.mubr.f32.gmra.mxu1 %v2679_v30  ;;  %v2879_v12 = vpop.f32.mrf.mxu0 }
 0x44a   : > { %3502 = vst.msk [vmem:[%s5773_s25 + $0x250] sm:$0xff] %vm2398_vm3, %v3159_v56  ;;  %3402 = vmatprep.mubr.f32.mxu1 %v2682_v51  ;;  %3446 = vst.msk [vmem:[%s5773_s25 + $0x90] sm:$0xff] %vm2398_vm3, %v2879_v12 }
 0x44b   : > { %v3161_v16 = vpop.f32.mrf.mxu1  ;;  %v2881_v34 = vpop.f32.mrf.mxu0 }
 0x44d   : > { %v3164_v38 = vpop.f32.mrf.mxu1  ;;  %3403 = vmatmul.mubr.f32.gmra.mxu1 %v2681_v21  ;;  %v2884_v28 = vpop.f32.mrf.mxu0 }
 0x44e   : > { %3503 = vst.msk [vmem:[%s5773_s25 + $0x258] sm:$0xff] %vm2398_vm3, %v3164_v38  ;;  %3407 = vmatprep.mubr.f32.mxu1 %v2684_v33  ;;  %3447 = vst.msk [vmem:[%s5773_s25 + $0x98] sm:$0xff] %vm2398_vm3, %v2884_v28 }
 0x44f   : > { %v3166_v42 = vpop.f32.mrf.mxu1  ;;  %v2886_v8 = vpop.f32.mrf.mxu0 }
 0x451   : > { %v3169_v60 = vpop.f32.mrf.mxu1  ;;  %3408 = vmatmul.mubr.f32.gmra.mxu1 %v2683_v36  ;;  %v2889_v35 = vpop.f32.mrf.mxu0 }
 0x452   : > { %3504 = vst.msk [vmem:[%s5773_s25 + $0x260] sm:$0xff] %vm2398_vm3, %v3169_v60  ;;  %3412 = vmatprep.mubr.f32.mxu1 %v2686_v15  ;;  %3448 = vst.msk [vmem:[%s5773_s25 + $0xa0] sm:$0xff] %vm2398_vm3, %v2889_v35 }
 0x453   : > { %v3171_v19 = vpop.f32.mrf.mxu1  ;;  %v2891_v45 = vpop.f32.mrf.mxu0 }
 0x455   : > { %v3174_v62 = vpop.f32.mrf.mxu1  ;;  %3413 = vmatmul.mubr.f32.gmra.mxu1 %v2685_v14  ;;  %v2894_v5 = vpop.f32.mrf.mxu0 }
 0x456   : > { %3505 = vst.msk [vmem:[%s5773_s25 + $0x268] sm:$0xff] %vm2398_vm3, %v3174_v62  ;;  %3417 = vmatprep.mubr.f32.mxu1 %v2688_v47  ;;  %3449 = vst.msk [vmem:[%s5773_s25 + $0xa8] sm:$0xff] %vm2398_vm3, %v2894_v5 }
 0x457   : > { %v3176_v27 = vpop.f32.mrf.mxu1  ;;  %v2896_v23 = vpop.f32.mrf.mxu0 }
 0x459   : > { %v3179_v9 = vpop.f32.mrf.mxu1  ;;  %3418 = vmatmul.mubr.f32.gmra.mxu1 %v2687_v55  ;;  %v2899_v11 = vpop.f32.mrf.mxu0 }
 0x45a   : > { %3506 = vst.msk [vmem:[%s5773_s25 + $0x270] sm:$0xff] %vm2398_vm3, %v3179_v9  ;;  %3422 = vmatprep.mubr.f32.mxu1 %v2690_v39  ;;  %3450 = vst.msk [vmem:[%s5773_s25 + $0xb0] sm:$0xff] %vm2398_vm3, %v2899_v11 }
 0x45b   : > { %v3181_v46 = vpop.f32.mrf.mxu1  ;;  %v2901_v37 = vpop.f32.mrf.mxu0 }
 0x45d   : > { %v3184_v3 = vpop.f32.mrf.mxu1  ;;  %3423 = vmatmul.mubr.f32.gmra.mxu1 %v2689_v25  ;;  %v2904_v49 = vpop.f32.mrf.mxu0 }
 0x45e   : > { %3507 = vst.msk [vmem:[%s5773_s25 + $0x278] sm:$0xff] %vm2398_vm3, %v3184_v3  ;;  %3451 = vst.msk [vmem:[%s5773_s25 + $0xb8] sm:$0xff] %vm2398_vm3, %v2904_v49 }
 0x45f   : > { %v3186_v48 = vpop.f32.mrf.mxu1  ;;  %v2906_v0 = vpop.f32.mrf.mxu0 }
 0x461   : > { %v3189_v20 = vpop.f32.mrf.mxu1  ;;  %v2909_v44 = vpop.f32.mrf.mxu0 }
 0x462   : > { %3508 = vst.msk [vmem:[%s5773_s25 + $0x280] sm:$0xff] %vm2398_vm3, %v3189_v20  ;;  %3452 = vst.msk [vmem:[%s5773_s25 + $0xc0] sm:$0xff] %vm2398_vm3, %v2909_v44 }
 0x463   : > { %v3191_v24 = vpop.f32.mrf.mxu1  ;;  %v2911_v61 = vpop.f32.mrf.mxu0 }
 0x465   : > { %v3194_v4 = vpop.f32.mrf.mxu1  ;;  %v2914_v40 = vpop.f32.mrf.mxu0 }
 0x466   : > { %3509 = vst.msk [vmem:[%s5773_s25 + $0x288] sm:$0xff] %vm2398_vm3, %v3194_v4  ;;  %3453 = vst.msk [vmem:[%s5773_s25 + $0xc8] sm:$0xff] %vm2398_vm3, %v2914_v40 }
 0x467   : > { %v3196_v41 = vpop.f32.mrf.mxu1  ;;  %v2916_v6 = vpop.f32.mrf.mxu0 }
 0x469   : > { %v3199_v58 = vpop.f32.mrf.mxu1  ;;  %v2919_v2 = vpop.f32.mrf.mxu0 }
 0x46a   : > { %3510 = vst.msk [vmem:[%s5773_s25 + $0x290] sm:$0xff] %vm2398_vm3, %v3199_v58  ;;  %3454 = vst.msk [vmem:[%s5773_s25 + $0xd0] sm:$0xff] %vm2398_vm3, %v2919_v2 }
 0x46b   : > { %v3201_v7 = vpop.f32.mrf.mxu1  ;;  %v2921_v26 = vpop.f32.mrf.mxu0 }
 0x46d   : > { %v3204_v53 = vpop.f32.mrf.mxu1  ;;  %v2924_v52 = vpop.f32.mrf.mxu0 }
 0x46e   : > { %3511 = vst.msk [vmem:[%s5773_s25 + $0x298] sm:$0xff] %vm2398_vm3, %v3204_v53  ;;  %3455 = vst.msk [vmem:[%s5773_s25 + $0xd8] sm:$0xff] %vm2398_vm3, %v2924_v52 }
 0x46f   : > { %v3206_v31 = vpop.f32.mrf.mxu1  ;;  %v2926_v29 = vpop.f32.mrf.mxu0 }
 0x471   : > { %v3209_v63 = vpop.f32.mrf.mxu1  ;;  %v2929_v54 = vpop.f32.mrf.mxu0 }
 0x472   : > { %3512 = vst.msk [vmem:[%s5773_s25 + $0x2a0] sm:$0xff] %vm2398_vm3, %v3209_v63  ;;  %3456 = vst.msk [vmem:[%s5773_s25 + $0xe0] sm:$0xff] %vm2398_vm3, %v2929_v54 }
 0x473   : > { %v3211_v17 = vpop.f32.mrf.mxu1  ;;  %v2931_v22 = vpop.f32.mrf.mxu0 }
 0x475   : > { %v3214_v13 = vpop.f32.mrf.mxu1  ;;  %v2934_v1 = vpop.f32.mrf.mxu0 }
 0x476   : > { %3513 = vst.msk [vmem:[%s5773_s25 + $0x2a8] sm:$0xff] %vm2398_vm3, %v3214_v13  ;;  %3457 = vst.msk [vmem:[%s5773_s25 + $0xe8] sm:$0xff] %vm2398_vm3, %v2934_v1 }
 0x477   : > { %v3216_v59 = vpop.f32.mrf.mxu1  ;;  %v2936_v57 = vpop.f32.mrf.mxu0 }
 0x479   : > { %v3219_v43 = vpop.f32.mrf.mxu1  ;;  %v2939_v50 = vpop.f32.mrf.mxu0 }
 0x47a   : > { %3514 = vst.msk [vmem:[%s5773_s25 + $0x2b0] sm:$0xff] %vm2398_vm3, %v3219_v43  ;;  %3458 = vst.msk [vmem:[%s5773_s25 + $0xf0] sm:$0xff] %vm2398_vm3, %v2939_v50 }
 0x47b   : > { %v3221_v18 = vpop.f32.mrf.mxu1  ;;  %v2941_v30 = vpop.f32.mrf.mxu0 }
 0x47d   : > { %v3224_v10 = vpop.f32.mrf.mxu1  ;;  %v2944_v51 = vpop.f32.mrf.mxu0 }
 0x47e   : > { %3515 = vst.msk [vmem:[%s5773_s25 + $0x2b8] sm:$0xff] %vm2398_vm3, %v3224_v10  ;;  %3459 = vst.msk [vmem:[%s5773_s25 + $0xf8] sm:$0xff] %vm2398_vm3, %v2944_v51 }
 0x47f   : > { %v3226_v32 = vpop.f32.mrf.mxu1  ;;  %v2946_v56 = vpop.f32.mrf.mxu0 }
 0x481   : > { %v3229_v12 = vpop.f32.mrf.mxu1  ;;  %v2949_v21 = vpop.f32.mrf.mxu0 }
 0x482   : > { %3516 = vst.msk [vmem:[%s5773_s25 + $0x2c0] sm:$0xff] %vm2398_vm3, %v3229_v12  ;;  %3460 = vst.msk [vmem:[%s5773_s25 + $0x100] sm:$0xff] %vm2398_vm3, %v2949_v21 }
 0x483   : > { %v3231_v16 = vpop.f32.mrf.mxu1  ;;  %v2951_v33 = vpop.f32.mrf.mxu0 }
 0x485   : > { %v3234_v34 = vpop.f32.mrf.mxu1  ;;  %v2954_v38 = vpop.f32.mrf.mxu0 }
 0x486   : > { %3517 = vst.msk [vmem:[%s5773_s25 + $0x2c8] sm:$0xff] %vm2398_vm3, %v3234_v34  ;;  %3461 = vst.msk [vmem:[%s5773_s25 + $0x108] sm:$0xff] %vm2398_vm3, %v2954_v38 }
 0x487   : > { %v3236_v28 = vpop.f32.mrf.mxu1  ;;  %v2956_v36 = vpop.f32.mrf.mxu0 }
 0x489   : > { %v3239_v42 = vpop.f32.mrf.mxu1  ;;  %v2959_v15 = vpop.f32.mrf.mxu0 }
 0x48a   : > { %3518 = vst.msk [vmem:[%s5773_s25 + $0x2d0] sm:$0xff] %vm2398_vm3, %v3239_v42  ;;  %3462 = vst.msk [vmem:[%s5773_s25 + $0x110] sm:$0xff] %vm2398_vm3, %v2959_v15 }
 0x48b   : > { %v3241_v8 = vpop.f32.mrf.mxu1  ;;  %v2961_v60 = vpop.f32.mrf.mxu0 }
 0x48d   : > { %v3244_v35 = vpop.f32.mrf.mxu1  ;;  %v2964_v14 = vpop.f32.mrf.mxu0 }
 0x48e   : > { %3519 = vst.msk [vmem:[%s5773_s25 + $0x2d8] sm:$0xff] %vm2398_vm3, %v3244_v35  ;;  %3463 = vst.msk [vmem:[%s5773_s25 + $0x118] sm:$0xff] %vm2398_vm3, %v2964_v14 }
 0x48f   : > { %v3246_v19 = vpop.f32.mrf.mxu1  ;;  %v2966_v47 = vpop.f32.mrf.mxu0 }
 0x491   : > { %v3249_v45 = vpop.f32.mrf.mxu1  ;;  %v2969_v62 = vpop.f32.mrf.mxu0 }
 0x492   : > { %3520 = vst.msk [vmem:[%s5773_s25 + $0x2e0] sm:$0xff] %vm2398_vm3, %v3249_v45  ;;  %3464 = vst.msk [vmem:[%s5773_s25 + $0x120] sm:$0xff] %vm2398_vm3, %v2969_v62 }
 0x493   : > { %v3251_v5 = vpop.f32.mrf.mxu1  ;;  %v2971_v55 = vpop.f32.mrf.mxu0 }
 0x495   : > { %v3254_v27 = vpop.f32.mrf.mxu1  ;;  %v2974_v39 = vpop.f32.mrf.mxu0 }
 0x496   : > { %3521 = vst.msk [vmem:[%s5773_s25 + $0x2e8] sm:$0xff] %vm2398_vm3, %v3254_v27  ;;  %3465 = vst.msk [vmem:[%s5773_s25 + $0x128] sm:$0xff] %vm2398_vm3, %v2974_v39 }
 0x497   : > { %v3256_v23 = vpop.f32.mrf.mxu1  ;;  %v2976_v9 = vpop.f32.mrf.mxu0 }
 0x499   : > { %v3259_v11 = vpop.f32.mrf.mxu1  ;;  %v2979_v25 = vpop.f32.mrf.mxu0 }
 0x49a   : > { %3522 = vst.msk [vmem:[%s5773_s25 + $0x2f0] sm:$0xff] %vm2398_vm3, %v3259_v11  ;;  %3466 = vst.msk [vmem:[%s5773_s25 + $0x130] sm:$0xff] %vm2398_vm3, %v2979_v25 }
 0x49b   : > { %v3261_v46 = vpop.f32.mrf.mxu1  ;;  %v2981_v37 = vpop.f32.mrf.mxu0 }
 0x49d   : > { %v3264_v3 = vpop.f32.mrf.mxu1  ;;  %v2984_v49 = vpop.f32.mrf.mxu0 }
 0x49e   : > { %3523 = vst.msk [vmem:[%s5773_s25 + $0x2f8] sm:$0xff] %vm2398_vm3, %v3264_v3  ;;  %3467 = vst.msk [vmem:[%s5773_s25 + $0x138] sm:$0xff] %vm2398_vm3, %v2984_v49 }
 0x49f   : > { %v3266_v48 = vpop.f32.mrf.mxu1  ;;  %v2986_v0 = vpop.f32.mrf.mxu0 }
 0x4a1   : > { %v3269_v20 = vpop.f32.mrf.mxu1  ;;  %v2989_v44 = vpop.f32.mrf.mxu0 }
 0x4a2   : > { %3524 = vst.msk [vmem:[%s5773_s25 + $0x300] sm:$0xff] %vm2398_vm3, %v3269_v20  ;;  %3468 = vst.msk [vmem:[%s5773_s25 + $0x140] sm:$0xff] %vm2398_vm3, %v2989_v44 }
 0x4a3   : > { %v3271_v24 = vpop.f32.mrf.mxu1  ;;  %v2991_v61 = vpop.f32.mrf.mxu0 }
 0x4a5   : > { %v3274_v4 = vpop.f32.mrf.mxu1  ;;  %v2994_v40 = vpop.f32.mrf.mxu0 }
 0x4a6   : > { %3525 = vst.msk [vmem:[%s5773_s25 + $0x308] sm:$0xff] %vm2398_vm3, %v3274_v4  ;;  %3469 = vst.msk [vmem:[%s5773_s25 + $0x148] sm:$0xff] %vm2398_vm3, %v2994_v40 }
 0x4a7   : > { %v3276_v41 = vpop.f32.mrf.mxu1  ;;  %v2996_v6 = vpop.f32.mrf.mxu0 }
 0x4a9   : > { %v3279_v58 = vpop.f32.mrf.mxu1  ;;  %v2999_v2 = vpop.f32.mrf.mxu0 }
 0x4aa   : > { %3526 = vst.msk [vmem:[%s5773_s25 + $0x310] sm:$0xff] %vm2398_vm3, %v3279_v58  ;;  %3470 = vst.msk [vmem:[%s5773_s25 + $0x150] sm:$0xff] %vm2398_vm3, %v2999_v2 }
 0x4ab   : > { %v3281_v7 = vpop.f32.mrf.mxu1  ;;  %v3001_v26 = vpop.f32.mrf.mxu0 }
 0x4ad   : > { %v3284_v53 = vpop.f32.mrf.mxu1  ;;  %v3004_v52 = vpop.f32.mrf.mxu0 }
 0x4ae   : > { %3527 = vst.msk [vmem:[%s5773_s25 + $0x318] sm:$0xff] %vm2398_vm3, %v3284_v53  ;;  %3471 = vst.msk [vmem:[%s5773_s25 + $0x158] sm:$0xff] %vm2398_vm3, %v3004_v52 }
 0x4af   : > { %v3286_v31 = vpop.f32.mrf.mxu1  ;;  %v3006_v29 = vpop.f32.mrf.mxu0 }
 0x4b1   : > { %v3289_v63 = vpop.f32.mrf.mxu1  ;;  %v3009_v54 = vpop.f32.mrf.mxu0 }
 0x4b2   : > { %3528 = vst.msk [vmem:[%s5773_s25 + $0x320] sm:$0xff] %vm2398_vm3, %v3289_v63  ;;  %3472 = vst.msk [vmem:[%s5773_s25 + $0x160] sm:$0xff] %vm2398_vm3, %v3009_v54 }
 0x4b3   : > { %v3291_v17 = vpop.f32.mrf.mxu1  ;;  %v3011_v22 = vpop.f32.mrf.mxu0 }
 0x4b5   : > { %v3294_v13 = vpop.f32.mrf.mxu1  ;;  %v3014_v1 = vpop.f32.mrf.mxu0 }
 0x4b6   : > { %3529 = vst.msk [vmem:[%s5773_s25 + $0x328] sm:$0xff] %vm2398_vm3, %v3294_v13  ;;  %3473 = vst.msk [vmem:[%s5773_s25 + $0x168] sm:$0xff] %vm2398_vm3, %v3014_v1 }
 0x4b7   : > { %v3296_v59 = vpop.f32.mrf.mxu1  ;;  %v3016_v57 = vpop.f32.mrf.mxu0 }
 0x4b9   : > { %v3299_v43 = vpop.f32.mrf.mxu1  ;;  %v3019_v50 = vpop.f32.mrf.mxu0 }
 0x4ba   : > { %3530 = vst.msk [vmem:[%s5773_s25 + $0x330] sm:$0xff] %vm2398_vm3, %v3299_v43  ;;  %3474 = vst.msk [vmem:[%s5773_s25 + $0x170] sm:$0xff] %vm2398_vm3, %v3019_v50 }
 0x4bb   : > { %v3301_v18 = vpop.f32.mrf.mxu1  ;;  %v3021_v30 = vpop.f32.mrf.mxu0 }
 0x4bd   : > { %v3304_v10 = vpop.f32.mrf.mxu1  ;;  %v3024_v51 = vpop.f32.mrf.mxu0 }
 0x4be   : > { %3531 = vst.msk [vmem:[%s5773_s25 + $0x338] sm:$0xff] %vm2398_vm3, %v3304_v10  ;;  %3475 = vst.msk [vmem:[%s5773_s25 + $0x178] sm:$0xff] %vm2398_vm3, %v3024_v51 }
 0x4bf   : > { %v3306_v32 = vpop.f32.mrf.mxu1  ;;  %v3026_v56 = vpop.f32.mrf.mxu0 }
 0x4c1   : > { %v3309_v12 = vpop.f32.mrf.mxu1  ;;  %v3029_v21 = vpop.f32.mrf.mxu0 }
 0x4c2   : > { %3532 = vst.msk [vmem:[%s5773_s25 + $0x340] sm:$0xff] %vm2398_vm3, %v3309_v12  ;;  %3476 = vst.msk [vmem:[%s5773_s25 + $0x180] sm:$0xff] %vm2398_vm3, %v3029_v21 }
 0x4c3   : > { %v3311_v16 = vpop.f32.mrf.mxu1  ;;  %v3031_v33 = vpop.f32.mrf.mxu0 }
 0x4c5   : > { %v3314_v34 = vpop.f32.mrf.mxu1  ;;  %v3034_v38 = vpop.f32.mrf.mxu0 }
 0x4c6   : > { %3533 = vst.msk [vmem:[%s5773_s25 + $0x348] sm:$0xff] %vm2398_vm3, %v3314_v34  ;;  %3477 = vst.msk [vmem:[%s5773_s25 + $0x188] sm:$0xff] %vm2398_vm3, %v3034_v38 }
 0x4c7   : > { %v3316_v28 = vpop.f32.mrf.mxu1  ;;  %v3036_v36 = vpop.f32.mrf.mxu0 }
 0x4c9   : > { %v3319_v42 = vpop.f32.mrf.mxu1  ;;  %v3039_v15 = vpop.f32.mrf.mxu0 }
 0x4ca   : > { %3534 = vst.msk [vmem:[%s5773_s25 + $0x350] sm:$0xff] %vm2398_vm3, %v3319_v42  ;;  %3478 = vst.msk [vmem:[%s5773_s25 + $0x190] sm:$0xff] %vm2398_vm3, %v3039_v15 }
 0x4cb   : > { %v3321_v8 = vpop.f32.mrf.mxu1  ;;  %v3041_v60 = vpop.f32.mrf.mxu0 }
 0x4cd   : > { %v3324_v35 = vpop.f32.mrf.mxu1  ;;  %v3044_v14 = vpop.f32.mrf.mxu0 }
 0x4ce   : > { %3535 = vst.msk [vmem:[%s5773_s25 + $0x358] sm:$0xff] %vm2398_vm3, %v3324_v35  ;;  %3479 = vst.msk [vmem:[%s5773_s25 + $0x198] sm:$0xff] %vm2398_vm3, %v3044_v14 }
 0x4cf   : > { %v3326_v19 = vpop.f32.mrf.mxu1  ;;  %v3046_v47 = vpop.f32.mrf.mxu0 }
 0x4d1   : > { %v3329_v45 = vpop.f32.mrf.mxu1  ;;  %v3049_v62 = vpop.f32.mrf.mxu0 }
 0x4d2   : > { %3536 = vst.msk [vmem:[%s5773_s25 + $0x360] sm:$0xff] %vm2398_vm3, %v3329_v45  ;;  %3480 = vst.msk [vmem:[%s5773_s25 + $0x1a0] sm:$0xff] %vm2398_vm3, %v3049_v62 }
 0x4d3   : > { %v3331_v5 = vpop.f32.mrf.mxu1  ;;  %v3051_v55 = vpop.f32.mrf.mxu0 }
 0x4d5   : > { %v3334_v27 = vpop.f32.mrf.mxu1  ;;  %v3054_v39 = vpop.f32.mrf.mxu0 }
 0x4d6   : > { %3537 = vst.msk [vmem:[%s5773_s25 + $0x368] sm:$0xff] %vm2398_vm3, %v3334_v27  ;;  %3481 = vst.msk [vmem:[%s5773_s25 + $0x1a8] sm:$0xff] %vm2398_vm3, %v3054_v39 }
 0x4d7   : > { %v3336_v23 = vpop.f32.mrf.mxu1  ;;  %v3056_v9 = vpop.f32.mrf.mxu0 }
 0x4d9   : > { %v3339_v11 = vpop.f32.mrf.mxu1  ;;  %v3059_v25 = vpop.f32.mrf.mxu0 }
 0x4da   : > { %3538 = vst.msk [vmem:[%s5773_s25 + $0x370] sm:$0xff] %vm2398_vm3, %v3339_v11  ;;  %3482 = vst.msk [vmem:[%s5773_s25 + $0x1b0] sm:$0xff] %vm2398_vm3, %v3059_v25 }
 0x4db   : > { %v3341_v46 = vpop.f32.mrf.mxu1  ;;  %v3061_v37 = vpop.f32.mrf.mxu0 }
 0x4dd   : > { %v3344_v3 = vpop.f32.mrf.mxu1  ;;  %v3064_v49 = vpop.f32.mrf.mxu0 }
 0x4de   : > { %3539 = vst.msk [vmem:[%s5773_s25 + $0x378] sm:$0xff] %vm2398_vm3, %v3344_v3  ;;  %3483 = vst.msk [vmem:[%s5773_s25 + $0x1b8] sm:$0xff] %vm2398_vm3, %v3064_v49 }
 0x4df   : > { %v3346_v48 = vpop.f32.mrf.mxu1  ;;  %v3066_v0 = vpop.f32.mrf.mxu0 }
 0x4e1   : > { %v3349_v20 = vpop.f32.mrf.mxu1 }
 0x4e2   : > { %3540 = vst.msk [vmem:[%s5773_s25 + $0x380] sm:$0xff] %vm2398_vm3, %v3349_v20 }
 0x4e3   : > { %v3351_v44 = vpop.f32.mrf.mxu1 }
 0x4e5   : > { %v3354_v24 = vpop.f32.mrf.mxu1 }
 0x4e6   : > { %3541 = vst.msk [vmem:[%s5773_s25 + $0x388] sm:$0xff] %vm2398_vm3, %v3354_v24 }
 0x4e7   : > { %v3356_v61 = vpop.f32.mrf.mxu1 }
 0x4e9   : > { %v3359_v4 = vpop.f32.mrf.mxu1 }
 0x4ea   : > { %3542 = vst.msk [vmem:[%s5773_s25 + $0x390] sm:$0xff] %vm2398_vm3, %v3359_v4 }
 0x4eb   : > { %v3361_v40 = vpop.f32.mrf.mxu1 }
 0x4ed   : > { %v3364_v41 = vpop.f32.mrf.mxu1 }
 0x4ee   : > { %3543 = vst.msk [vmem:[%s5773_s25 + $0x398] sm:$0xff] %vm2398_vm3, %v3364_v41 }
 0x4ef   : > { %v3366_v6 = vpop.f32.mrf.mxu1 }
 0x4f1   : > { %v3369_v58 = vpop.f32.mrf.mxu1 }
 0x4f2   : > { %3544 = vst.msk [vmem:[%s5773_s25 + $0x3a0] sm:$0xff] %vm2398_vm3, %v3369_v58 }
 0x4f3   : > { %v3371_v2 = vpop.f32.mrf.mxu1 }
 0x4f5   : > { %v3374_v7 = vpop.f32.mrf.mxu1 }
 0x4f6   : > { %3545 = vst.msk [vmem:[%s5773_s25 + $0x3a8] sm:$0xff] %vm2398_vm3, %v3374_v7 }
 0x4f7   : > { %v3376_v26 = vpop.f32.mrf.mxu1 }
 0x4f9   : > { %v3379_v53 = vpop.f32.mrf.mxu1 }
 0x4fa   : > { %3546 = vst.msk [vmem:[%s5773_s25 + $0x3b0] sm:$0xff] %vm2398_vm3, %v3379_v53 }
 0x4fb   : > { %v3381_v52 = vpop.f32.mrf.mxu1 }
 0x4fd   : > { %v3384_v31 = vpop.f32.mrf.mxu1 }
 0x4fe   : > { %3547 = vst.msk [vmem:[%s5773_s25 + $0x3b8] sm:$0xff] %vm2398_vm3, %v3384_v31 }
 0x4ff   : > { %v3386_v29 = vpop.f32.mrf.mxu1 }
 0x501   : > { %v3389_v63 = vpop.f32.mrf.mxu1 }
 0x502   : > { %3548 = vst.msk [vmem:[%s5773_s25 + $0x3c0] sm:$0xff] %vm2398_vm3, %v3389_v63 }
 0x503   : > { %v3391_v54 = vpop.f32.mrf.mxu1 }
 0x505   : > { %v3394_v17 = vpop.f32.mrf.mxu1 }
 0x506   : > { %3549 = vst.msk [vmem:[%s5773_s25 + $0x3c8] sm:$0xff] %vm2398_vm3, %v3394_v17 }
 0x507   : > { %v3396_v22 = vpop.f32.mrf.mxu1 }
 0x509   : > { %v3399_v13 = vpop.f32.mrf.mxu1 }
 0x50a   : > { %3550 = vst.msk [vmem:[%s5773_s25 + $0x3d0] sm:$0xff] %vm2398_vm3, %v3399_v13 }
 0x50b   : > { %v3401_v1 = vpop.f32.mrf.mxu1 }
 0x50d   : > { %v3404_v59 = vpop.f32.mrf.mxu1 }
 0x50e   : > { %3551 = vst.msk [vmem:[%s5773_s25 + $0x3d8] sm:$0xff] %vm2398_vm3, %v3404_v59 }
 0x50f   : > { %v3406_v57 = vpop.f32.mrf.mxu1 }
 0x511   : > { %v3409_v43 = vpop.f32.mrf.mxu1 }
 0x512   : > { %3552 = vst.msk [vmem:[%s5773_s25 + $0x3e0] sm:$0xff] %vm2398_vm3, %v3409_v43 }
 0x513   : > { %v3411_v50 = vpop.f32.mrf.mxu1 }
 0x515   : > { %v3414_v18 = vpop.f32.mrf.mxu1 }
 0x516   : > { %3553 = vst.msk [vmem:[%s5773_s25 + $0x3e8] sm:$0xff] %vm2398_vm3, %v3414_v18 }
 0x517   : > { %v3416_v30 = vpop.f32.mrf.mxu1 }
 0x519   : > { %v3419_v10 = vpop.f32.mrf.mxu1 }
 0x51a   : > { %3554 = vst.msk [vmem:[%s5773_s25 + $0x3f0] sm:$0xff] %vm2398_vm3, %v3419_v10 }
 0x51b   : > { %v3421_v51 = vpop.f32.mrf.mxu1 }
 0x51d   : > { %v3424_v32 = vpop.f32.mrf.mxu1 }
 0x51e   : > { %3555 = vst.msk [vmem:[%s5773_s25 + $0x3f8] sm:$0xff] %vm2398_vm3, %v3424_v32 }
 0x51f   : > { %v3426_v56 = vpop.f32.mrf.mxu1 }
 0x520 PF: > { %s15_s20 = sadd.s32 1, %s4103_s20   ;;  %s6226_s18 = smov %s4099_s19 }
 0x521   : > { %p12_p5 = scmp.ge.s32.totalorder %s15_s20, 4   ;;  %s6227_s19 = smov %s6229_s21 }
 0x523   :  { %14 = sbr.rel (!%p12_p5) target bundleno = 2 (0x2), region = 78 }

</bundles_post_ra>
